<compile_context>
chip_gen: v7x
topology: tpu7x:2x2x1
jax: 0.10.0
libtpu: 0.0.40
codegen_flags: <defaults>
</compile_context>

<pallas_src>
import functools

import jax
import jax.numpy as jnp
from jax import lax
from jax.experimental import pallas as pl
from jax.experimental.pallas import tpu as pltpu

BN_EPS = 1e-5
OUT_PAD = 128                    # lane-dense padding for narrow FC outputs (9, k)
VMEM_LIMIT = 32 * 1024 * 1024    # v7x-safe scoped VMEM request
MAX_POINT_TILE = 2048            # ~15 MiB live set; keeps headroom under VMEM_LIMIT


# ---------------------------------------------------------------------------
# Kernel 1/3: fused point-MLP (3 -> 64 -> 128 -> 1024) + running max over points
# ---------------------------------------------------------------------------
def _point_mlp_max_kernel(x_ref, w1_ref, b1_ref, w2_ref, b2_ref, w3_ref, b3_ref,
                          o_ref, *, relu_last):
    t = pl.program_id(1)

    @pl.when(t == 0)
    def _():
        o_ref[...] = jnp.full(o_ref.shape, -jnp.inf, o_ref.dtype)

    x = x_ref[0]                                      # (tn, 3) f32
    w1 = w1_ref[0]                                    # (3, 64) f32 (BN + optional 3x3 transform folded)

    # layer 1: 3 -> 64, K=3 as broadcast-FMAs on the VPU (K=3 would waste the MXU).
    h = (x[:, 0:1] * w1[0:1, :]
         + x[:, 1:2] * w1[1:2, :]
         + x[:, 2:3] * w1[2:3, :]) + b1_ref[...]
    h = jnp.maximum(h, 0.0)

    # layer 2: 64 -> 128 on the MXU (bf16 in, f32 accumulate).
    h = jnp.dot(h.astype(jnp.bfloat16), w2_ref[...],
                preferred_element_type=jnp.float32) + b2_ref[...]
    h = jnp.maximum(h, 0.0)

    # layer 3: 128 -> 1024 on the MXU. Bias/ReLU are hoisted past the max (exact).
    h = jnp.dot(h.astype(jnp.bfloat16), w3_ref[...],
                preferred_element_type=jnp.float32)

    # running max over this point tile, accumulated in the resident output block.
    tile_max = jnp.max(h, axis=0, keepdims=True)      # (1, 1024)
    o_ref[...] = jnp.maximum(o_ref[...], tile_max[None])

    # epilogue (once per batch row): bias add (+ ReLU) on the (1,1,1024) accumulator.
    @pl.when(t == pl.num_programs(1) - 1)
    def _():
        y = o_ref[...] + b3_ref[...][None]
        if relu_last:
            y = jnp.maximum(y, 0.0)
        o_ref[...] = y


def point_mlp_max(xp, w1, b1, l2, l3, *, relu_last, point_tile=1024):
    """xp: (B, N, 3) f32; w1: (Bw, 3, 64) with Bw in {1, B}. Returns (B, 1024) f32."""
    B, N, _ = xp.shape
    c_out = l3["w"].shape[1]

    # Tile choice: big tile (amortizes per-step overhead + w3 weight push), capped for
    # v7x VMEM, rounded up to a sublane multiple.
    tn = min(point_tile, MAX_POINT_TILE, N)
    tn = ((tn + 7) // 8) * 8
    n_t = pl.cdiv(N, tn)
    n_pad = n_t * tn
    if n_pad != N:
        # Pad the point axis with duplicated edge points: exact for a max over points.
        xp = jnp.pad(xp, ((0, 0), (0, n_pad - N), (0, 0)), mode="edge")

    per_batch_w1 = w1.shape[0] != 1
    w1_map = (lambda b, t: (b, 0, 0)) if per_batch_w1 else (lambda b, t: (0, 0, 0))

    kernel = functools.partial(_point_mlp_max_kernel, relu_last=relu_last)

    in_specs = [
        pl.BlockSpec((1, tn, 3), lambda b, t: (b, t, 0)),
        pl.BlockSpec((1, 3, w1.shape[2]), w1_map),
        pl.BlockSpec(b1.shape, lambda b, t: (0, 0)),
        pl.BlockSpec(l2["w"].shape, lambda b, t: (0, 0)),
        pl.BlockSpec(l2["b"].shape, lambda b, t: (0, 0)),
        pl.BlockSpec(l3["w"].shape, lambda b, t: (0, 0)),
        pl.BlockSpec(l3["b"].shape, lambda b, t: (0, 0)),
    ]

    # TODO(synk): for B=1 serving on v7x, add a leading parallel axis that splits the
    # point tiles across the two TensorCores and combine the partial maxima on the host.
    out = pl.pallas_call(
        kernel,
        out_shape=jax.ShapeDtypeStruct((B, 1, c_out), jnp.float32),
        grid=(B, n_t),
        in_specs=in_specs,
        out_specs=pl.BlockSpec((1, 1, c_out), lambda b, t: (b, 0, 0)),
        compiler_params=pltpu.CompilerParams(
            dimension_semantics=("parallel", "arbitrary"),
            vmem_limit_bytes=VMEM_LIMIT),
    )(xp, w1, b1, l2["w"], l2["b"], l3["w"], l3["b"])
    return out.reshape(B, c_out)


# ---------------------------------------------------------------------------
# Kernel 2/4: fused FC head (1024 -> 512 -> 256 -> padded 128) [+ log_softmax]
# fc1's K=1024 is chunked over a small grid so weight DMA overlaps compute.
# ---------------------------------------------------------------------------
def _fc_head_kernel(g_ref, w1_ref, b1_ref, w2_ref, b2_ref, w3_ref, b3_ref,
                    o_ref, acc_ref, *, log_softmax_out, n_valid):
    kc = pl.program_id(0)

    @pl.when(kc == 0)
    def _():
        acc_ref[...] = jnp.zeros_like(acc_ref)

    acc_ref[...] += jnp.dot(g_ref[...].astype(jnp.bfloat16), w1_ref[...],
                            preferred_element_type=jnp.float32)

    @pl.when(kc == pl.num_programs(0) - 1)
    def _():
        h = jnp.maximum(acc_ref[...] + b1_ref[...], 0.0)
        h = jnp.dot(h.astype(jnp.bfloat16), w2_ref[...],
                    preferred_element_type=jnp.float32) + b2_ref[...]
        # TODO(synk): nn.Dropout(p=0.3) on the fc2 output is identity in eval mode.
        h = jnp.maximum(h, 0.0)
        y = jnp.dot(h.astype(jnp.bfloat16), w3_ref[...],
                    preferred_element_type=jnp.float32) + b3_ref[...]   # (B, 128 padded)
        if log_softmax_out:
            lane = lax.broadcasted_iota(jnp.int32, y.shape, 1)
            valid = lane < n_valid
            ym = jnp.where(valid, y, -jnp.inf)
            m = jnp.max(ym, axis=-1, keepdims=True)
            z = ym - m
            lse = jnp.log(jnp.sum(jnp.where(valid, jnp.exp(z), 0.0),
                                  axis=-1, keepdims=True))
            y = z - lse
        o_ref[...] = y


def fc_head(g, l1, l2, l3, *, log_softmax_out, n_valid, k_chunk=256):
    """g: (B, 1024) -> (B, OUT_PAD) f32 (caller slices the valid lanes)."""
    B, K1 = g.shape
    out_w = l3["w"].shape[1]
    if K1 % k_chunk != 0:
        k_chunk = K1
    n_k = K1 // k_chunk

    kernel = functools.partial(_fc_head_kernel,
                               log_softmax_out=log_softmax_out, n_valid=n_valid)
    in_specs = [
        pl.BlockSpec((B, k_chunk), lambda kc: (0, kc)),
        pl.BlockSpec((k_chunk, l1["w"].shape[1]), lambda kc: (kc, 0)),
        pl.BlockSpec(l1["b"].shape, lambda kc: (0, 0)),
        pl.BlockSpec(l2["w"].shape, lambda kc: (0, 0)),
        pl.BlockSpec(l2["b"].shape, lambda kc: (0, 0)),
        pl.BlockSpec(l3["w"].shape, lambda kc: (0, 0)),
        pl.BlockSpec(l3["b"].shape, lambda kc: (0, 0)),
    ]
    return pl.pallas_call(
        kernel,
        out_shape=jax.ShapeDtypeStruct((B, out_w), jnp.float32),
        grid=(n_k,),
        in_specs=in_specs,
        out_specs=pl.BlockSpec((B, out_w), lambda kc: (0, 0)),
        scratch_shapes=[pltpu.VMEM((B, l1["w"].shape[1]), jnp.float32)],
        compiler_params=pltpu.CompilerParams(
            dimension_semantics=("arbitrary",),
            vmem_limit_bytes=VMEM_LIMIT),
    )(g, l1["w"], l1["b"], l2["w"], l2["b"], l3["w"], l3["b"])


# ---------------------------------------------------------------------------
# Deterministic synthetic parameters (BN folded into weights, bf16 MXU weights)
# ---------------------------------------------------------------------------
def _make_layer(key, in_c, out_c, *, bn, w_dtype, out_pad=None):
    kw, kb = jax.random.split(key)
    w = jax.random.normal(kw, (in_c, out_c), jnp.float32) / jnp.sqrt(float(in_c))
    bias = jax.random.normal(kb, (out_c,), jnp.float32) * 0.02
    if bn:
        gamma = jnp.ones((out_c,), jnp.float32)
        beta = jnp.zeros((out_c,), jnp.float32)
        mean = jnp.zeros((out_c,), jnp.float32)
        var = jnp.ones((out_c,), jnp.float32)
        scale = gamma / jnp.sqrt(var + BN_EPS)
        w = w * scale[None, :]                       # fold BN scale into weights
        bias = (bias - mean) * scale + beta          # fold BN shift into bias
    if out_pad is not None and out_pad > out_c:
        w = jnp.pad(w, ((0, 0), (0, out_pad - out_c)))
        bias = jnp.pad(bias, (0, out_pad - out_c))
    return {"w": w.astype(w_dtype), "b": bias.reshape(1, -1).astype(jnp.float32)}


def init_params(key, k_cls=2):
    specs = [
        # name,      in,   out,  bn,    dtype,        out_pad
        ("stn_c1",   3,    64,   True,  jnp.float32,  None),   # VPU layer, keep f32
        ("stn_c2",   64,   128,  True,  jnp.bfloat16, None),
        ("stn_c3",   128,  1024, True,  jnp.bfloat16, None),
        ("stn_fc1",  1024, 512,  True,  jnp.bfloat16, None),
        ("stn_fc2",  512,  256,  True,  jnp.bfloat16, None),
        ("stn_fc3",  256,  9,    False, jnp.bfloat16, OUT_PAD),
        ("f_c1",     3,    64,   True,  jnp.float32,  None),   # VPU layer, keep f32
        ("f_c2",     64,   128,  True,  jnp.bfloat16, None),
        ("f_c3",     128,  1024, True,  jnp.bfloat16, None),
        ("c_fc1",    1024, 512,  True,  jnp.bfloat16, None),
        ("c_fc2",    512,  256,  True,  jnp.bfloat16, None),
        ("c_fc3",    256,  k_cls, False, jnp.bfloat16, OUT_PAD),
    ]
    keys = jax.random.split(key, len(specs))
    return {
        name: _make_layer(k, ci, co, bn=bn, w_dtype=dt, out_pad=op)
        for k, (name, ci, co, bn, dt, op) in zip(keys, specs)
    }


# ---------------------------------------------------------------------------
# Forward pass (4 fused Pallas kernel calls + tiny JAX glue)
# ---------------------------------------------------------------------------
def pointnet_cls_forward(params, x, *, k_cls, point_tile=1024):
    """x: (B, 3, N) float32 (PyTorch NCW). Returns (log_probs, trans, trans_feat)."""
    B, C, N = x.shape
    xp = jnp.transpose(x, (0, 2, 1))                                  # (B, N, 3)

    # ---- STN3d: fused point-MLP + max-pool, then fused FC head -> 3x3 transform ----
    g_stn = point_mlp_max(xp, params["stn_c1"]["w"][None], params["stn_c1"]["b"],
                          params["stn_c2"], params["stn_c3"],
                          relu_last=True, point_tile=point_tile)
    t_pad = fc_head(g_stn, params["stn_fc1"], params["stn_fc2"], params["stn_fc3"],
                    log_softmax_out=False, n_valid=9)                  # (B, 128)
    trans = t_pad[:, :9].reshape(B, 3, 3) + jnp.eye(3, dtype=jnp.float32)[None]

    # ---- PointNetfeat (global_feat=True): fold the 3x3 transform into layer 1 ----
    # (x @ trans) @ W1 == x @ (trans @ W1): per-batch effective (3, 64) weight.
    w1_feat = jnp.einsum("bij,jk->bik", trans, params["f_c1"]["w"])    # (B, 3, 64)
    gf = point_mlp_max(xp, w1_feat, params["f_c1"]["b"],
                       params["f_c2"], params["f_c3"],
                       relu_last=False, point_tile=point_tile)
    trans_feat = None  # feature_transform=False

    # ---- classifier head + log_softmax (fused) ----
    logp_pad = fc_head(gf, params["c_fc1"], params["c_fc2"], params["c_fc3"],
                       log_softmax_out=True, n_valid=k_cls)            # (B, 128)
    logp = logp_pad[:, :k_cls]
    return logp, trans, trans_feat


if __name__ == "__main__":
    key = jax.random.PRNGKey(0)
    pkey, xkey = jax.random.split(key)

    K_CLASSES = 2
    # Small test shapes; N=200 with point_tile=64 exercises cdiv gridding + edge-pad
    # (4 point tiles per batch). Production default point_tile is 1024.
    B, N_PTS = 2, 200
    params = init_params(pkey, k_cls=K_CLASSES)
    x = jax.random.normal(xkey, (B, 3, N_PTS), jnp.float32)

    fwd = jax.jit(functools.partial(pointnet_cls_forward, params,
                                    k_cls=K_CLASSES, point_tile=64))
    logp, trans, trans_feat = fwd(x)
    jax.block_until_ready((logp, trans))

    assert logp.shape == (B, K_CLASSES)
    assert trans.shape == (B, 3, 3)
    assert trans_feat is None
    # log_softmax rows must (approximately) sum to 1 in prob space.
    assert bool(jnp.all(jnp.abs(jnp.sum(jnp.exp(logp), axis=1) - 1.0) < 1e-4))
    print("KERNEL_OK")
</pallas_src>

<mosaic_0001>
module attributes {stable_mosaic.version = 11 : i64} {
  func.func @_fc_head_kernel(%arg0: i32, %arg1: memref<2x256xf32, #tpu.memory_space<vmem>>, %arg2: memref<256x512xbf16, #tpu.memory_space<vmem>>, %arg3: memref<1x512xf32, #tpu.memory_space<vmem>>, %arg4: memref<512x256xbf16, #tpu.memory_space<vmem>>, %arg5: memref<1x256xf32, #tpu.memory_space<vmem>>, %arg6: memref<256x128xbf16, #tpu.memory_space<vmem>>, %arg7: memref<1x128xf32, #tpu.memory_space<vmem>>, %arg8: memref<2x128xf32, #tpu.memory_space<vmem>>, %arg9: memref<2x512xf32, #tpu.memory_space<vmem>>) attributes {dimension_semantics = [#tpu.dimension_semantics<arbitrary>], iteration_bounds = array<i64: 4>, scalar_prefetch = 0 : i64, scratch_operands = 1 : i64, tpu.core_type = #tpu.core_type<tc>, window_params = [{transform_indices = @transform_0, window_bounds = array<i64: 2, 256>}, {transform_indices = @transform_1, window_bounds = array<i64: 256, 512>}, {pipeline_mode = #tpu.pipeline_mode<synchronous>, transform_indices = @transform_2, window_bounds = array<i64: 1, 512>}, {pipeline_mode = #tpu.pipeline_mode<synchronous>, transform_indices = @transform_3, window_bounds = array<i64: 512, 256>}, {pipeline_mode = #tpu.pipeline_mode<synchronous>, transform_indices = @transform_4, window_bounds = array<i64: 1, 256>}, {pipeline_mode = #tpu.pipeline_mode<synchronous>, transform_indices = @transform_5, window_bounds = array<i64: 256, 128>}, {pipeline_mode = #tpu.pipeline_mode<synchronous>, transform_indices = @transform_6, window_bounds = array<i64: 1, 128>}, {pipeline_mode = #tpu.pipeline_mode<synchronous>, transform_indices = @transform_7, window_bounds = array<i64: 2, 128>}]} {
    %c0_i32 = arith.constant 0 : i32
    %0 = arith.cmpi eq, %arg0, %c0_i32 : i32
    %1 = arith.extui %0 : i1 to i32
    %c0_i32_0 = arith.constant 0 : i32
    %2 = arith.cmpi ne, %1, %c0_i32_0 : i32
    scf.if %2 {
      %cst_9 = arith.constant 0.000000e+00 : f32
      %13 = vector.broadcast %cst_9 : f32 to vector<2x512xf32>
      %c0_10 = arith.constant 0 : index
      %c0_11 = arith.constant 0 : index
      %14 = vector.load %arg9[%c0_10, %c0_11] : memref<2x512xf32, #tpu.memory_space<vmem>>, vector<2x512xf32>
      tpu.vector_store %arg9[%c0_10, %c0_11], %13 {strides = array<i32>} : memref<2x512xf32, #tpu.memory_space<vmem>>, vector<2x512xf32>,
    } else {
    }
    %c0 = arith.constant 0 : index
    %c0_1 = arith.constant 0 : index
    %3 = vector.load %arg9[%c0, %c0_1] : memref<2x512xf32, #tpu.memory_space<vmem>>, vector<2x512xf32>
    %c0_2 = arith.constant 0 : index
    %c0_3 = arith.constant 0 : index
    %4 = vector.load %arg1[%c0_2, %c0_3] : memref<2x256xf32, #tpu.memory_space<vmem>>, vector<2x256xf32>
    %5 = arith.truncf %4 : vector<2x256xf32> to vector<2x256xbf16>
    %c0_4 = arith.constant 0 : index
    %c0_5 = arith.constant 0 : index
    %6 = vector.load %arg2[%c0_4, %c0_5] : memref<256x512xbf16, #tpu.memory_space<vmem>>, vector<256x512xbf16>
    %cst = arith.constant dense<0.000000e+00> : vector<2x512xf32>
    %7 = tpu.matmul %5, %6, %cst {dimension_numbers = #tpu.dot_dimension_numbers<[1], [0], [0], [1], [0, 0, 1, 1], [], []>} : vector<2x256xbf16>, vector<256x512xbf16>, vector<2x512xf32> -> vector<2x512xf32>
    %8 = arith.addf %3, %7 : vector<2x512xf32>
    %c0_6 = arith.constant 0 : index
    %c0_7 = arith.constant 0 : index
    %9 = vector.load %arg9[%c0_6, %c0_7] : memref<2x512xf32, #tpu.memory_space<vmem>>, vector<2x512xf32>
    tpu.vector_store %arg9[%c0_6, %c0_7], %8 {strides = array<i32>} : memref<2x512xf32, #tpu.memory_space<vmem>>, vector<2x512xf32>,
    %c3_i32 = arith.constant 3 : i32
    %10 = arith.cmpi eq, %arg0, %c3_i32 : i32
    %11 = arith.extui %10 : i1 to i32
    %c0_i32_8 = arith.constant 0 : i32
    %12 = arith.cmpi ne, %11, %c0_i32_8 : i32
    scf.if %12 {
      %c0_9 = arith.constant 0 : index
      %c0_10 = arith.constant 0 : index
      %13 = vector.load %arg9[%c0_9, %c0_10] : memref<2x512xf32, #tpu.memory_space<vmem>>, vector<2x512xf32>
      %c0_11 = arith.constant 0 : index
      %c0_12 = arith.constant 0 : index
      %14 = vector.load %arg3[%c0_11, %c0_12] : memref<1x512xf32, #tpu.memory_space<vmem>>, vector<1x512xf32>
      %15 = vector.broadcast %14 : vector<1x512xf32> to vector<2x512xf32>
      %16 = arith.addf %13, %15 : vector<2x512xf32>
      %cst_13 = arith.constant 0.000000e+00 : f32
      %17 = vector.broadcast %cst_13 : f32 to vector<2x512xf32>
      %18 = arith.maximumf %16, %17 : vector<2x512xf32>
      %19 = arith.truncf %18 : vector<2x512xf32> to vector<2x512xbf16>
      %c0_14 = arith.constant 0 : index
      %c0_15 = arith.constant 0 : index
      %20 = vector.load %arg4[%c0_14, %c0_15] : memref<512x256xbf16, #tpu.memory_space<vmem>>, vector<512x256xbf16>
      %cst_16 = arith.constant dense<0.000000e+00> : vector<2x256xf32>
      %21 = tpu.matmul %19, %20, %cst_16 {dimension_numbers = #tpu.dot_dimension_numbers<[1], [0], [0], [1], [0, 0, 1, 1], [], []>} : vector<2x512xbf16>, vector<512x256xbf16>, vector<2x256xf32> -> vector<2x256xf32>
      %c0_17 = arith.constant 0 : index
      %c0_18 = arith.constant 0 : index
      %22 = vector.load %arg5[%c0_17, %c0_18] : memref<1x256xf32, #tpu.memory_space<vmem>>, vector<1x256xf32>
      %23 = vector.broadcast %22 : vector<1x256xf32> to vector<2x256xf32>
      %24 = arith.addf %21, %23 : vector<2x256xf32>
      %cst_19 = arith.constant 0.000000e+00 : f32
      %25 = vector.broadcast %cst_19 : f32 to vector<2x256xf32>
      %26 = arith.maximumf %24, %25 : vector<2x256xf32>
      %27 = arith.truncf %26 : vector<2x256xf32> to vector<2x256xbf16>
      %c0_20 = arith.constant 0 : index
      %c0_21 = arith.constant 0 : index
      %28 = vector.load %arg6[%c0_20, %c0_21] : memref<256x128xbf16, #tpu.memory_space<vmem>>, vector<256x128xbf16>
      %cst_22 = arith.constant dense<0.000000e+00> : vector<2x128xf32>
      %29 = tpu.matmul %27, %28, %cst_22 {dimension_numbers = #tpu.dot_dimension_numbers<[1], [0], [0], [1], [0, 0, 1, 1], [], []>} : vector<2x256xbf16>, vector<256x128xbf16>, vector<2x128xf32> -> vector<2x128xf32>
      %c0_23 = arith.constant 0 : index
      %c0_24 = arith.constant 0 : index
      %30 = vector.load %arg7[%c0_23, %c0_24] : memref<1x128xf32, #tpu.memory_space<vmem>>, vector<1x128xf32>
      %31 = vector.broadcast %30 : vector<1x128xf32> to vector<2x128xf32>
      %32 = arith.addf %29, %31 : vector<2x128xf32>
      %c0_25 = arith.constant 0 : index
      %c0_26 = arith.constant 0 : index
      %33 = vector.load %arg8[%c0_25, %c0_26] : memref<2x128xf32, #tpu.memory_space<vmem>>, vector<2x128xf32>
      tpu.vector_store %arg8[%c0_25, %c0_26], %32 {strides = array<i32>} : memref<2x128xf32, #tpu.memory_space<vmem>>, vector<2x128xf32>,
    } else {
    }
    return
  }
  func.func @transform_0(%arg0: i32) -> (i32, i32) {
    %c0_i32 = arith.constant 0 : i32
    %c0_i32_0 = arith.constant 0 : i32
    return %c0_i32, %arg0 : i32, i32
  }
  func.func @transform_1(%arg0: i32) -> (i32, i32) {
    %c0_i32 = arith.constant 0 : i32
    %c0_i32_0 = arith.constant 0 : i32
    return %arg0, %c0_i32 : i32, i32
  }
  func.func @transform_2(%arg0: i32) -> (i32, i32) {
    %c0_i32 = arith.constant 0 : i32
    %c0_i32_0 = arith.constant 0 : i32
    %c0_i32_1 = arith.constant 0 : i32
    return %c0_i32, %c0_i32_0 : i32, i32
  }
  func.func @transform_3(%arg0: i32) -> (i32, i32) {
    %c0_i32 = arith.constant 0 : i32
    %c0_i32_0 = arith.constant 0 : i32
    %c0_i32_1 = arith.constant 0 : i32
    return %c0_i32, %c0_i32_0 : i32, i32
  }
  func.func @transform_4(%arg0: i32) -> (i32, i32) {
    %c0_i32 = arith.constant 0 : i32
    %c0_i32_0 = arith.constant 0 : i32
    %c0_i32_1 = arith.constant 0 : i32
    return %c0_i32, %c0_i32_0 : i32, i32
  }
  func.func @transform_5(%arg0: i32) -> (i32, i32) {
    %c0_i32 = arith.constant 0 : i32
    %c0_i32_0 = arith.constant 0 : i32
    %c0_i32_1 = arith.constant 0 : i32
    return %c0_i32, %c0_i32_0 : i32, i32
  }
  func.func @transform_6(%arg0: i32) -> (i32, i32) {
    %c0_i32 = arith.constant 0 : i32
    %c0_i32_0 = arith.constant 0 : i32
    %c0_i32_1 = arith.constant 0 : i32
    return %c0_i32, %c0_i32_0 : i32, i32
  }
  func.func @transform_7(%arg0: i32) -> (i32, i32) {
    %c0_i32 = arith.constant 0 : i32
    %c0_i32_0 = arith.constant 0 : i32
    %c0_i32_1 = arith.constant 0 : i32
    return %c0_i32, %c0_i32_0 : i32, i32
  }
}

module attributes {stable_mosaic.version = 11 : i64} {
  func.func @_point_mlp_max_kernel(%arg0: i32, %arg1: i32, %arg2: memref<1x64x3xf32, #tpu.memory_space<vmem>>, %arg3: memref<1x3x64xf32, #tpu.memory_space<vmem>>, %arg4: memref<1x64xf32, #tpu.memory_space<vmem>>, %arg5: memref<64x128xbf16, #tpu.memory_space<vmem>>, %arg6: memref<1x128xf32, #tpu.memory_space<vmem>>, %arg7: memref<128x1024xbf16, #tpu.memory_space<vmem>>, %arg8: memref<1x1024xf32, #tpu.memory_space<vmem>>, %arg9: memref<1x1x1024xf32, #tpu.memory_space<vmem>>) attributes {dimension_semantics = [#tpu.dimension_semantics<parallel>, #tpu.dimension_semantics<arbitrary>], iteration_bounds = array<i64: 2, 4>, scalar_prefetch = 0 : i64, scratch_operands = 0 : i64, tpu.core_type = #tpu.core_type<tc>, window_params = [{transform_indices = @transform_0, window_bounds = array<i64: 1, 64, 3>}, {pipeline_mode = #tpu.pipeline_mode<synchronous>, transform_indices = @transform_1, window_bounds = array<i64: 1, 3, 64>}, {pipeline_mode = #tpu.pipeline_mode<synchronous>, transform_indices = @transform_2, window_bounds = array<i64: 1, 64>}, {pipeline_mode = #tpu.pipeline_mode<synchronous>, transform_indices = @transform_3, window_bounds = array<i64: 64, 128>}, {pipeline_mode = #tpu.pipeline_mode<synchronous>, transform_indices = @transform_4, window_bounds = array<i64: 1, 128>}, {pipeline_mode = #tpu.pipeline_mode<synchronous>, transform_indices = @transform_5, window_bounds = array<i64: 128, 1024>}, {pipeline_mode = #tpu.pipeline_mode<synchronous>, transform_indices = @transform_6, window_bounds = array<i64: 1, 1024>}, {transform_indices = @transform_7, window_bounds = array<i64: 1, 1, 1024>}]} {
    %c0_i32 = arith.constant 0 : i32
    %0 = arith.cmpi eq, %arg1, %c0_i32 : i32
    %1 = arith.extui %0 : i1 to i32
    %c0_i32_0 = arith.constant 0 : i32
    %2 = arith.cmpi ne, %1, %c0_i32_0 : i32
    scf.if %2 {
      %cst_25 = arith.constant 0xFF800000 : f32
      %49 = vector.broadcast %cst_25 : f32 to vector<1x1x1024xf32>
      %c0_26 = arith.constant 0 : index
      %c0_27 = arith.constant 0 : index
      %c0_28 = arith.constant 0 : index
      %50 = vector.load %arg9[%c0_26, %c0_27, %c0_28] : memref<1x1x1024xf32, #tpu.memory_space<vmem>>, vector<1x1x1024xf32>
      tpu.vector_store %arg9[%c0_26, %c0_27, %c0_28], %49 {strides = array<i32>} : memref<1x1x1024xf32, #tpu.memory_space<vmem>>, vector<1x1x1024xf32>,
    } else {
    }
    %c0 = arith.constant 0 : index
    %c0_1 = arith.constant 0 : index
    %c0_2 = arith.constant 0 : index
    %3 = vector.load %arg2[%c0, %c0_1, %c0_2] : memref<1x64x3xf32, #tpu.memory_space<vmem>>, vector<1x64x3xf32>
    %4 = vector.shape_cast %3 : vector<1x64x3xf32> to vector<64x3xf32>
    %c0_3 = arith.constant 0 : index
    %c0_4 = arith.constant 0 : index
    %c0_5 = arith.constant 0 : index
    %5 = vector.load %arg3[%c0_3, %c0_4, %c0_5] : memref<1x3x64xf32, #tpu.memory_space<vmem>>, vector<1x3x64xf32>
    %6 = vector.shape_cast %5 : vector<1x3x64xf32> to vector<3x64xf32>
    %7 = vector.extract_strided_slice %4 {offsets = [0, 0], sizes = [64, 1], strides = [1, 1]} : vector<64x3xf32> to vector<64x1xf32>
    %8 = vector.extract_strided_slice %6 {offsets = [0, 0], sizes = [1, 64], strides = [1, 1]} : vector<3x64xf32> to vector<1x64xf32>
    %9 = vector.broadcast %7 : vector<64x1xf32> to vector<64x64xf32>
    %10 = vector.broadcast %8 : vector<1x64xf32> to vector<64x64xf32>
    %11 = arith.mulf %9, %10 : vector<64x64xf32>
    %12 = vector.extract_strided_slice %4 {offsets = [0, 1], sizes = [64, 1], strides = [1, 1]} : vector<64x3xf32> to vector<64x1xf32>
    %13 = vector.extract_strided_slice %6 {offsets = [1, 0], sizes = [1, 64], strides = [1, 1]} : vector<3x64xf32> to vector<1x64xf32>
    %14 = vector.broadcast %12 : vector<64x1xf32> to vector<64x64xf32>
    %15 = vector.broadcast %13 : vector<1x64xf32> to vector<64x64xf32>
    %16 = arith.mulf %14, %15 : vector<64x64xf32>
    %17 = arith.addf %11, %16 : vector<64x64xf32>
    %18 = vector.extract_strided_slice %4 {offsets = [0, 2], sizes = [64, 1], strides = [1, 1]} : vector<64x3xf32> to vector<64x1xf32>
    %19 = vector.extract_strided_slice %6 {offsets = [2, 0], sizes = [1, 64], strides = [1, 1]} : vector<3x64xf32> to vector<1x64xf32>
    %20 = vector.broadcast %18 : vector<64x1xf32> to vector<64x64xf32>
    %21 = vector.broadcast %19 : vector<1x64xf32> to vector<64x64xf32>
    %22 = arith.mulf %20, %21 : vector<64x64xf32>
    %23 = arith.addf %17, %22 : vector<64x64xf32>
    %c0_6 = arith.constant 0 : index
    %c0_7 = arith.constant 0 : index
    %24 = vector.load %arg4[%c0_6, %c0_7] : memref<1x64xf32, #tpu.memory_space<vmem>>, vector<1x64xf32>
    %25 = vector.broadcast %24 : vector<1x64xf32> to vector<64x64xf32>
    %26 = arith.addf %23, %25 : vector<64x64xf32>
    %cst = arith.constant 0.000000e+00 : f32
    %27 = vector.broadcast %cst : f32 to vector<64x64xf32>
    %28 = arith.maximumf %26, %27 : vector<64x64xf32>
    %29 = arith.truncf %28 : vector<64x64xf32> to vector<64x64xbf16>
    %c0_8 = arith.constant 0 : index
    %c0_9 = arith.constant 0 : index
    %30 = vector.load %arg5[%c0_8, %c0_9] : memref<64x128xbf16, #tpu.memory_space<vmem>>, vector<64x128xbf16>
    %cst_10 = arith.constant dense<0.000000e+00> : vector<64x128xf32>
    %31 = tpu.matmul %29, %30, %cst_10 {dimension_numbers = #tpu.dot_dimension_numbers<[1], [0], [0], [1], [0, 0, 1, 1], [], []>} : vector<64x64xbf16>, vector<64x128xbf16>, vector<64x128xf32> -> vector<64x128xf32>
    %c0_11 = arith.constant 0 : index
    %c0_12 = arith.constant 0 : index
    %32 = vector.load %arg6[%c0_11, %c0_12] : memref<1x128xf32, #tpu.memory_space<vmem>>, vector<1x128xf32>
    %33 = vector.broadcast %32 : vector<1x128xf32> to vector<64x128xf32>
    %34 = arith.addf %31, %33 : vector<64x128xf32>
    %cst_13 = arith.constant 0.000000e+00 : f32
    %35 = vector.broadcast %cst_13 : f32 to vector<64x128xf32>
    %36 = arith.maximumf %34, %35 : vector<64x128xf32>
    %37 = arith.truncf %36 : vector<64x128xf32> to vector<64x128xbf16>
    %c0_14 = arith.constant 0 : index
    %c0_15 = arith.constant 0 : index
    %38 = vector.load %arg7[%c0_14, %c0_15] : memref<128x1024xbf16, #tpu.memory_space<vmem>>, vector<128x1024xbf16>
    %cst_16 = arith.constant dense<0.000000e+00> : vector<64x1024xf32>
    %39 = tpu.matmul %37, %38, %cst_16 {dimension_numbers = #tpu.dot_dimension_numbers<[1], [0], [0], [1], [0, 0, 1, 1], [], []>} : vector<64x128xbf16>, vector<128x1024xbf16>, vector<64x1024xf32> -> vector<64x1024xf32>
    %cst_17 = arith.constant dense<0xFF800000> : vector<1024xf32>
    %40 = vector.multi_reduction <maximumf>, %39, %cst_17 [0] : vector<64x1024xf32> to vector<1024xf32>
    %41 = vector.shape_cast %40 : vector<1024xf32> to vector<1x1024xf32>
    %c0_18 = arith.constant 0 : index
    %c0_19 = arith.constant 0 : index
    %c0_20 = arith.constant 0 : index
    %42 = vector.load %arg9[%c0_18, %c0_19, %c0_20] : memref<1x1x1024xf32, #tpu.memory_space<vmem>>, vector<1x1x1024xf32>
    %43 = vector.shape_cast %41 : vector<1x1024xf32> to vector<1x1x1024xf32>
    %44 = arith.maximumf %42, %43 : vector<1x1x1024xf32>
    %c0_21 = arith.constant 0 : index
    %c0_22 = arith.constant 0 : index
    %c0_23 = arith.constant 0 : index
    %45 = vector.load %arg9[%c0_21, %c0_22, %c0_23] : memref<1x1x1024xf32, #tpu.memory_space<vmem>>, vector<1x1x1024xf32>
    tpu.vector_store %arg9[%c0_21, %c0_22, %c0_23], %44 {strides = array<i32>} : memref<1x1x1024xf32, #tpu.memory_space<vmem>>, vector<1x1x1024xf32>,
    %c3_i32 = arith.constant 3 : i32
    %46 = arith.cmpi eq, %arg1, %c3_i32 : i32
    %47 = arith.extui %46 : i1 to i32
    %c0_i32_24 = arith.constant 0 : i32
    %48 = arith.cmpi ne, %47, %c0_i32_24 : i32
    scf.if %48 {
      %c0_25 = arith.constant 0 : index
      %c0_26 = arith.constant 0 : index
      %c0_27 = arith.constant 0 : index
      %49 = vector.load %arg9[%c0_25, %c0_26, %c0_27] : memref<1x1x1024xf32, #tpu.memory_space<vmem>>, vector<1x1x1024xf32>
      %c0_28 = arith.constant 0 : index
      %c0_29 = arith.constant 0 : index
      %50 = vector.load %arg8[%c0_28, %c0_29] : memref<1x1024xf32, #tpu.memory_space<vmem>>, vector<1x1024xf32>
      %51 = vector.shape_cast %50 : vector<1x1024xf32> to vector<1x1x1024xf32>
      %52 = arith.addf %49, %51 : vector<1x1x1024xf32>
      %cst_30 = arith.constant 0.000000e+00 : f32
      %53 = vector.broadcast %cst_30 : f32 to vector<1x1x1024xf32>
      %54 = arith.maximumf %52, %53 : vector<1x1x1024xf32>
      %c0_31 = arith.constant 0 : index
      %c0_32 = arith.constant 0 : index
      %c0_33 = arith.constant 0 : index
      %55 = vector.load %arg9[%c0_31, %c0_32, %c0_33] : memref<1x1x1024xf32, #tpu.memory_space<vmem>>, vector<1x1x1024xf32>
      tpu.vector_store %arg9[%c0_31, %c0_32, %c0_33], %54 {strides = array<i32>} : memref<1x1x1024xf32, #tpu.memory_space<vmem>>, vector<1x1x1024xf32>,
    } else {
    }
    return
  }
  func.func @transform_0(%arg0: i32, %arg1: i32) -> (i32, i32, i32) {
    %c0_i32 = arith.constant 0 : i32
    %c0_i32_0 = arith.constant 0 : i32
    return %arg0, %arg1, %c0_i32 : i32, i32, i32
  }
  func.func @transform_1(%arg0: i32, %arg1: i32) -> (i32, i32, i32) {
    %c0_i32 = arith.constant 0 : i32
    %c0_i32_0 = arith.constant 0 : i32
    %c0_i32_1 = arith.constant 0 : i32
    %c0_i32_2 = arith.constant 0 : i32
    return %c0_i32, %c0_i32_0, %c0_i32_1 : i32, i32, i32
  }
  func.func @transform_2(%arg0: i32, %arg1: i32) -> (i32, i32) {
    %c0_i32 = arith.constant 0 : i32
    %c0_i32_0 = arith.constant 0 : i32
    %c0_i32_1 = arith.constant 0 : i32
    return %c0_i32, %c0_i32_0 : i32, i32
  }
  func.func @transform_3(%arg0: i32, %arg1: i32) -> (i32, i32) {
    %c0_i32 = arith.constant 0 : i32
    %c0_i32_0 = arith.constant 0 : i32
    %c0_i32_1 = arith.constant 0 : i32
    return %c0_i32, %c0_i32_0 : i32, i32
  }
  func.func @transform_4(%arg0: i32, %arg1: i32) -> (i32, i32) {
    %c0_i32 = arith.constant 0 : i32
    %c0_i32_0 = arith.constant 0 : i32
    %c0_i32_1 = arith.constant 0 : i32
    return %c0_i32, %c0_i32_0 : i32, i32
  }
  func.func @transform_5(%arg0: i32, %arg1: i32) -> (i32, i32) {
    %c0_i32 = arith.constant 0 : i32
    %c0_i32_0 = arith.constant 0 : i32
    %c0_i32_1 = arith.constant 0 : i32
    return %c0_i32, %c0_i32_0 : i32, i32
  }
  func.func @transform_6(%arg0: i32, %arg1: i32) -> (i32, i32) {
    %c0_i32 = arith.constant 0 : i32
    %c0_i32_0 = arith.constant 0 : i32
    %c0_i32_1 = arith.constant 0 : i32
    return %c0_i32, %c0_i32_0 : i32, i32
  }
  func.func @transform_7(%arg0: i32, %arg1: i32) -> (i32, i32, i32) {
    %c0_i32 = arith.constant 0 : i32
    %c0_i32_0 = arith.constant 0 : i32
    %c0_i32_1 = arith.constant 0 : i32
    return %arg0, %c0_i32, %c0_i32_0 : i32, i32, i32
  }
}

module attributes {stable_mosaic.version = 11 : i64} {
  func.func @_point_mlp_max_kernel(%arg0: i32, %arg1: i32, %arg2: memref<1x64x3xf32, #tpu.memory_space<vmem>>, %arg3: memref<1x3x64xf32, #tpu.memory_space<vmem>>, %arg4: memref<1x64xf32, #tpu.memory_space<vmem>>, %arg5: memref<64x128xbf16, #tpu.memory_space<vmem>>, %arg6: memref<1x128xf32, #tpu.memory_space<vmem>>, %arg7: memref<128x1024xbf16, #tpu.memory_space<vmem>>, %arg8: memref<1x1024xf32, #tpu.memory_space<vmem>>, %arg9: memref<1x1x1024xf32, #tpu.memory_space<vmem>>) attributes {dimension_semantics = [#tpu.dimension_semantics<parallel>, #tpu.dimension_semantics<arbitrary>], iteration_bounds = array<i64: 2, 4>, scalar_prefetch = 0 : i64, scratch_operands = 0 : i64, tpu.core_type = #tpu.core_type<tc>, window_params = [{transform_indices = @transform_0, window_bounds = array<i64: 1, 64, 3>}, {transform_indices = @transform_1, window_bounds = array<i64: 1, 3, 64>}, {pipeline_mode = #tpu.pipeline_mode<synchronous>, transform_indices = @transform_2, window_bounds = array<i64: 1, 64>}, {pipeline_mode = #tpu.pipeline_mode<synchronous>, transform_indices = @transform_3, window_bounds = array<i64: 64, 128>}, {pipeline_mode = #tpu.pipeline_mode<synchronous>, transform_indices = @transform_4, window_bounds = array<i64: 1, 128>}, {pipeline_mode = #tpu.pipeline_mode<synchronous>, transform_indices = @transform_5, window_bounds = array<i64: 128, 1024>}, {pipeline_mode = #tpu.pipeline_mode<synchronous>, transform_indices = @transform_6, window_bounds = array<i64: 1, 1024>}, {transform_indices = @transform_7, window_bounds = array<i64: 1, 1, 1024>}]} {
    %c0_i32 = arith.constant 0 : i32
    %0 = arith.cmpi eq, %arg1, %c0_i32 : i32
    %1 = arith.extui %0 : i1 to i32
    %c0_i32_0 = arith.constant 0 : i32
    %2 = arith.cmpi ne, %1, %c0_i32_0 : i32
    scf.if %2 {
      %cst_25 = arith.constant 0xFF800000 : f32
      %49 = vector.broadcast %cst_25 : f32 to vector<1x1x1024xf32>
      %c0_26 = arith.constant 0 : index
      %c0_27 = arith.constant 0 : index
      %c0_28 = arith.constant 0 : index
      %50 = vector.load %arg9[%c0_26, %c0_27, %c0_28] : memref<1x1x1024xf32, #tpu.memory_space<vmem>>, vector<1x1x1024xf32>
      tpu.vector_store %arg9[%c0_26, %c0_27, %c0_28], %49 {strides = array<i32>} : memref<1x1x1024xf32, #tpu.memory_space<vmem>>, vector<1x1x1024xf32>,
    } else {
    }
    %c0 = arith.constant 0 : index
    %c0_1 = arith.constant 0 : index
    %c0_2 = arith.constant 0 : index
    %3 = vector.load %arg2[%c0, %c0_1, %c0_2] : memref<1x64x3xf32, #tpu.memory_space<vmem>>, vector<1x64x3xf32>
    %4 = vector.shape_cast %3 : vector<1x64x3xf32> to vector<64x3xf32>
    %c0_3 = arith.constant 0 : index
    %c0_4 = arith.constant 0 : index
    %c0_5 = arith.constant 0 : index
    %5 = vector.load %arg3[%c0_3, %c0_4, %c0_5] : memref<1x3x64xf32, #tpu.memory_space<vmem>>, vector<1x3x64xf32>
    %6 = vector.shape_cast %5 : vector<1x3x64xf32> to vector<3x64xf32>
    %7 = vector.extract_strided_slice %4 {offsets = [0, 0], sizes = [64, 1], strides = [1, 1]} : vector<64x3xf32> to vector<64x1xf32>
    %8 = vector.extract_strided_slice %6 {offsets = [0, 0], sizes = [1, 64], strides = [1, 1]} : vector<3x64xf32> to vector<1x64xf32>
    %9 = vector.broadcast %7 : vector<64x1xf32> to vector<64x64xf32>
    %10 = vector.broadcast %8 : vector<1x64xf32> to vector<64x64xf32>
    %11 = arith.mulf %9, %10 : vector<64x64xf32>
    %12 = vector.extract_strided_slice %4 {offsets = [0, 1], sizes = [64, 1], strides = [1, 1]} : vector<64x3xf32> to vector<64x1xf32>
    %13 = vector.extract_strided_slice %6 {offsets = [1, 0], sizes = [1, 64], strides = [1, 1]} : vector<3x64xf32> to vector<1x64xf32>
    %14 = vector.broadcast %12 : vector<64x1xf32> to vector<64x64xf32>
    %15 = vector.broadcast %13 : vector<1x64xf32> to vector<64x64xf32>
    %16 = arith.mulf %14, %15 : vector<64x64xf32>
    %17 = arith.addf %11, %16 : vector<64x64xf32>
    %18 = vector.extract_strided_slice %4 {offsets = [0, 2], sizes = [64, 1], strides = [1, 1]} : vector<64x3xf32> to vector<64x1xf32>
    %19 = vector.extract_strided_slice %6 {offsets = [2, 0], sizes = [1, 64], strides = [1, 1]} : vector<3x64xf32> to vector<1x64xf32>
    %20 = vector.broadcast %18 : vector<64x1xf32> to vector<64x64xf32>
    %21 = vector.broadcast %19 : vector<1x64xf32> to vector<64x64xf32>
    %22 = arith.mulf %20, %21 : vector<64x64xf32>
    %23 = arith.addf %17, %22 : vector<64x64xf32>
    %c0_6 = arith.constant 0 : index
    %c0_7 = arith.constant 0 : index
    %24 = vector.load %arg4[%c0_6, %c0_7] : memref<1x64xf32, #tpu.memory_space<vmem>>, vector<1x64xf32>
    %25 = vector.broadcast %24 : vector<1x64xf32> to vector<64x64xf32>
    %26 = arith.addf %23, %25 : vector<64x64xf32>
    %cst = arith.constant 0.000000e+00 : f32
    %27 = vector.broadcast %cst : f32 to vector<64x64xf32>
    %28 = arith.maximumf %26, %27 : vector<64x64xf32>
    %29 = arith.truncf %28 : vector<64x64xf32> to vector<64x64xbf16>
    %c0_8 = arith.constant 0 : index
    %c0_9 = arith.constant 0 : index
    %30 = vector.load %arg5[%c0_8, %c0_9] : memref<64x128xbf16, #tpu.memory_space<vmem>>, vector<64x128xbf16>
    %cst_10 = arith.constant dense<0.000000e+00> : vector<64x128xf32>
    %31 = tpu.matmul %29, %30, %cst_10 {dimension_numbers = #tpu.dot_dimension_numbers<[1], [0], [0], [1], [0, 0, 1, 1], [], []>} : vector<64x64xbf16>, vector<64x128xbf16>, vector<64x128xf32> -> vector<64x128xf32>
    %c0_11 = arith.constant 0 : index
    %c0_12 = arith.constant 0 : index
    %32 = vector.load %arg6[%c0_11, %c0_12] : memref<1x128xf32, #tpu.memory_space<vmem>>, vector<1x128xf32>
    %33 = vector.broadcast %32 : vector<1x128xf32> to vector<64x128xf32>
    %34 = arith.addf %31, %33 : vector<64x128xf32>
    %cst_13 = arith.constant 0.000000e+00 : f32
    %35 = vector.broadcast %cst_13 : f32 to vector<64x128xf32>
    %36 = arith.maximumf %34, %35 : vector<64x128xf32>
    %37 = arith.truncf %36 : vector<64x128xf32> to vector<64x128xbf16>
    %c0_14 = arith.constant 0 : index
    %c0_15 = arith.constant 0 : index
    %38 = vector.load %arg7[%c0_14, %c0_15] : memref<128x1024xbf16, #tpu.memory_space<vmem>>, vector<128x1024xbf16>
    %cst_16 = arith.constant dense<0.000000e+00> : vector<64x1024xf32>
    %39 = tpu.matmul %37, %38, %cst_16 {dimension_numbers = #tpu.dot_dimension_numbers<[1], [0], [0], [1], [0, 0, 1, 1], [], []>} : vector<64x128xbf16>, vector<128x1024xbf16>, vector<64x1024xf32> -> vector<64x1024xf32>
    %cst_17 = arith.constant dense<0xFF800000> : vector<1024xf32>
    %40 = vector.multi_reduction <maximumf>, %39, %cst_17 [0] : vector<64x1024xf32> to vector<1024xf32>
    %41 = vector.shape_cast %40 : vector<1024xf32> to vector<1x1024xf32>
    %c0_18 = arith.constant 0 : index
    %c0_19 = arith.constant 0 : index
    %c0_20 = arith.constant 0 : index
    %42 = vector.load %arg9[%c0_18, %c0_19, %c0_20] : memref<1x1x1024xf32, #tpu.memory_space<vmem>>, vector<1x1x1024xf32>
    %43 = vector.shape_cast %41 : vector<1x1024xf32> to vector<1x1x1024xf32>
    %44 = arith.maximumf %42, %43 : vector<1x1x1024xf32>
    %c0_21 = arith.constant 0 : index
    %c0_22 = arith.constant 0 : index
    %c0_23 = arith.constant 0 : index
    %45 = vector.load %arg9[%c0_21, %c0_22, %c0_23] : memref<1x1x1024xf32, #tpu.memory_space<vmem>>, vector<1x1x1024xf32>
    tpu.vector_store %arg9[%c0_21, %c0_22, %c0_23], %44 {strides = array<i32>} : memref<1x1x1024xf32, #tpu.memory_space<vmem>>, vector<1x1x1024xf32>,
    %c3_i32 = arith.constant 3 : i32
    %46 = arith.cmpi eq, %arg1, %c3_i32 : i32
    %47 = arith.extui %46 : i1 to i32
    %c0_i32_24 = arith.constant 0 : i32
    %48 = arith.cmpi ne, %47, %c0_i32_24 : i32
    scf.if %48 {
      %c0_25 = arith.constant 0 : index
      %c0_26 = arith.constant 0 : index
      %c0_27 = arith.constant 0 : index
      %49 = vector.load %arg9[%c0_25, %c0_26, %c0_27] : memref<1x1x1024xf32, #tpu.memory_space<vmem>>, vector<1x1x1024xf32>
      %c0_28 = arith.constant 0 : index
      %c0_29 = arith.constant 0 : index
      %50 = vector.load %arg8[%c0_28, %c0_29] : memref<1x1024xf32, #tpu.memory_space<vmem>>, vector<1x1024xf32>
      %51 = vector.shape_cast %50 : vector<1x1024xf32> to vector<1x1x1024xf32>
      %52 = arith.addf %49, %51 : vector<1x1x1024xf32>
      %c0_30 = arith.constant 0 : index
      %c0_31 = arith.constant 0 : index
      %c0_32 = arith.constant 0 : index
      %53 = vector.load %arg9[%c0_30, %c0_31, %c0_32] : memref<1x1x1024xf32, #tpu.memory_space<vmem>>, vector<1x1x1024xf32>
      tpu.vector_store %arg9[%c0_30, %c0_31, %c0_32], %52 {strides = array<i32>} : memref<1x1x1024xf32, #tpu.memory_space<vmem>>, vector<1x1x1024xf32>,
    } else {
    }
    return
  }
  func.func @transform_0(%arg0: i32, %arg1: i32) -> (i32, i32, i32) {
    %c0_i32 = arith.constant 0 : i32
    %c0_i32_0 = arith.constant 0 : i32
    return %arg0, %arg1, %c0_i32 : i32, i32, i32
  }
  func.func @transform_1(%arg0: i32, %arg1: i32) -> (i32, i32, i32) {
    %c0_i32 = arith.constant 0 : i32
    %c0_i32_0 = arith.constant 0 : i32
    %c0_i32_1 = arith.constant 0 : i32
    return %arg0, %c0_i32, %c0_i32_0 : i32, i32, i32
  }
  func.func @transform_2(%arg0: i32, %arg1: i32) -> (i32, i32) {
    %c0_i32 = arith.constant 0 : i32
    %c0_i32_0 = arith.constant 0 : i32
    %c0_i32_1 = arith.constant 0 : i32
    return %c0_i32, %c0_i32_0 : i32, i32
  }
  func.func @transform_3(%arg0: i32, %arg1: i32) -> (i32, i32) {
    %c0_i32 = arith.constant 0 : i32
    %c0_i32_0 = arith.constant 0 : i32
    %c0_i32_1 = arith.constant 0 : i32
    return %c0_i32, %c0_i32_0 : i32, i32
  }
  func.func @transform_4(%arg0: i32, %arg1: i32) -> (i32, i32) {
    %c0_i32 = arith.constant 0 : i32
    %c0_i32_0 = arith.constant 0 : i32
    %c0_i32_1 = arith.constant 0 : i32
    return %c0_i32, %c0_i32_0 : i32, i32
  }
  func.func @transform_5(%arg0: i32, %arg1: i32) -> (i32, i32) {
    %c0_i32 = arith.constant 0 : i32
    %c0_i32_0 = arith.constant 0 : i32
    %c0_i32_1 = arith.constant 0 : i32
    return %c0_i32, %c0_i32_0 : i32, i32
  }
  func.func @transform_6(%arg0: i32, %arg1: i32) -> (i32, i32) {
    %c0_i32 = arith.constant 0 : i32
    %c0_i32_0 = arith.constant 0 : i32
    %c0_i32_1 = arith.constant 0 : i32
    return %c0_i32, %c0_i32_0 : i32, i32
  }
  func.func @transform_7(%arg0: i32, %arg1: i32) -> (i32, i32, i32) {
    %c0_i32 = arith.constant 0 : i32
    %c0_i32_0 = arith.constant 0 : i32
    %c0_i32_1 = arith.constant 0 : i32
    return %arg0, %c0_i32, %c0_i32_0 : i32, i32, i32
  }
}

module attributes {stable_mosaic.version = 11 : i64} {
  func.func @_fc_head_kernel(%arg0: i32, %arg1: memref<2x256xf32, #tpu.memory_space<vmem>>, %arg2: memref<256x512xbf16, #tpu.memory_space<vmem>>, %arg3: memref<1x512xf32, #tpu.memory_space<vmem>>, %arg4: memref<512x256xbf16, #tpu.memory_space<vmem>>, %arg5: memref<1x256xf32, #tpu.memory_space<vmem>>, %arg6: memref<256x128xbf16, #tpu.memory_space<vmem>>, %arg7: memref<1x128xf32, #tpu.memory_space<vmem>>, %arg8: memref<2x128xf32, #tpu.memory_space<vmem>>, %arg9: memref<2x512xf32, #tpu.memory_space<vmem>>) attributes {dimension_semantics = [#tpu.dimension_semantics<arbitrary>], iteration_bounds = array<i64: 4>, scalar_prefetch = 0 : i64, scratch_operands = 1 : i64, tpu.core_type = #tpu.core_type<tc>, window_params = [{transform_indices = @transform_0, window_bounds = array<i64: 2, 256>}, {transform_indices = @transform_1, window_bounds = array<i64: 256, 512>}, {pipeline_mode = #tpu.pipeline_mode<synchronous>, transform_indices = @transform_2, window_bounds = array<i64: 1, 512>}, {pipeline_mode = #tpu.pipeline_mode<synchronous>, transform_indices = @transform_3, window_bounds = array<i64: 512, 256>}, {pipeline_mode = #tpu.pipeline_mode<synchronous>, transform_indices = @transform_4, window_bounds = array<i64: 1, 256>}, {pipeline_mode = #tpu.pipeline_mode<synchronous>, transform_indices = @transform_5, window_bounds = array<i64: 256, 128>}, {pipeline_mode = #tpu.pipeline_mode<synchronous>, transform_indices = @transform_6, window_bounds = array<i64: 1, 128>}, {pipeline_mode = #tpu.pipeline_mode<synchronous>, transform_indices = @transform_7, window_bounds = array<i64: 2, 128>}]} {
    %c0_i32 = arith.constant 0 : i32
    %0 = arith.cmpi eq, %arg0, %c0_i32 : i32
    %1 = arith.extui %0 : i1 to i32
    %c0_i32_0 = arith.constant 0 : i32
    %2 = arith.cmpi ne, %1, %c0_i32_0 : i32
    scf.if %2 {
      %cst_9 = arith.constant 0.000000e+00 : f32
      %13 = vector.broadcast %cst_9 : f32 to vector<2x512xf32>
      %c0_10 = arith.constant 0 : index
      %c0_11 = arith.constant 0 : index
      %14 = vector.load %arg9[%c0_10, %c0_11] : memref<2x512xf32, #tpu.memory_space<vmem>>, vector<2x512xf32>
      tpu.vector_store %arg9[%c0_10, %c0_11], %13 {strides = array<i32>} : memref<2x512xf32, #tpu.memory_space<vmem>>, vector<2x512xf32>,
    } else {
    }
    %c0 = arith.constant 0 : index
    %c0_1 = arith.constant 0 : index
    %3 = vector.load %arg9[%c0, %c0_1] : memref<2x512xf32, #tpu.memory_space<vmem>>, vector<2x512xf32>
    %c0_2 = arith.constant 0 : index
    %c0_3 = arith.constant 0 : index
    %4 = vector.load %arg1[%c0_2, %c0_3] : memref<2x256xf32, #tpu.memory_space<vmem>>, vector<2x256xf32>
    %5 = arith.truncf %4 : vector<2x256xf32> to vector<2x256xbf16>
    %c0_4 = arith.constant 0 : index
    %c0_5 = arith.constant 0 : index
    %6 = vector.load %arg2[%c0_4, %c0_5] : memref<256x512xbf16, #tpu.memory_space<vmem>>, vector<256x512xbf16>
    %cst = arith.constant dense<0.000000e+00> : vector<2x512xf32>
    %7 = tpu.matmul %5, %6, %cst {dimension_numbers = #tpu.dot_dimension_numbers<[1], [0], [0], [1], [0, 0, 1, 1], [], []>} : vector<2x256xbf16>, vector<256x512xbf16>, vector<2x512xf32> -> vector<2x512xf32>
    %8 = arith.addf %3, %7 : vector<2x512xf32>
    %c0_6 = arith.constant 0 : index
    %c0_7 = arith.constant 0 : index
    %9 = vector.load %arg9[%c0_6, %c0_7] : memref<2x512xf32, #tpu.memory_space<vmem>>, vector<2x512xf32>
    tpu.vector_store %arg9[%c0_6, %c0_7], %8 {strides = array<i32>} : memref<2x512xf32, #tpu.memory_space<vmem>>, vector<2x512xf32>,
    %c3_i32 = arith.constant 3 : i32
    %10 = arith.cmpi eq, %arg0, %c3_i32 : i32
    %11 = arith.extui %10 : i1 to i32
    %c0_i32_8 = arith.constant 0 : i32
    %12 = arith.cmpi ne, %11, %c0_i32_8 : i32
    scf.if %12 {
      %c0_9 = arith.constant 0 : index
      %c0_10 = arith.constant 0 : index
      %13 = vector.load %arg9[%c0_9, %c0_10] : memref<2x512xf32, #tpu.memory_space<vmem>>, vector<2x512xf32>
      %c0_11 = arith.constant 0 : index
      %c0_12 = arith.constant 0 : index
      %14 = vector.load %arg3[%c0_11, %c0_12] : memref<1x512xf32, #tpu.memory_space<vmem>>, vector<1x512xf32>
      %15 = vector.broadcast %14 : vector<1x512xf32> to vector<2x512xf32>
      %16 = arith.addf %13, %15 : vector<2x512xf32>
      %cst_13 = arith.constant 0.000000e+00 : f32
      %17 = vector.broadcast %cst_13 : f32 to vector<2x512xf32>
      %18 = arith.maximumf %16, %17 : vector<2x512xf32>
      %19 = arith.truncf %18 : vector<2x512xf32> to vector<2x512xbf16>
      %c0_14 = arith.constant 0 : index
      %c0_15 = arith.constant 0 : index
      %20 = vector.load %arg4[%c0_14, %c0_15] : memref<512x256xbf16, #tpu.memory_space<vmem>>, vector<512x256xbf16>
      %cst_16 = arith.constant dense<0.000000e+00> : vector<2x256xf32>
      %21 = tpu.matmul %19, %20, %cst_16 {dimension_numbers = #tpu.dot_dimension_numbers<[1], [0], [0], [1], [0, 0, 1, 1], [], []>} : vector<2x512xbf16>, vector<512x256xbf16>, vector<2x256xf32> -> vector<2x256xf32>
      %c0_17 = arith.constant 0 : index
      %c0_18 = arith.constant 0 : index
      %22 = vector.load %arg5[%c0_17, %c0_18] : memref<1x256xf32, #tpu.memory_space<vmem>>, vector<1x256xf32>
      %23 = vector.broadcast %22 : vector<1x256xf32> to vector<2x256xf32>
      %24 = arith.addf %21, %23 : vector<2x256xf32>
      %cst_19 = arith.constant 0.000000e+00 : f32
      %25 = vector.broadcast %cst_19 : f32 to vector<2x256xf32>
      %26 = arith.maximumf %24, %25 : vector<2x256xf32>
      %27 = arith.truncf %26 : vector<2x256xf32> to vector<2x256xbf16>
      %c0_20 = arith.constant 0 : index
      %c0_21 = arith.constant 0 : index
      %28 = vector.load %arg6[%c0_20, %c0_21] : memref<256x128xbf16, #tpu.memory_space<vmem>>, vector<256x128xbf16>
      %cst_22 = arith.constant dense<0.000000e+00> : vector<2x128xf32>
      %29 = tpu.matmul %27, %28, %cst_22 {dimension_numbers = #tpu.dot_dimension_numbers<[1], [0], [0], [1], [0, 0, 1, 1], [], []>} : vector<2x256xbf16>, vector<256x128xbf16>, vector<2x128xf32> -> vector<2x128xf32>
      %c0_23 = arith.constant 0 : index
      %c0_24 = arith.constant 0 : index
      %30 = vector.load %arg7[%c0_23, %c0_24] : memref<1x128xf32, #tpu.memory_space<vmem>>, vector<1x128xf32>
      %31 = vector.broadcast %30 : vector<1x128xf32> to vector<2x128xf32>
      %32 = arith.addf %29, %31 : vector<2x128xf32>
      %33 = tpu.iota {dimensions = array<i32: 1>} : vector<2x128xi32>
      %c2_i32 = arith.constant 2 : i32
      %34 = vector.broadcast %c2_i32 : i32 to vector<2x128xi32>
      %35 = arith.cmpi slt, %33, %34 : vector<2x128xi32>
      %cst_25 = arith.constant 0xFF800000 : f32
      %36 = vector.broadcast %cst_25 : f32 to vector<2x128xf32>
      %37 = arith.select %35, %32, %36 : vector<2x128xi1>, vector<2x128xf32>
      %cst_26 = arith.constant dense<0xFF800000> : vector<2xf32>
      %38 = vector.multi_reduction <maximumf>, %37, %cst_26 [1] : vector<2x128xf32> to vector<2xf32>
      %39 = vector.shape_cast %38 : vector<2xf32> to vector<2x1xf32>
      %40 = vector.broadcast %39 : vector<2x1xf32> to vector<2x128xf32>
      %41 = arith.subf %37, %40 : vector<2x128xf32>
      %42 = math.exp %41 : vector<2x128xf32>
      %cst_27 = arith.constant 0.000000e+00 : f32
      %43 = vector.broadcast %cst_27 : f32 to vector<2x128xf32>
      %44 = arith.select %35, %42, %43 : vector<2x128xi1>, vector<2x128xf32>
      %cst_28 = arith.constant dense<0.000000e+00> : vector<2xf32>
      %45 = vector.multi_reduction <add>, %44, %cst_28 [1] : vector<2x128xf32> to vector<2xf32>
      %46 = vector.shape_cast %45 : vector<2xf32> to vector<2x1xf32>
      %47 = math.log %46 : vector<2x1xf32>
      %48 = vector.broadcast %47 : vector<2x1xf32> to vector<2x128xf32>
      %49 = arith.subf %41, %48 : vector<2x128xf32>
      %c0_29 = arith.constant 0 : index
      %c0_30 = arith.constant 0 : index
      %50 = vector.load %arg8[%c0_29, %c0_30] : memref<2x128xf32, #tpu.memory_space<vmem>>, vector<2x128xf32>
      tpu.vector_store %arg8[%c0_29, %c0_30], %49 {strides = array<i32>} : memref<2x128xf32, #tpu.memory_space<vmem>>, vector<2x128xf32>,
    } else {
    }
    return
  }
  func.func @transform_0(%arg0: i32) -> (i32, i32) {
    %c0_i32 = arith.constant 0 : i32
    %c0_i32_0 = arith.constant 0 : i32
    return %c0_i32, %arg0 : i32, i32
  }
  func.func @transform_1(%arg0: i32) -> (i32, i32) {
    %c0_i32 = arith.constant 0 : i32
    %c0_i32_0 = arith.constant 0 : i32
    return %arg0, %c0_i32 : i32, i32
  }
  func.func @transform_2(%arg0: i32) -> (i32, i32) {
    %c0_i32 = arith.constant 0 : i32
    %c0_i32_0 = arith.constant 0 : i32
    %c0_i32_1 = arith.constant 0 : i32
    return %c0_i32, %c0_i32_0 : i32, i32
  }
  func.func @transform_3(%arg0: i32) -> (i32, i32) {
    %c0_i32 = arith.constant 0 : i32
    %c0_i32_0 = arith.constant 0 : i32
    %c0_i32_1 = arith.constant 0 : i32
    return %c0_i32, %c0_i32_0 : i32, i32
  }
  func.func @transform_4(%arg0: i32) -> (i32, i32) {
    %c0_i32 = arith.constant 0 : i32
    %c0_i32_0 = arith.constant 0 : i32
    %c0_i32_1 = arith.constant 0 : i32
    return %c0_i32, %c0_i32_0 : i32, i32
  }
  func.func @transform_5(%arg0: i32) -> (i32, i32) {
    %c0_i32 = arith.constant 0 : i32
    %c0_i32_0 = arith.constant 0 : i32
    %c0_i32_1 = arith.constant 0 : i32
    return %c0_i32, %c0_i32_0 : i32, i32
  }
  func.func @transform_6(%arg0: i32) -> (i32, i32) {
    %c0_i32 = arith.constant 0 : i32
    %c0_i32_0 = arith.constant 0 : i32
    %c0_i32_1 = arith.constant 0 : i32
    return %c0_i32, %c0_i32_0 : i32, i32
  }
  func.func @transform_7(%arg0: i32) -> (i32, i32) {
    %c0_i32 = arith.constant 0 : i32
    %c0_i32_0 = arith.constant 0 : i32
    %c0_i32_1 = arith.constant 0 : i32
    return %c0_i32, %c0_i32_0 : i32, i32
  }
}

</mosaic_0001>

<bundles_post_ra>
// kernel: pointnet_cls_forward.5
= control target key start
LH: loop header
LB: loop body
LE: loop exit
PB: predicated region body
PF: predicated region fallthrough
CT: control target
= control target key end

     0   :  { %s2023_s24 = smov 0   ;;  %s2390_s0 = inlined_call_operand.vmem [shape: f32[2,1024], index: 0, kind: input, shape index: {}]   ;;  %s2391_s1 = inlined_call_operand.vmem [shape: bf16[1024,512], index: 1, kind: input, shape index: {}]   ;;  %s2392_s2 = inlined_call_operand.vmem [shape: f32[1,512], index: 2, kind: input, shape index: {}]   ;;  %s2393_s3 = inlined_call_operand.vmem [shape: bf16[512,256], index: 3, kind: input, shape index: {}]   ;;  %s2394_s4 = inlined_call_operand.vmem [shape: f32[1,256], index: 4, kind: input, shape index: {}]   ;;  %s2395_s5 = inlined_call_operand.vmem [shape: bf16[256,128], index: 5, kind: input, shape index: {}]   ;;  %s2396_s6 = inlined_call_operand.vmem [shape: f32[1,128], index: 6, kind: input, shape index: {}]   ;;  %s2397_s7 = inlined_call_operand.vmem [shape: f32[2,128], index: 7, kind: output, shape index: {}]  }
   0x1 LB: > { %s2029_s25 = sadd.s32 4294967295, %s1979_s24   ;;  %p1572_p0 = scmp.ge.s32.totalorder %s1979_s24, 1  ;;  %s1979_s24 = sphi %s2023_s24, %s17_s24  }
   0x2   : > { %p245_p1 = scmp.lt.s32.totalorder %s1979_s24, 5 }
   0x4   : > { %p246_p2 = pnand %p1572_p0, %p245_p1 }
   0x5   : > { %s1573_s26 = sshll.u32 (!%p246_p2), %s2029_s25, 1  ;;  %s1575_s27 = sshll.u32 (!%p246_p2), %s2029_s25, 5 }
   0x6   : > { %249 = sbr.rel (%p246_p2) target bundleno = 768 (0x300), region = 48  ;;  %p279_p3 = scmp.lt.s32.totalorder (!%p246_p2), %s1573_s26, 7 }
   0x7   : > { %p285_p4 = scmp.lt.s32.totalorder (!%p246_p2), %s1575_s27, 127  ;;  %p1578_p5 = scmp.ne.s32.totalorder (!%p246_p2), %s2029_s25, 0 }
   0xd   : > { %s2399_s26 = smov (!%p279_p3, %s1573_s26), 7  ;;  %s2401_s27 = smov (!%p285_p4, %s1575_s27), 127 }
   0xe   : > { %s1574_s28 = sshll.u32 %s2399_s26, 1  ;;  %s1728_s9 = sshll.u32 %s2401_s27, 4  ;;  %v1981_v0 = vmov (!%p1578_p5), 0.0  }
   0xf   : > { %s2038_s8 = scalar_lea.vmem %s2390_s0, %s1574_s28  ;;  %s2043_s12 = scalar_lea.vmem %s2391_s1, %s1728_s9  ;;  %296 = vst [vmem:[#allocation2] sm:$0xff] (!%p1578_p5), %v1981_v0 }
  0x10   : > { %295 = sbr.rel (%p1578_p5) target bundleno = 23 (0x17), region = 52 }
  0x17 PF: > { %v1765_v1 = vld [vmem:[%s2043_s12 + $0x4] ss:$16 sps:$4 sm:$0xff]   ;;  %v1767_v2 = vld [vmem:[%s2043_s12 + $0xc] ss:$16 sps:$4 sm:$0xff]   ;;  %v1769_v3 = vld [vmem:[%s2043_s12] ss:$16 sps:$4 sm:$0xff]  }
  0x18   : > { %696 = vmatprep.subr.bf16.mxu0 %v1765_v1  ;;  %v1770_v4 = vld [vmem:[%s2043_s12 + $0x8] ss:$16 sps:$4 sm:$0xff]   ;;  %737 = vmatprep.subr.bf16.mxu1 %v1767_v2  ;;  %v1771_v5 = vld [vmem:[%s2043_s12 + $0x24] ss:$16 sps:$4 sm:$0xff]   ;;  %v1773_v6 = vld [vmem:[%s2043_s12 + $0x2c] ss:$16 sps:$4 sm:$0xff]  }
  0x19   : > { %697 = vmatpush1.bf16.msra.mxu0 %v1769_v3  ;;  %738 = vmatpush1.bf16.msra.mxu1 %v1770_v4  ;;  %v1775_v7 = vld [vmem:[%s2043_s12 + $0x20] ss:$16 sps:$4 sm:$0xff]   ;;  %v1776_v8 = vld [vmem:[%s2043_s12 + $0x28] ss:$16 sps:$4 sm:$0xff]   ;;  %v1777_v9 = vld [vmem:[%s2043_s12 + $0x44] ss:$16 sps:$4 sm:$0xff]  }
  0x1a   : > { %698 = vmatprep.subr.bf16.mxu0 %v1771_v5  ;;  %739 = vmatprep.subr.bf16.mxu1 %v1773_v6  ;;  %v1779_v10 = vld [vmem:[%s2043_s12 + $0x4c] ss:$16 sps:$4 sm:$0xff]   ;;  %v1781_v11 = vld [vmem:[%s2043_s12 + $0x40] ss:$16 sps:$4 sm:$0xff]   ;;  %v1782_v12 = vld [vmem:[%s2043_s12 + $0x48] ss:$16 sps:$4 sm:$0xff]  }
  0x1b   : > { %v1783_v13 = vld [vmem:[%s2043_s12 + $0x64] ss:$16 sps:$4 sm:$0xff]   ;;  %v1785_v14 = vld [vmem:[%s2043_s12 + $0x6c] ss:$16 sps:$4 sm:$0xff]   ;;  %v1787_v15 = vld [vmem:[%s2043_s12 + $0x60] ss:$16 sps:$4 sm:$0xff]  }
  0x1c   : > { %v1788_v16 = vld [vmem:[%s2043_s12 + $0x68] ss:$16 sps:$4 sm:$0xff]   ;;  %v1789_v17 = vld [vmem:[%s2043_s12 + $0x84] ss:$16 sps:$4 sm:$0xff]   ;;  %v1791_v18 = vld [vmem:[%s2043_s12 + $0x8c] ss:$16 sps:$4 sm:$0xff]  }
  0x1d   : > { %699 = vmatpush1.bf16.msra.mxu0 %v1775_v7  ;;  %740 = vmatpush1.bf16.msra.mxu1 %v1776_v8  ;;  %v1793_v19 = vld [vmem:[%s2043_s12 + $0x80] ss:$16 sps:$4 sm:$0xff]   ;;  %v1794_v20 = vld [vmem:[%s2043_s12 + $0x88] ss:$16 sps:$4 sm:$0xff]   ;;  %v1795_v21 = vld [vmem:[%s2043_s12 + $0xa4] ss:$16 sps:$4 sm:$0xff]   ;;  %v787_v7 = vlaneseq }
  0x1e   : > { %700 = vmatprep.subr.bf16.mxu0 %v1777_v9  ;;  %741 = vmatprep.subr.bf16.mxu1 %v1779_v10  ;;  %v1797_v22 = vld [vmem:[%s2043_s12 + $0xac] ss:$16 sps:$4 sm:$0xff]   ;;  %v1799_v23 = vld [vmem:[%s2043_s12 + $0xa0] ss:$16 sps:$4 sm:$0xff]   ;;  %v1800_v24 = vld [vmem:[%s2043_s12 + $0xa8] ss:$16 sps:$4 sm:$0xff]  }
  0x1f   : > { %v1801_v25 = vld [vmem:[%s2043_s12 + $0xc4] ss:$16 sps:$4 sm:$0xff]   ;;  %v1803_v26 = vld [vmem:[%s2043_s12 + $0xcc] ss:$16 sps:$4 sm:$0xff]   ;;  %v1805_v27 = vld [vmem:[%s2043_s12 + $0xc0] ss:$16 sps:$4 sm:$0xff]  }
  0x20   : > { %v1806_v28 = vld [vmem:[%s2043_s12 + $0xc8] ss:$16 sps:$4 sm:$0xff]   ;;  %v1807_v29 = vld [vmem:[%s2043_s12 + $0xe4] ss:$16 sps:$4 sm:$0xff]   ;;  %v1809_v30 = vld [vmem:[%s2043_s12 + $0xec] ss:$16 sps:$4 sm:$0xff]  }
  0x21   : > { %701 = vmatpush1.bf16.msra.mxu0 %v1781_v11  ;;  %742 = vmatpush1.bf16.msra.mxu1 %v1782_v12  ;;  %v1811_v31 = vld [vmem:[%s2043_s12 + $0xe0] ss:$16 sps:$4 sm:$0xff]   ;;  %v1812_v32 = vld [vmem:[%s2043_s12 + $0xe8] ss:$16 sps:$4 sm:$0xff]   ;;  %v1813_v33 = vld [vmem:[%s2043_s12 + $0x104] ss:$16 sps:$4 sm:$0xff]  }
  0x22   : > { %702 = vmatprep.subr.bf16.mxu0 %v1783_v13  ;;  %743 = vmatprep.subr.bf16.mxu1 %v1785_v14  ;;  %v1815_v34 = vld [vmem:[%s2043_s12 + $0x10c] ss:$16 sps:$4 sm:$0xff]   ;;  %v1817_v35 = vld [vmem:[%s2043_s12 + $0x100] ss:$16 sps:$4 sm:$0xff]   ;;  %v1818_v36 = vld [vmem:[%s2043_s12 + $0x108] ss:$16 sps:$4 sm:$0xff]  }
  0x23   : > { %v1819_v37 = vld [vmem:[%s2043_s12 + $0x124] ss:$16 sps:$4 sm:$0xff]   ;;  %v1821_v38 = vld [vmem:[%s2043_s12 + $0x12c] ss:$16 sps:$4 sm:$0xff]   ;;  %v1823_v39 = vld [vmem:[%s2043_s12 + $0x120] ss:$16 sps:$4 sm:$0xff]  }
  0x24   : > { %v1824_v40 = vld [vmem:[%s2043_s12 + $0x128] ss:$16 sps:$4 sm:$0xff]   ;;  %v1825_v41 = vld [vmem:[%s2043_s12 + $0x144] ss:$16 sps:$4 sm:$0xff]   ;;  %v1827_v42 = vld [vmem:[%s2043_s12 + $0x14c] ss:$16 sps:$4 sm:$0xff]  }
  0x25   : > { %703 = vmatpush1.bf16.msra.mxu0 %v1787_v15  ;;  %744 = vmatpush1.bf16.msra.mxu1 %v1788_v16  ;;  %v1829_v43 = vld [vmem:[%s2043_s12 + $0x140] ss:$16 sps:$4 sm:$0xff]   ;;  %v1830_v44 = vld [vmem:[%s2043_s12 + $0x148] ss:$16 sps:$4 sm:$0xff]   ;;  %v1831_v45 = vld [vmem:[%s2043_s12 + $0x164] ss:$16 sps:$4 sm:$0xff]  }
  0x26   : > { %704 = vmatprep.subr.bf16.mxu0 %v1789_v17  ;;  %745 = vmatprep.subr.bf16.mxu1 %v1791_v18  ;;  %v1833_v46 = vld [vmem:[%s2043_s12 + $0x16c] ss:$16 sps:$4 sm:$0xff]   ;;  %v1579_v47 = vld.sshfl [vmem:[%s2038_s8] sm:$0x33 pattern:$0x76325410] }
  0x27   : > { %v1835_v48 = vld [vmem:[%s2043_s12 + $0x160] ss:$16 sps:$4 sm:$0xff]   ;;  %v1836_v49 = vld [vmem:[%s2043_s12 + $0x168] ss:$16 sps:$4 sm:$0xff]   ;;  %v307_v50 = vcombine.high %v1579_v47, %v1579_v47  ;;  %v1837_v51 = vld [vmem:[%s2043_s12 + $0x184] ss:$16 sps:$4 sm:$0xff]   ;;  %v310_v4 = vpack.c.bf16 %v1579_v47, %v1579_v47 }
  0x28   : > { %v1839_v52 = vld [vmem:[%s2043_s12 + $0x18c] ss:$16 sps:$4 sm:$0xff]   ;;  %v1841_v54 = vld [vmem:[%s2043_s12 + $0x180] ss:$16 sps:$4 sm:$0xff]   ;;  %v1842_v55 = vld [vmem:[%s2043_s12 + $0x188] ss:$16 sps:$4 sm:$0xff]  }
  0x29   : > { %705 = vmatpush1.bf16.msra.mxu0 %v1793_v19  ;;  %746 = vmatpush1.bf16.msra.mxu1 %v1794_v20  ;;  %v311_v53 = vpack.c.bf16 %v307_v50, %v307_v50  ;;  %v1843_v56 = vld [vmem:[%s2043_s12 + $0x1a4] ss:$16 sps:$4 sm:$0xff]   ;;  %v1845_v57 = vld [vmem:[%s2043_s12 + $0x1ac] ss:$16 sps:$4 sm:$0xff]   ;;  %v1847_v58 = vld [vmem:[%s2043_s12 + $0x1a0] ss:$16 sps:$4 sm:$0xff]  }
  0x2a   : > { %706 = vmatprep.subr.bf16.mxu0 %v1795_v21  ;;  %747 = vmatprep.subr.bf16.mxu1 %v1797_v22  ;;  %v1848_v59 = vld [vmem:[%s2043_s12 + $0x1a8] ss:$16 sps:$4 sm:$0xff]   ;;  %v1849_v60 = vld [vmem:[%s2043_s12 + $0x1c4] ss:$16 sps:$4 sm:$0xff]   ;;  %v1851_v61 = vld [vmem:[%s2043_s12 + $0x1cc] ss:$16 sps:$4 sm:$0xff]  }
  0x2b   : > { %728 = vmatprep.mubr.bf16.mxu0 %v311_v53  ;;  %769 = vmatprep.mubr.bf16.mxu1 %v311_v53  ;;  %v1853_v62 = vld [vmem:[%s2043_s12 + $0x1c0] ss:$16 sps:$4 sm:$0xff]   ;;  %v1854_v63 = vld [vmem:[%s2043_s12 + $0x1c8] ss:$16 sps:$4 sm:$0xff]   ;;  %v1855_v0 = vld [vmem:[%s2043_s12 + $0x1e4] ss:$16 sps:$4 sm:$0xff]  }
  0x2c   : > { %v1857_v1 = vld [vmem:[%s2043_s12 + $0x1ec] ss:$16 sps:$4 sm:$0xff]   ;;  %v1859_v2 = vld [vmem:[%s2043_s12 + $0x1e0] ss:$16 sps:$4 sm:$0xff]   ;;  %v1860_v3 = vld [vmem:[%s2043_s12 + $0x1e8] ss:$16 sps:$4 sm:$0xff]  }
  0x2d   : > { %707 = vmatpush1.bf16.msra.mxu0 %v1799_v23  ;;  %748 = vmatpush1.bf16.msra.mxu1 %v1800_v24  ;;  %v1982_v5 = vmov 1983009808   ;;  %v2111_v9 = vshrl.u32 %v787_v7, 7  ;;  %v297_v23 = vld [vmem:[#allocation2] sm:$0xff]  ;;  %p1644_p6 = scmp.ne.s32.totalorder %s2029_s25, 3 }
  0x2e   : > { %708 = vmatprep.subr.bf16.mxu0 %v1801_v25  ;;  %749 = vmatprep.subr.bf16.mxu1 %v1803_v26  ;;  %v785_v6 = vunpack.c.l.s4 %v1982_v5  ;;  %v1861_v26 = vld [vmem:[%s2393_s3 + $0x4] ss:$8 sps:$4 sm:$0xff] (!%p1644_p6)   ;;  %v1893_v47 = vld [vmem:[%s2393_s3 + $0x154] ss:$8 sps:$4 sm:$0xff] (!%p1644_p6)   ;;  %v1902_v53 = vld [vmem:[%s2393_s3 + $0x160] ss:$8 sps:$4 sm:$0xff] (!%p1644_p6)  }
  0x2f   : > { %v1897_v50 = vld [vmem:[%s2393_s3 + $0x64] ss:$8 sps:$4 sm:$0xff] (!%p1644_p6)   ;;  %v1926_v5 = vld [vmem:[%s2393_s3 + $0x1a0] ss:$8 sps:$4 sm:$0xff] (!%p1644_p6)   ;;  %v1927_v7 = vld [vmem:[%s2393_s3 + $0xb4] ss:$8 sps:$4 sm:$0xff] (!%p1644_p6)  }
  0x30   : > { %v786_v8 = vunpack.c.0.s8 %v785_v6  ;;  %v811_v6 = vsub.s32 (!%p1644_p6), 0, %v2111_v9 }
  0x31   : > { %709 = vmatpush1.bf16.msra.mxu0 %v1805_v27  ;;  %750 = vmatpush1.bf16.msra.mxu1 %v1806_v28  ;;  %v1863_v27 = vld [vmem:[%s2393_s3 + $0x104] ss:$8 sps:$4 sm:$0xff] (!%p1644_p6)   ;;  %v1865_v28 = vld [vmem:[%s2393_s3] ss:$8 sps:$4 sm:$0xff] (!%p1644_p6)  }
  0x32   : > { %710 = vmatprep.subr.bf16.mxu0 %v1807_v29  ;;  %751 = vmatprep.subr.bf16.mxu1 %v1809_v30  ;;  %v2114_v12 = vsub.s32 %v786_v8, %v2111_v9  ;;  %v1866_v29 = vld [vmem:[%s2393_s3 + $0x100] ss:$8 sps:$4 sm:$0xff] (!%p1644_p6)   ;;  %v1867_v30 = vld [vmem:[%s2393_s3 + $0x14] ss:$8 sps:$4 sm:$0xff] (!%p1644_p6)   ;;  %v815_v8 = vsub.s32 (!%p1644_p6), 1, %v2111_v9 }
  0x35   : > { %711 = vmatpush1.bf16.msra.mxu0 %v1811_v31  ;;  %752 = vmatpush1.bf16.msra.mxu1 %v1812_v32  ;;  %v1869_v31 = vld [vmem:[%s2393_s3 + $0x114] ss:$8 sps:$4 sm:$0xff] (!%p1644_p6)   ;;  %v1871_v32 = vld [vmem:[%s2393_s3 + $0x10] ss:$8 sps:$4 sm:$0xff] (!%p1644_p6)  }
  0x36   : > { %712 = vmatprep.subr.bf16.mxu0 %v1813_v33  ;;  %753 = vmatprep.subr.bf16.mxu1 %v1815_v34  ;;  %v1872_v33 = vld [vmem:[%s2393_s3 + $0x110] ss:$8 sps:$4 sm:$0xff] (!%p1644_p6)   ;;  %v1873_v34 = vld [vmem:[%s2393_s3 + $0x24] ss:$8 sps:$4 sm:$0xff] (!%p1644_p6)  }
  0x39   : > { %713 = vmatpush1.bf16.msra.mxu0 %v1817_v35  ;;  %754 = vmatpush1.bf16.msra.mxu1 %v1818_v36  ;;  %v1875_v35 = vld [vmem:[%s2393_s3 + $0x124] ss:$8 sps:$4 sm:$0xff] (!%p1644_p6)   ;;  %v1877_v36 = vld [vmem:[%s2393_s3 + $0x20] ss:$8 sps:$4 sm:$0xff] (!%p1644_p6)  }
  0x3a   : > { %714 = vmatprep.subr.bf16.mxu0 %v1819_v37  ;;  %755 = vmatprep.subr.bf16.mxu1 %v1821_v38  ;;  %v1878_v37 = vld [vmem:[%s2393_s3 + $0x120] ss:$8 sps:$4 sm:$0xff] (!%p1644_p6)   ;;  %v1879_v38 = vld [vmem:[%s2393_s3 + $0x34] ss:$8 sps:$4 sm:$0xff] (!%p1644_p6)  }
  0x3d   : > { %715 = vmatpush1.bf16.msra.mxu0 %v1823_v39  ;;  %756 = vmatpush1.bf16.msra.mxu1 %v1824_v40  ;;  %v1881_v39 = vld [vmem:[%s2393_s3 + $0x134] ss:$8 sps:$4 sm:$0xff] (!%p1644_p6)   ;;  %v1883_v40 = vld [vmem:[%s2393_s3 + $0x30] ss:$8 sps:$4 sm:$0xff] (!%p1644_p6)  }
  0x3e   : > { %716 = vmatprep.subr.bf16.mxu0 %v1825_v41  ;;  %757 = vmatprep.subr.bf16.mxu1 %v1827_v42  ;;  %v1884_v41 = vld [vmem:[%s2393_s3 + $0x130] ss:$8 sps:$4 sm:$0xff] (!%p1644_p6)   ;;  %v1885_v42 = vld [vmem:[%s2393_s3 + $0x44] ss:$8 sps:$4 sm:$0xff] (!%p1644_p6)  }
  0x41   : > { %717 = vmatpush1.bf16.msra.mxu0 %v1829_v43  ;;  %758 = vmatpush1.bf16.msra.mxu1 %v1830_v44  ;;  %v1887_v43 = vld [vmem:[%s2393_s3 + $0x144] ss:$8 sps:$4 sm:$0xff] (!%p1644_p6)   ;;  %v1889_v44 = vld [vmem:[%s2393_s3 + $0x40] ss:$8 sps:$4 sm:$0xff] (!%p1644_p6)  }
  0x42   : > { %718 = vmatprep.subr.bf16.mxu0 %v1831_v45  ;;  %759 = vmatprep.subr.bf16.mxu1 %v1833_v46  ;;  %v1890_v45 = vld [vmem:[%s2393_s3 + $0x140] ss:$8 sps:$4 sm:$0xff] (!%p1644_p6)   ;;  %v1891_v46 = vld [vmem:[%s2393_s3 + $0x54] ss:$8 sps:$4 sm:$0xff] (!%p1644_p6)  }
  0x45   : > { %719 = vmatpush1.bf16.msra.mxu0 %v1835_v48  ;;  %760 = vmatpush1.bf16.msra.mxu1 %v1836_v49  ;;  %v1895_v48 = vld [vmem:[%s2393_s3 + $0x50] ss:$8 sps:$4 sm:$0xff] (!%p1644_p6)  }
  0x46   : > { %720 = vmatprep.subr.bf16.mxu0 %v1837_v51  ;;  %761 = vmatprep.subr.bf16.mxu1 %v1839_v52  ;;  %v1896_v49 = vld [vmem:[%s2393_s3 + $0x150] ss:$8 sps:$4 sm:$0xff] (!%p1644_p6)   ;;  %v1899_v51 = vld [vmem:[%s2393_s3 + $0x164] ss:$8 sps:$4 sm:$0xff] (!%p1644_p6)   ;;  %v1901_v52 = vld [vmem:[%s2393_s3 + $0x60] ss:$8 sps:$4 sm:$0xff] (!%p1644_p6)  }
  0x49   : > { %721 = vmatpush1.bf16.msra.mxu0 %v1841_v54  ;;  %762 = vmatpush1.bf16.msra.mxu1 %v1842_v55  ;;  %v1903_v54 = vld [vmem:[%s2393_s3 + $0x74] ss:$8 sps:$4 sm:$0xff] (!%p1644_p6)  }
  0x4a   : > { %722 = vmatprep.subr.bf16.mxu0 %v1843_v56  ;;  %763 = vmatprep.subr.bf16.mxu1 %v1845_v57  ;;  %v1905_v55 = vld [vmem:[%s2393_s3 + $0x174] ss:$8 sps:$4 sm:$0xff] (!%p1644_p6)   ;;  %v1907_v56 = vld [vmem:[%s2393_s3 + $0x70] ss:$8 sps:$4 sm:$0xff] (!%p1644_p6)  }
  0x4b   : > { %v1908_v57 = vld [vmem:[%s2393_s3 + $0x170] ss:$8 sps:$4 sm:$0xff] (!%p1644_p6)  }
  0x4d   : > { %723 = vmatpush1.bf16.msra.mxu0 %v1847_v58  ;;  %764 = vmatpush1.bf16.msra.mxu1 %v1848_v59  ;;  %v1909_v58 = vld [vmem:[%s2393_s3 + $0x84] ss:$8 sps:$4 sm:$0xff] (!%p1644_p6)  }
  0x4e   : > { %724 = vmatprep.subr.bf16.mxu0 %v1849_v60  ;;  %765 = vmatprep.subr.bf16.mxu1 %v1851_v61  ;;  %v1911_v59 = vld [vmem:[%s2393_s3 + $0x184] ss:$8 sps:$4 sm:$0xff] (!%p1644_p6)   ;;  %v1913_v60 = vld [vmem:[%s2393_s3 + $0x80] ss:$8 sps:$4 sm:$0xff] (!%p1644_p6)  }
  0x4f   : > { %v1914_v61 = vld [vmem:[%s2393_s3 + $0x180] ss:$8 sps:$4 sm:$0xff] (!%p1644_p6)  }
  0x51   : > { %725 = vmatpush1.bf16.msra.mxu0 %v1853_v62  ;;  %766 = vmatpush1.bf16.msra.mxu1 %v1854_v63  ;;  %v1915_v62 = vld [vmem:[%s2393_s3 + $0x94] ss:$8 sps:$4 sm:$0xff] (!%p1644_p6)  }
  0x52   : > { %726 = vmatprep.subr.bf16.mxu0 %v1855_v0  ;;  %767 = vmatprep.subr.bf16.mxu1 %v1857_v1  ;;  %v1917_v63 = vld [vmem:[%s2393_s3 + $0x194] ss:$8 sps:$4 sm:$0xff] (!%p1644_p6)   ;;  %v1919_v0 = vld [vmem:[%s2393_s3 + $0x90] ss:$8 sps:$4 sm:$0xff] (!%p1644_p6)  }
  0x53   : > { %v1920_v1 = vld [vmem:[%s2393_s3 + $0x190] ss:$8 sps:$4 sm:$0xff] (!%p1644_p6)  }
  0x55   : > { %727 = vmatpush1.bf16.msra.mxu0 %v1859_v2  ;;  %768 = vmatpush1.bf16.msra.mxu1 %v1860_v3  ;;  %v1921_v2 = vld [vmem:[%s2393_s3 + $0xa4] ss:$8 sps:$4 sm:$0xff] (!%p1644_p6)  }
  0x56   : > { %1267 = vmatprep.subr.bf16.mxu1 (!%p1644_p6), %v1861_v26  ;;  %1308 = vmatprep.subr.bf16.mxu0 (!%p1644_p6), %v1863_v27  ;;  %v1923_v3 = vld [vmem:[%s2393_s3 + $0x1a4] ss:$8 sps:$4 sm:$0xff] (!%p1644_p6)   ;;  %v1939_v27 = vld [vmem:[%s2393_s3 + $0xd4] ss:$8 sps:$4 sm:$0xff] (!%p1644_p6)  }
  0x58   : > { %729 = vmatmul.mubr.bf16.vlgmr.msra.gmra.mrb[0].mxu0 %v310_v4  ;;  %770 = vmatmul.mubr.bf16.vlgmr.msra.gmra.mrb[0].mxu1 %v310_v4  ;;  %v1925_v4 = vld [vmem:[%s2393_s3 + $0xa0] ss:$8 sps:$4 sm:$0xff] (!%p1644_p6)  }
  0x59   : > { %1268 = vmatpush1.bf16.msra.mxu1 (!%p1644_p6), %v1865_v28  ;;  %1309 = vmatpush1.bf16.msra.mxu0 (!%p1644_p6), %v1866_v29  ;;  %v1941_v29 = vld [vmem:[%s2393_s3 + $0x1d4] ss:$8 sps:$4 sm:$0xff] (!%p1644_p6)  }
  0x5a   : > { %1269 = vmatprep.subr.bf16.mxu1 (!%p1644_p6), %v1867_v30  ;;  %1310 = vmatprep.subr.bf16.mxu0 (!%p1644_p6), %v1869_v31  ;;  %v1943_v31 = vld [vmem:[%s2393_s3 + $0xd0] ss:$8 sps:$4 sm:$0xff] (!%p1644_p6)  }
  0x5d   : > { %1270 = vmatpush1.bf16.msra.mxu1 (!%p1644_p6), %v1871_v32  ;;  %1311 = vmatpush1.bf16.msra.mxu0 (!%p1644_p6), %v1872_v33  ;;  %v1944_v33 = vld [vmem:[%s2393_s3 + $0x1d0] ss:$8 sps:$4 sm:$0xff] (!%p1644_p6)  }
  0x5e   : > { %1271 = vmatprep.subr.bf16.mxu1 (!%p1644_p6), %v1873_v34  ;;  %1312 = vmatprep.subr.bf16.mxu0 (!%p1644_p6), %v1875_v35  ;;  %v1945_v35 = vld [vmem:[%s2393_s3 + $0xe4] ss:$8 sps:$4 sm:$0xff] (!%p1644_p6)  }
  0x61   : > { %1272 = vmatpush1.bf16.msra.mxu1 (!%p1644_p6), %v1877_v36  ;;  %1313 = vmatpush1.bf16.msra.mxu0 (!%p1644_p6), %v1878_v37  ;;  %v1947_v36 = vld [vmem:[%s2393_s3 + $0x1e4] ss:$8 sps:$4 sm:$0xff] (!%p1644_p6)  }
  0x62   : > { %1273 = vmatprep.subr.bf16.mxu1 (!%p1644_p6), %v1879_v38  ;;  %1314 = vmatprep.subr.bf16.mxu0 (!%p1644_p6), %v1881_v39  ;;  %v1949_v38 = vld [vmem:[%s2393_s3 + $0xe0] ss:$8 sps:$4 sm:$0xff] (!%p1644_p6)  }
  0x63   : > { %v1950_v39 = vld [vmem:[%s2393_s3 + $0x1e0] ss:$8 sps:$4 sm:$0xff] (!%p1644_p6)  }
  0x65   : > { %1274 = vmatpush1.bf16.msra.mxu1 (!%p1644_p6), %v1883_v40  ;;  %1315 = vmatpush1.bf16.msra.mxu0 (!%p1644_p6), %v1884_v41  ;;  %v1951_v40 = vld [vmem:[%s2393_s3 + $0xf4] ss:$8 sps:$4 sm:$0xff] (!%p1644_p6)  }
  0x66   : > { %1275 = vmatprep.subr.bf16.mxu1 (!%p1644_p6), %v1885_v42  ;;  %1316 = vmatprep.subr.bf16.mxu0 (!%p1644_p6), %v1887_v43  ;;  %v1953_v41 = vld [vmem:[%s2393_s3 + $0x1f4] ss:$8 sps:$4 sm:$0xff] (!%p1644_p6)  }
  0x69   : > { %1276 = vmatpush1.bf16.msra.mxu1 (!%p1644_p6), %v1889_v44  ;;  %1317 = vmatpush1.bf16.msra.mxu0 (!%p1644_p6), %v1890_v45 }
  0x6a   : > { %1277 = vmatprep.subr.bf16.mxu1 (!%p1644_p6), %v1891_v46  ;;  %1318 = vmatprep.subr.bf16.mxu0 (!%p1644_p6), %v1893_v47  ;;  %v1955_v47 = vld [vmem:[%s2393_s3 + $0xf0] ss:$8 sps:$4 sm:$0xff] (!%p1644_p6)  }
  0x6d   : > { %1278 = vmatpush1.bf16.msra.mxu1 (!%p1644_p6), %v1895_v48  ;;  %1319 = vmatpush1.bf16.msra.mxu0 (!%p1644_p6), %v1896_v49  ;;  %v1956_v48 = vld [vmem:[%s2393_s3 + $0x1f0] ss:$8 sps:$4 sm:$0xff] (!%p1644_p6)  }
  0x6e   : > { %1279 = vmatprep.subr.bf16.mxu1 (!%p1644_p6), %v1897_v50  ;;  %1320 = vmatprep.subr.bf16.mxu0 (!%p1644_p6), %v1899_v51  ;;  %v1957_v51 = vld [vmem:[%s2395_s5 + $0x40] sm:$0xff] (!%p1644_p6)  }
  0x71   : > { %1280 = vmatpush1.bf16.msra.mxu1 (!%p1644_p6), %v1901_v52  ;;  %1321 = vmatpush1.bf16.msra.mxu0 (!%p1644_p6), %v1902_v53 }
  0x72   : > { %1281 = vmatprep.subr.bf16.mxu1 (!%p1644_p6), %v1903_v54  ;;  %1322 = vmatprep.subr.bf16.mxu0 (!%p1644_p6), %v1905_v55  ;;  %v1958_v54 = vld [vmem:[%s2395_s5] sm:$0xff] (!%p1644_p6)   ;;  %v1959_v55 = vld [vmem:[%s2395_s5 + $0x48] sm:$0xff] (!%p1644_p6)  }
  0x75   : > { %1282 = vmatpush1.bf16.msra.mxu1 (!%p1644_p6), %v1907_v56  ;;  %1323 = vmatpush1.bf16.msra.mxu0 (!%p1644_p6), %v1908_v57  ;;  %v1960_v56 = vld [vmem:[%s2395_s5 + $0x8] sm:$0xff] (!%p1644_p6)   ;;  %v1961_v57 = vld [vmem:[%s2395_s5 + $0x50] sm:$0xff] (!%p1644_p6)  }
  0x76   : > { %1283 = vmatprep.subr.bf16.mxu1 (!%p1644_p6), %v1909_v58  ;;  %1324 = vmatprep.subr.bf16.mxu0 (!%p1644_p6), %v1911_v59  ;;  %v1962_v58 = vld [vmem:[%s2395_s5 + $0x10] sm:$0xff] (!%p1644_p6)   ;;  %v1963_v59 = vld [vmem:[%s2395_s5 + $0x58] sm:$0xff] (!%p1644_p6)  }
  0x79   : > { %1284 = vmatpush1.bf16.msra.mxu1 (!%p1644_p6), %v1913_v60  ;;  %1325 = vmatpush1.bf16.msra.mxu0 (!%p1644_p6), %v1914_v61  ;;  %v1964_v60 = vld [vmem:[%s2395_s5 + $0x18] sm:$0xff] (!%p1644_p6)   ;;  %v1965_v61 = vld [vmem:[%s2395_s5 + $0x60] sm:$0xff] (!%p1644_p6)  }
  0x7a   : > { %1285 = vmatprep.subr.bf16.mxu1 (!%p1644_p6), %v1915_v62  ;;  %1326 = vmatprep.subr.bf16.mxu0 (!%p1644_p6), %v1917_v63  ;;  %v1966_v62 = vld [vmem:[%s2395_s5 + $0x20] sm:$0xff] (!%p1644_p6)   ;;  %v1967_v63 = vld [vmem:[%s2395_s5 + $0x68] sm:$0xff] (!%p1644_p6)  }
  0x7d   : > { %1286 = vmatpush1.bf16.msra.mxu1 (!%p1644_p6), %v1919_v0  ;;  %1327 = vmatpush1.bf16.msra.mxu0 (!%p1644_p6), %v1920_v1  ;;  %v1968_v0 = vld [vmem:[%s2395_s5 + $0x28] sm:$0xff] (!%p1644_p6)   ;;  %v1969_v1 = vld [vmem:[%s2395_s5 + $0x70] sm:$0xff] (!%p1644_p6)  }
  0x7e   : > { %1287 = vmatprep.subr.bf16.mxu1 (!%p1644_p6), %v1921_v2  ;;  %1328 = vmatprep.subr.bf16.mxu0 (!%p1644_p6), %v1923_v3  ;;  %v1970_v2 = vld [vmem:[%s2395_s5 + $0x30] sm:$0xff] (!%p1644_p6)   ;;  %v1971_v3 = vld [vmem:[%s2395_s5 + $0x78] sm:$0xff] (!%p1644_p6)  }
  0x81   : > { %1288 = vmatpush1.bf16.msra.mxu1 (!%p1644_p6), %v1925_v4  ;;  %1329 = vmatpush1.bf16.msra.mxu0 (!%p1644_p6), %v1926_v5  ;;  %v1972_v4 = vld [vmem:[%s2395_s5 + $0x38] sm:$0xff] (!%p1644_p6)   ;;  %v935_v5 = vld [vmem:[%s2394_s4] sm:$0x3] (!%p1644_p6) }
  0x82   : > { %1289 = vmatprep.subr.bf16.mxu1 (!%p1644_p6), %v1927_v7  ;;  %v940_v7 = vrot.slane (!%p1644_p6), %v935_v5, %v811_v6 }
 0x12b   : > { %v730_v10 = vpop.f32.mrb[0].mxu0  ;;  %v771_v11 = vpop.f32.mrb[0].mxu1 }
 0x12c   : > { %v732_v13 = vpop.f32.mrb[1].mxu0  ;;  %v773_v14 = vpop.f32.mrb[1].mxu1 }
 0x12d   : > { %v782_v15 = vcombine.low %v730_v10, %v732_v13  ;;  %v783_v16 = vcombine.low %v771_v11, %v773_v14  ;;  %v734_v17 = vpop.f32.mrb[2].mxu0  ;;  %v775_v18 = vpop.f32.mrb[2].mxu1  ;;  %v819_v10 = vsub.s32 (!%p1644_p6), 2, %v2111_v9  ;;  %v1929_v11 = vld [vmem:[%s2393_s3 + $0x1b4] ss:$8 sps:$4 sm:$0xff] (!%p1644_p6)   ;;  %v823_v13 = vsub.s32 (!%p1644_p6), 3, %v2111_v9 }
 0x12e   : > { %v735_v19 = vpop.f32.mrb[3].mxu0  ;;  %v776_v20 = vpop.f32.mrb[3].mxu1  ;;  %v1931_v14 = vld [vmem:[%s2393_s3 + $0xb0] ss:$8 sps:$4 sm:$0xff] (!%p1644_p6)   ;;  %v1933_v17 = vld [vmem:[%s2393_s3 + $0xc4] ss:$8 sps:$4 sm:$0xff] (!%p1644_p6)   ;;  %1330 = vmatprep.subr.bf16.mxu0 (!%p1644_p6), %v1929_v11 }
 0x12f   : > { %v790_v21 = vrot.slane %v782_v15, %v2114_v12  ;;  %v797_v22 = vrot.slane %v783_v16, %v2114_v12  ;;  %805 = sbr.rel (%p1644_p6) target bundleno = 768 (0x300), region = 56  ;;  %v1932_v15 = vld [vmem:[%s2393_s3 + $0x1b0] ss:$8 sps:$4 sm:$0xff] (!%p1644_p6)   ;;  %v807_v16 = vld [vmem:[%s2392_s2] sm:$0xf] (!%p1644_p6)  ;;  %1290 = vmatpush1.bf16.msra.mxu1 (!%p1644_p6), %v1931_v14 }
 0x130   : > { %v812_v18 = vrot.slane (!%p1644_p6), %v807_v16, %v811_v6  ;;  %v816_v19 = vrot.slane (!%p1644_p6), %v807_v16, %v815_v8  ;;  %v820_v20 = vrot.slane (!%p1644_p6), %v807_v16, %v819_v10  ;;  %1331 = vmatpush1.bf16.msra.mxu0 (!%p1644_p6), %v1932_v15  ;;  %1291 = vmatprep.subr.bf16.mxu1 (!%p1644_p6), %v1933_v17  ;;  %v1709_v6 = vld [vmem:[%s2396_s6] ss:$0 sm:$0xff] (!%p1644_p6) }
 0x131   : > { %v798_v24 = vcombine.low %v790_v21, %v797_v22  ;;  %v1935_v21 = vld [vmem:[%s2393_s3 + $0x1c4] ss:$8 sps:$4 sm:$0xff] (!%p1644_p6)   ;;  %v824_v22 = vrot.slane (!%p1644_p6), %v807_v16, %v823_v13  ;;  %v944_v10 = vrot.slane (!%p1644_p6), %v935_v5, %v815_v8 }
 0x132   : > { %1332 = vmatprep.subr.bf16.mxu0 (!%p1644_p6), %v1935_v21 }
 0x133   : > { %v800_v25 = vadd.f32 %v798_v24, %v297_v23  ;;  %v1937_v23 = vld [vmem:[%s2393_s3 + $0xc0] ss:$8 sps:$4 sm:$0xff] (!%p1644_p6)   ;;  %v825_v24 = vcombine.low (!%p1644_p6), %v812_v18, %v816_v19  ;;  %v826_v26 = vcombine.low (!%p1644_p6), %v820_v20, %v824_v22 }
 0x134   : > { %1292 = vmatpush1.bf16.msra.mxu1 (!%p1644_p6), %v1937_v23 }
 0x135   : > { %801 = vst [vmem:[#allocation2] sm:$0xff] %v800_v25  ;;  %v1938_v25 = vld [vmem:[%s2393_s3 + $0x1c0] ss:$8 sps:$4 sm:$0xff] (!%p1644_p6)   ;;  %v833_v28 = vrot.slane (!%p1644_p6), %v825_v24, %v2114_v12  ;;  %v840_v30 = vrot.slane (!%p1644_p6), %v826_v26, %v2114_v12  ;;  %1293 = vmatprep.subr.bf16.mxu1 (!%p1644_p6), %v1939_v27 }
 0x136   : > { %1333 = vmatpush1.bf16.msra.mxu0 %v1938_v25 }
 0x137   : > { %v841_v34 = vcombine.low %v833_v28, %v840_v30  ;;  %1334 = vmatprep.subr.bf16.mxu0 %v1941_v29 }
 0x138   : > { %1294 = vmatpush1.bf16.msra.mxu1 %v1943_v31 }
 0x139   : > { %1295 = vmatprep.subr.bf16.mxu1 %v1945_v35 }
 0x13a   : > { %1335 = vmatpush1.bf16.msra.mxu0 %v1944_v33 }
 0x13b   : > { %1336 = vmatprep.subr.bf16.mxu0 %v1947_v36 }
 0x13c   : > { %v806_v32 = vld [vmem:[#allocation2] sm:$0xff]  ;;  %1296 = vmatpush1.bf16.msra.mxu1 %v1949_v38 }
 0x13d   : > { %v843_v37 = vadd.f32 %v841_v34, %v806_v32  ;;  %1297 = vmatprep.subr.bf16.mxu1 %v1951_v40 }
 0x13e   : > { %1337 = vmatpush1.bf16.msra.mxu0 %v1950_v39 }
 0x13f   : > { %v844_v42 = vmax.f32 %v843_v37, 0.0  ;;  %1338 = vmatprep.subr.bf16.mxu0 %v1953_v41 }
 0x140   : > { %1298 = vmatpush1.bf16.msra.mxu1 %v1955_v47 }
 0x141   : > { %v853_v43 = vrot.slane %v844_v42, %v2114_v12  ;;  %v846_v44 = vcombine.high %v844_v42, %v844_v42  ;;  %1729 = vmatprep.subr.bf16.mxu1 %v1957_v51 }
 0x142   : > { %1339 = vmatpush1.bf16.msra.mxu0 %v1956_v48 }
 0x143   : > { %v861_v45 = vcombine.high %v853_v43, %v853_v43  ;;  %v860_v46 = vrot.slane %v846_v44, %v2114_v12  ;;  %v867_v52 = vpack.c.bf16 %v853_v43, %v853_v43 }
 0x145   : > { %v868_v49 = vpack.c.bf16 %v861_v45, %v861_v45  ;;  %v862_v50 = vcombine.high %v860_v46, %v860_v46  ;;  %v869_v53 = vpack.c.bf16 %v860_v46, %v860_v46 }
 0x147   : > { %1299 = vmatprep.mubr.bf16.mxu1 %v868_v49  ;;  %v870_v12 = vpack.c.bf16 %v862_v50, %v862_v50 }
 0x148   : > { %1300 = vmatmul.mubr.bf16.vlgmr.msra.gmra.mrb[0].mxu1 %v867_v52 }
 0x149   : > { %1340 = vmatprep.mubr.bf16.mxu0 %v870_v12  ;;  %1730 = vmatpush3.bf16.msra.mxu1 %v1958_v54 }
 0x14a   : > { %1341 = vmatmul.mubr.bf16.vlgmr.msra.gmra.mrb[0].mxu0 %v869_v53  ;;  %1731 = vmatprep.subr.bf16.mxu1 %v1959_v55 }
 0x14d   : > { %1732 = vmatpush3.bf16.msra.mxu1 %v1960_v56 }
 0x14e   : > { %1733 = vmatprep.subr.bf16.mxu1 %v1961_v57 }
 0x151   : > { %1734 = vmatpush3.bf16.msra.mxu1 %v1962_v58 }
 0x152   : > { %1735 = vmatprep.subr.bf16.mxu1 %v1963_v59 }
 0x155   : > { %1736 = vmatpush3.bf16.msra.mxu1 %v1964_v60 }
 0x156   : > { %1737 = vmatprep.subr.bf16.mxu1 %v1965_v61 }
 0x159   : > { %1738 = vmatpush3.bf16.msra.mxu1 %v1966_v62 }
 0x15a   : > { %1739 = vmatprep.subr.bf16.mxu1 %v1967_v63 }
 0x15d   : > { %1740 = vmatpush3.bf16.msra.mxu1 %v1968_v0 }
 0x15e   : > { %1741 = vmatprep.subr.bf16.mxu1 %v1969_v1 }
 0x161   : > { %1742 = vmatpush3.bf16.msra.mxu1 %v1970_v2 }
 0x162   : > { %1743 = vmatprep.subr.bf16.mxu1 %v1971_v3 }
 0x165   : > { %1744 = vmatpush3.bf16.msra.mxu1 %v1972_v4 }
 0x21b   : > { %v1301_v11 = vpop.f32.mrb[0].mxu1 }
 0x21c   : > { %v1302_v14 = vadd.f32 %v1301_v11, %v940_v7  ;;  %v1303_v15 = vpop.f32.mrb[1].mxu1 }
 0x21d   : > { %v1342_v13 = vpop.f32.mrb[0].mxu0  ;;  %v1304_v17 = vadd.f32 %v1303_v15, %v944_v10  ;;  %v1305_v18 = vpop.f32.mrb[2].mxu1 }
 0x21e   : > { %v1344_v16 = vpop.f32.mrb[1].mxu0  ;;  %v1343_v20 = vadd.f32 %v1342_v13, %v1302_v14  ;;  %v1306_v21 = vpop.f32.mrb[3].mxu1 }
 0x21f   : > { %v1346_v19 = vpop.f32.mrb[2].mxu0  ;;  %v1345_v23 = vadd.f32 %v1344_v16, %v1304_v17 }
 0x220   : > { %v1347_v22 = vpop.f32.mrb[3].mxu0  ;;  %v1349_v24 = vmax.f32 %v1343_v20, 0.0 }
 0x221   : > { %v1350_v25 = vmax.f32 %v1345_v23, 0.0 }
 0x222   : > { %v1351_v27 = vpack.c.bf16 %v1349_v24, %v1349_v24 }
 0x223   : > { %v1352_v26 = vpack.c.bf16 %v1350_v25, %v1350_v25 }
 0x225   : > { %1520 = vmatprep.mubr.bf16.mxu1 %v1352_v26 }
 0x226   : > { %1521 = vmatmul.mubr.bf16.vlgmr.msra.gmra.mrb[4].mxu1 %v1351_v27 }
 0x2f9   : > { %v1745_v9 = vpop.f32.mrb[4].mxu1 }
 0x2fa   : > { %v1746_v8 = vpop.f32.mrb[5].mxu1 }
 0x2fb   : > { %v1747_v28 = vadd.f32 %v1746_v8, %v1745_v9  ;;  %v1748_v29 = vpop.f32.mrb[6].mxu1 }
 0x2fc   : > { %v1749_v30 = vpop.f32.mrb[7].mxu1 }
 0x2fd   : > { %v1523_v31 = vadd.f32 %v1747_v28, %v1709_v6 }
 0x2ff   : > { %1528 = vst [vmem:[%s2397_s7] sm:$0x3] %v1523_v31 }
 0x300 PF: > { %s17_s24 = sadd.s32 1, %s1979_s24  }
 0x301   : > { %p14_p7 = scmp.ge.s32.totalorder %s17_s24, 6  }
 0x303   :  { %16 = sbr.rel (!%p14_p7) target bundleno = 1 (0x1), region = 85 }

// kernel: pointnet_cls_forward.4
= control target key start
LH: loop header
LB: loop body
LE: loop exit
PB: predicated region body
PF: predicated region fallthrough
CT: control target
= control target key end

     0   :  { %s1826_s24 = smov 0   ;;  %s1828_s25 = smov 0   ;;  %s2287_s0 = inlined_call_operand.vmem [shape: f32[2,256,3], index: 0, kind: input, shape index: {}]   ;;  %s2288_s1 = inlined_call_operand.vmem [shape: f32[1,3,64], index: 1, kind: input, shape index: {}]   ;;  %s2289_s2 = inlined_call_operand.vmem [shape: f32[1,64], index: 2, kind: input, shape index: {}]   ;;  %s2290_s3 = inlined_call_operand.vmem [shape: bf16[64,128], index: 3, kind: input, shape index: {}]   ;;  %s2291_s4 = inlined_call_operand.vmem [shape: f32[1,128], index: 4, kind: input, shape index: {}]   ;;  %s2292_s5 = inlined_call_operand.vmem [shape: bf16[128,1024], index: 5, kind: input, shape index: {}]   ;;  %s2293_s6 = inlined_call_operand.vmem [shape: f32[1,1024], index: 6, kind: input, shape index: {}]   ;;  %s2294_s7 = inlined_call_operand.vmem [shape: f32[2,1,1024], index: 7, kind: output, shape index: {}]  }
   0x1   :  { %s1830_s26 = smov 0   ;;  %s1832_s27 = smov 0  }
   0x2   :  { %s1834_s28 = smov 0  }
   0x3 LB: > { %s26_s29 = sadd.s32 1, %s1771_s26  ;;  %s29_s30 = sadd.s32 1, %s1775_s27  ;;  %s1779_s28 = sphi %s1834_s28, %s17_s28   ;;  %s1775_s27 = sphi %s1832_s27, %s2298_s27   ;;  %s1771_s26 = sphi %s1830_s26, %s2297_s26   ;;  %s1767_s25 = sphi %s1828_s25, %s2296_s25   ;;  %s1763_s24 = sphi %s1826_s24, %s2295_s24  }
   0x4   : > { %p27_p0 = scmp.ge.s32.totalorder %s26_s29, 4  ;;  %p1556_p1 = scmp.ge.s32.totalorder %s1779_s28, 1 }
   0x5   : > { %p256_p2 = scmp.lt.s32.totalorder %s1779_s28, 9 }
   0x6   : > { %s2300_s29 = smov (%p27_p0, %s26_s29), 0  ;;  %s2302_s30 = smov (!%p27_p0, %s29_s30), %s1775_s27 }
   0x7   : > { %p257_p3 = pnand %p1556_p1, %p256_p2  ;;  %p31_p4 = scmp.ge.s32.totalorder %s2302_s30, 2 }
   0x8   : > { %s1557_s8 = sshll.u32 (!%p257_p3), %s1763_s24, 3  ;;  %p292_p5 = scmp.lt.s32.totalorder (!%p257_p3), %s1767_s25, 1 }
   0x9   : > { %s2304_s30 = smov (%p31_p4, %s2302_s30), 0  ;;  %260 = sbr.rel (%p257_p3) target bundleno = 749 (0x2ed), region = 48 }
   0xa   : > { %p294_p6 = scmp.lt.s32.totalorder (!%p257_p3), %s1557_s8, 31  ;;  %p1561_p7 = scmp.ne.s32.totalorder (!%p257_p3), %s1763_s24, 0 }
  0x10   : > { %s2306_s25 = smov (!%p292_p5, %s1767_s25), 1  ;;  %s2308_s8 = smov (!%p294_p6, %s1557_s8), 31 }
  0x11   : > { %s1558_s9 = sshll.u32 %s2306_s25, 5  ;;  %s1560_s10 = sshll.u32 %s2306_s25, 3  ;;  %v1781_v0 = vmov (!%p1561_p7), -inf  }
  0x12   : > { %s297_s11 = sadd.s32 %s1558_s9, %s2308_s8  ;;  %s1862_s14 = scalar_lea.vmem %s2294_s7, %s1560_s10 }
  0x13   : > { %s1559_s15 = sshll.u32 %s297_s11, 3  ;;  %309 = sbr.rel (%p1561_p7) target bundleno = 26 (0x1a), region = 52  ;;  %310 = vst [vmem:[%s1862_s14] sm:$0xff] (!%p1561_p7), %v1781_v0 }
  0x14   : > { %s1867_s18 = scalar_lea.vmem %s2287_s0, %s1559_s15 }
  0x1a PF: > { %v312_v1 = vld [vmem:[%s1867_s18 + $0x8] sm:$0xff]  ;;  %v311_v2 = vld [vmem:[%s1867_s18] sm:$0xff]  ;;  %v1782_v3 = vmov 2   ;;  %v1783_v4 = vmov 1   ;;  %v1784_v5 = vmov 0   ;;  %v314_v6 = vld [vmem:[%s1867_s18 + $0x18] sm:$0xff]  ;;  %v360_v44 = vlaneseq }
  0x1b   : > { %1728 = vset.pattern.permute.xlu0 %v1782_v3  ;;  %1724 = vset.pattern.permute.xlu1 %v1783_v4  ;;  %v313_v7 = vld [vmem:[%s1867_s18 + $0x10] sm:$0xff]  ;;  %v315_v8 = vld [vmem:[%s1867_s18 + $0x20] sm:$0xff]  ;;  %v316_v10 = vld [vmem:[%s1867_s18 + $0x28] sm:$0xff]  ;;  %vm542_vm0 = vcmask 523264   ;;  %p1636_p8 = scmp.ne.s32.totalorder %s1763_s24, 3 }
  0x1c   : > { %429 = vperm.xlu0 %1728, %v312_v1   ;;  %373 = vperm.xlu1 %1724, %v311_v2   ;;  %v1737_v9 = vld [vmem:[%s2290_s3] sm:$0xff]   ;;  %v1738_v11 = vld [vmem:[%s2290_s3 + $0x8] sm:$0xff]   ;;  %v317_v12 = vld [vmem:[%s1867_s18 + $0x30] sm:$0xff]  ;;  %v1946_v47 = vshrl.u32 %v360_v44, 7 }
  0x1d   : > { %1048 = vmatprep.mubr.bf16.mxu1 %v1784_v5  ;;  %1647 = vmatprep.subr.bf16.mxu0 %v1737_v9  ;;  %v1739_v13 = vld [vmem:[%s2290_s3 + $0x10] sm:$0xff]   ;;  %v1740_v14 = vld [vmem:[%s2290_s3 + $0x18] sm:$0xff]   ;;  %v632_v16 = vld [vmem:[%s2292_s5] sm:$0xff] }
  0x1e   : > { %1648 = vmatpush3.bf16.msra.mxu0 %v1737_v9  ;;  %v318_v15 = vld [vmem:[%s1867_s18 + $0x38] sm:$0xff]  ;;  %v636_v17 = vld [vmem:[%s2292_s5 + $0x20] sm:$0xff]  ;;  %v1905_v18 = vld [vmem:[%s2292_s5 + $0x8] sm:$0xff]  ;;  %v362_v49 = vsub.s32 0, %v1946_v47  ;;  %v406_v51 = vsub.s32 1, %v1946_v47  ;;  %v458_v52 = vsub.s32 2, %v1946_v47 }
  0x1f   : > { %1649 = vmatprep.subr.bf16.mxu0 %v1738_v11  ;;  %v1573_v19 = vcombine.high %v632_v16, %v636_v17  ;;  %v1910_v20 = vld [vmem:[%s2292_s5 + $0x28] sm:$0xff]  ;;  %v1572_v21 = vcombine.low %v632_v16, %v636_v17  ;;  %v640_v22 = vld [vmem:[%s2292_s5 + $0x40] sm:$0xff] }
  0x20   : > { %1729 = vset.pattern.permute.xlu0 %v1784_v5  ;;  %377 = vperm.xlu1 %1724, %v312_v1   ;;  %v644_v23 = vld [vmem:[%s2292_s5 + $0x60] sm:$0xff]  ;;  %v1574_v24 = vcombine.low %v1905_v18, %v1910_v20  ;;  %v1575_v25 = vcombine.high %v1905_v18, %v1910_v20  ;;  %v653_v44 = vld [vmem:[%s2292_s5 + $0xa8] sm:$0xff] }
  0x21   : > { %322 = vperm.xlu0 %1729, %v311_v2   ;;  %v1581_v26 = vcombine.high %v640_v22, %v644_v23  ;;  %v648_v27 = vld [vmem:[%s2292_s5 + $0x80] sm:$0xff]  ;;  %1016 = vmatprep.subr.bf16.mxu1 %v1573_v19  ;;  %v1580_v29 = vcombine.low %v640_v22, %v644_v23  ;;  %v665_v18 = vld [vmem:[%s2292_s5 + $0x108] sm:$0xff] }
  0x22   : > { %1650 = vmatpush3.bf16.msra.mxu0 %v1738_v11  ;;  %v652_v28 = vld [vmem:[%s2292_s5 + $0xa0] sm:$0xff]  ;;  %1017 = vmatpush1.bf16.msra.mxu1 %v1572_v21  ;;  %v669_v20 = vld [vmem:[%s2292_s5 + $0x128] sm:$0xff] }
  0x23   : > { %1651 = vmatprep.subr.bf16.mxu0 %v1739_v13  ;;  %1018 = vmatprep.subr.bf16.mxu1 %v1581_v26  ;;  %v1589_v30 = vcombine.high %v648_v27, %v652_v28  ;;  %v656_v31 = vld [vmem:[%s2292_s5 + $0xc0] sm:$0xff]  ;;  %v1588_v33 = vcombine.low %v648_v27, %v652_v28 }
  0x24   : > { %1725 = vset.pattern.permute.xlu1 %v1784_v5  ;;  %v660_v32 = vld [vmem:[%s2292_s5 + $0xe0] sm:$0xff] }
  0x25   : > { %327 = vperm.xlu0 %1729, %v312_v1   ;;  %337 = vperm.xlu1 %1725, %v314_v6   ;;  %v1597_v34 = vcombine.high %v656_v31, %v660_v32  ;;  %v664_v35 = vld [vmem:[%s2292_s5 + $0x100] sm:$0xff]  ;;  %v1596_v37 = vcombine.low %v656_v31, %v660_v32 }
  0x26   : > { %1652 = vmatpush3.bf16.msra.mxu0 %v1739_v13  ;;  %1019 = vmatpush1.bf16.msra.mxu1 %v1580_v29  ;;  %v668_v36 = vld [vmem:[%s2292_s5 + $0x120] sm:$0xff] }
  0x27   : > { %1653 = vmatprep.subr.bf16.mxu0 %v1740_v14  ;;  %1020 = vmatprep.subr.bf16.mxu1 %v1589_v30  ;;  %v1605_v38 = vcombine.high %v664_v35, %v668_v36  ;;  %v672_v39 = vld [vmem:[%s2292_s5 + $0x140] sm:$0xff]  ;;  %v1604_v41 = vcombine.low %v664_v35, %v668_v36  ;;  %v641_v35 = vld [vmem:[%s2292_s5 + $0x48] sm:$0xff] }
  0x28   : > { %v676_v40 = vld [vmem:[%s2292_s5 + $0x160] sm:$0xff]  ;;  %v645_v36 = vld [vmem:[%s2292_s5 + $0x68] sm:$0xff] }
  0x29   : > { %332 = vperm.xlu0 %1729, %v313_v7   ;;  %1726 = vset.pattern.permute.xlu1 %v1783_v4  ;;  %v1613_v42 = vcombine.high %v672_v39, %v676_v40  ;;  %v1612_v43 = vcombine.low %v672_v39, %v676_v40  ;;  %v319_v53 = vld [vmem:[%s2288_s1] sm:$0x7] }
  0x2a   : > { %385 = vperm.xlu1 %1726, %v314_v6   ;;  %1654 = vmatpush3.bf16.msra.mxu0 %v1740_v14  ;;  %v1954_v54 = vrot.slane %v319_v53, %v362_v49  ;;  %v1956_v57 = vrot.slane %v319_v53, %v406_v51  ;;  %v1958_v58 = vrot.slane %v319_v53, %v458_v52  ;;  %v661_v49 = vld [vmem:[%s2292_s5 + $0xe8] sm:$0xff] }
  0x2b   : > { %1089 = vmatprep.subr.bf16.mxu0 %v1575_v25  ;;  %1021 = vmatpush1.bf16.msra.mxu1 %v1588_v33 }
  0x2c   : > { %1022 = vmatprep.subr.bf16.mxu1 %v1597_v34 }
  0x2d   : > { %342 = vperm.xlu0 %1729, %v315_v8  }
  0x2e   : > { %1727 = vset.pattern.permute.xlu1 %v1782_v3 }
  0x2f   : > { %425 = vperm.xlu1 %1727, %v311_v2   ;;  %1023 = vmatpush1.bf16.msra.mxu1 %v1596_v37 }
  0x30   : > { %1024 = vmatprep.subr.bf16.mxu1 %v1605_v38 }
  0x31   : > { %1730 = vset.pattern.permute.xlu0 %v1783_v4 }
  0x32   : > { %381 = vperm.xlu0 %1730, %v313_v7  }
  0x33   : > { %433 = vperm.xlu1 %1727, %v313_v7   ;;  %1025 = vmatpush1.bf16.msra.mxu1 %v1604_v41  ;;  %v1970_v7 = vld [vmem:[%s2289_s2] ss:$0 sm:$0xff]  ;;  %v1583_v41 = vcombine.high %v641_v35, %v645_v36 }
  0x34   : > { %1026 = vmatprep.subr.bf16.mxu1 %v1613_v42 }
  0x36   : > { %393 = vperm.xlu0 %1730, %v316_v10  }
  0x37   : > { %437 = vperm.xlu1 %1727, %v314_v6   ;;  %1027 = vmatpush1.bf16.msra.mxu1 %v1612_v43  ;;  %v649_v43 = vld [vmem:[%s2292_s5 + $0x88] sm:$0xff] }
  0x38   : > { %v1590_v52 = vcombine.low %v649_v43, %v653_v44 }
  0x3a   : > { %397 = vperm.xlu0 %1730, %v317_v12  }
  0x3b   : > { %1731 = vset.pattern.permute.xlu1 %v1784_v5 }
  0x3c   : > { %347 = vperm.xlu1 %1731, %v316_v10  }
  0x3e   : > { %1735 = vset.pattern.permute.xlu0 %v1782_v3 }
  0x3f   : > { %441 = vperm.xlu0 %1735, %v315_v8  }
  0x40   : > { %1732 = vset.pattern.permute.xlu1 %v1783_v4 }
  0x41   : > { %389 = vperm.xlu1 %1732, %v315_v8  }
  0x43   : > { %453 = vperm.xlu0 %1735, %v318_v15  }
  0x45   : > { %1733 = vset.pattern.permute.xlu1 %v1784_v5 }
  0x46   : > { %352 = vperm.xlu1 %1733, %v317_v12  }
  0x4a   : > { %357 = vperm.xlu1 %1733, %v318_v15  }
  0x4e   : > { %1734 = vset.pattern.permute.xlu1 %v1783_v4 }
  0x4f   : > { %401 = vperm.xlu1 %1734, %v318_v15  }
  0x53   : > { %1736 = vset.pattern.permute.xlu1 %v1782_v3 }
  0x54   : > { %445 = vperm.xlu1 %1736, %v316_v10  }
  0x58   : > { %449 = vperm.xlu1 %1736, %v317_v12  }
  0x9b   : > { %v374_v45 = vpop.permute.xlu1 %373  ;;  %v430_v46 = vpop.permute.xlu0 %429 }
  0x9c   : > { %v461_v62 = vmul.f32 %v1958_v58, %v430_v46  ;;  %v408_v3 = vmul.f32 %v1956_v57, %v374_v45  ;;  %v1582_v45 = vcombine.low %v641_v35, %v645_v36  ;;  %v1591_v46 = vcombine.high %v649_v43, %v653_v44  ;;  %v688_v44 = vld [vmem:[%s2292_s5 + $0x1c0] sm:$0xff] }
  0x9f   : > { %v378_v48 = vpop.permute.xlu1 %377 }
  0xa0   : > { %v323_v50 = vpop.permute.xlu0 %322  ;;  %v409_v60 = vmul.f32 %v1956_v57, %v378_v48  ;;  %v657_v48 = vld [vmem:[%s2292_s5 + $0xc8] sm:$0xff] }
  0xa1   : > { %v364_v1 = vmul.f32 %v1954_v54, %v323_v50  ;;  %v1599_v53 = vcombine.high %v657_v48, %v661_v49 }
  0xa3   : > { %v416_v8 = vadd.f32 %v408_v3, %v364_v1 }
  0xa4   : > { %v328_v55 = vpop.permute.xlu0 %327  ;;  %v338_v56 = vpop.permute.xlu1 %337 }
  0xa5   : > { %v365_v59 = vmul.f32 %v1954_v54, %v328_v55  ;;  %v367_v22 = vmul.f32 %v1954_v54, %v338_v56  ;;  %v1598_v56 = vcombine.low %v657_v48, %v661_v49  ;;  %v693_v49 = vld [vmem:[%s2292_s5 + $0x1e8] sm:$0xff] }
  0xa7   : > { %v417_v63 = vadd.f32 %v409_v60, %v365_v59  ;;  %v1607_v60 = vcombine.high %v665_v18, %v669_v20 }
  0xa8   : > { %v333_v61 = vpop.permute.xlu0 %332 }
  0xa9   : > { %v386_v0 = vpop.permute.xlu1 %385  ;;  %v469_v4 = vadd.f32 %v461_v62, %v417_v63  ;;  %v366_v10 = vmul.f32 %v1954_v54, %v333_v61  ;;  %v673_v62 = vld [vmem:[%s2292_s5 + $0x148] sm:$0xff] }
  0xaa   : > { %v411_v16 = vmul.f32 %v1956_v57, %v386_v0  ;;  %v677_v63 = vld [vmem:[%s2292_s5 + $0x168] sm:$0xff] }
  0xab   : > { %v484_v13 = vadd.f32 %v1970_v7, %v469_v4  ;;  %v1606_v4 = vcombine.low %v665_v18, %v669_v20  ;;  %v638_v18 = vld [vmem:[%s2292_s5 + $0x30] sm:$0xff]  ;;  %v635_v20 = vld [vmem:[%s2292_s5 + $0x18] sm:$0xff] }
  0xac   : > { %v1964_v2 = vpop.permute.xlu0 %342  ;;  %v419_v28 = vadd.f32 %v411_v16, %v367_v22 }
  0xad   : > { %v492_v25 = vmax.f32 %v484_v13, 0.0  ;;  %v368_v61 = vmul.f32 %v1954_v54, %v1964_v2 }
  0xae   : > { %v426_v6 = vpop.permute.xlu1 %425 }
  0xaf   : > { %v460_v9 = vmul.f32 %v1958_v58, %v426_v6 }
  0xb1   : > { %v468_v11 = vadd.f32 %v460_v9, %v416_v8  ;;  %v382_v12 = vpop.permute.xlu0 %381  ;;  %v1615_v9 = vcombine.high %v673_v62, %v677_v63 }
  0xb2   : > { %v410_v14 = vmul.f32 %v1956_v57, %v382_v12  ;;  %v434_v15 = vpop.permute.xlu1 %433 }
  0xb3   : > { %v462_v17 = vmul.f32 %v1958_v58, %v434_v15  ;;  %v483_v19 = vadd.f32 %v1970_v7, %v468_v11  ;;  %v1614_v15 = vcombine.low %v673_v62, %v677_v63 }
  0xb4   : > { %v418_v21 = vadd.f32 %v410_v14, %v366_v10 }
  0xb5   : > { %v491_v23 = vmax.f32 %v483_v19, 0.0  ;;  %v394_v40 = vpop.permute.xlu0 %393 }
  0xb6   : > { %v470_v26 = vadd.f32 %v462_v17, %v418_v21  ;;  %v438_v27 = vpop.permute.xlu1 %437  ;;  %v413_v2 = vmul.f32 %v1956_v57, %v394_v40  ;;  %v685_v40 = vld [vmem:[%s2292_s5 + $0x1a8] sm:$0xff] }
  0xb7   : > { %v463_v29 = vmul.f32 %v1958_v58, %v438_v27  ;;  %v499_v30 = vpack.c.bf16 %v492_v25, %v491_v23 }
  0xb8   : > { %v485_v31 = vadd.f32 %v1970_v7, %v470_v26 }
  0xb9   : > { %v471_v32 = vadd.f32 %v463_v29, %v419_v28  ;;  %1655 = vmatprep.mubr.msk.bf16.mxu0 %vm542_vm0, %v499_v30  ;;  %v398_v50 = vpop.permute.xlu0 %397 }
  0xba   : > { %v493_v37 = vmax.f32 %v485_v31, 0.0  ;;  %v414_v19 = vmul.f32 %v1956_v57, %v398_v50 }
  0xbb   : > { %v486_v33 = vadd.f32 %v1970_v7, %v471_v32  ;;  %v348_v34 = vpop.permute.xlu1 %347 }
  0xbc   : > { %v369_v10 = vmul.f32 %v1954_v54, %v348_v34 }
  0xbd   : > { %v494_v38 = vmax.f32 %v486_v33, 0.0 }
  0xbe   : > { %v442_v59 = vpop.permute.xlu0 %441  ;;  %v421_v17 = vadd.f32 %v413_v2, %v369_v10  ;;  %v642_v10 = vld [vmem:[%s2292_s5 + $0x50] sm:$0xff] }
  0xbf   : > { %v500_v39 = vpack.c.bf16 %v494_v38, %v493_v37  ;;  %v464_v1 = vmul.f32 %v1958_v58, %v442_v59  ;;  %v684_v38 = vld [vmem:[%s2292_s5 + $0x1a0] sm:$0xff] }
  0xc0   : > { %v390_v42 = vpop.permute.xlu1 %389 }
  0xc1   : > { %1656 = vmatmul.mubr.msk.bf16.vlgmr.msra.gmra.mrb[0].mxu0 %vm542_vm0, %v500_v39  ;;  %v412_v55 = vmul.f32 %v1956_v57, %v390_v42 }
  0xc2   : > { %1090 = vmatpush1.bf16.msra.mxu0 %v1574_v24  ;;  %v454_v8 = vpop.permute.xlu0 %453 }
  0xc3   : > { %1091 = vmatprep.subr.bf16.mxu0 %v1583_v41  ;;  %v420_v0 = vadd.f32 %v412_v55, %v368_v61  ;;  %v467_v14 = vmul.f32 %v1958_v58, %v454_v8  ;;  %v2082_v61 = vld [vmem:[%s2291_s4] ss:$0 sm:$0xff] }
  0xc5   : > { %v353_v51 = vpop.permute.xlu1 %352  ;;  %v472_v12 = vadd.f32 %v464_v1, %v420_v0 }
  0xc6   : > { %1092 = vmatpush1.bf16.msra.mxu0 %v1582_v45  ;;  %v370_v21 = vmul.f32 %v1954_v54, %v353_v51  ;;  %v692_v45 = vld [vmem:[%s2292_s5 + $0x1e0] sm:$0xff] }
  0xc7   : > { %1093 = vmatprep.subr.bf16.mxu0 %v1591_v46  ;;  %v487_v23 = vadd.f32 %v1970_v7, %v472_v12  ;;  %v689_v46 = vld [vmem:[%s2292_s5 + $0x1c8] sm:$0xff]  ;;  %v1629_v48 = vcombine.high %v688_v44, %v692_v45 }
  0xc8   : > { %v422_v28 = vadd.f32 %v414_v19, %v370_v21  ;;  %v1630_v50 = vcombine.low %v689_v46, %v693_v49  ;;  %v1631_v51 = vcombine.high %v689_v46, %v693_v49  ;;  %v679_v46 = vld [vmem:[%s2292_s5 + $0x178] sm:$0xff] }
  0xc9   : > { %v358_v24 = vpop.permute.xlu1 %357  ;;  %v495_v31 = vmax.f32 %v487_v23, 0.0  ;;  %v654_v23 = vld [vmem:[%s2292_s5 + $0xb0] sm:$0xff] }
  0xca   : > { %1094 = vmatpush1.bf16.msra.mxu0 %v1590_v52  ;;  %v371_v11 = vmul.f32 %v1954_v54, %v358_v24  ;;  %v1628_v52 = vcombine.low %v688_v44, %v692_v45  ;;  %v678_v44 = vld [vmem:[%s2292_s5 + $0x170] sm:$0xff]  ;;  %v675_v45 = vld [vmem:[%s2292_s5 + $0x158] sm:$0xff] }
  0xcb   : > { %1095 = vmatprep.subr.bf16.mxu0 %v1599_v53  ;;  %v634_v53 = vld [vmem:[%s2292_s5 + $0x10] sm:$0xff] }
  0xcc   : > { %v1576_v24 = vcombine.low %v634_v53, %v638_v18  ;;  %v1577_v55 = vcombine.high %v634_v53, %v638_v18  ;;  %v686_v53 = vld [vmem:[%s2292_s5 + $0x1b0] sm:$0xff]  ;;  %v683_v18 = vld [vmem:[%s2292_s5 + $0x198] sm:$0xff] }
  0xce   : > { %v402_v3 = vpop.permute.xlu1 %401  ;;  %1096 = vmatpush1.bf16.msra.mxu0 %v1598_v56  ;;  %v639_v56 = vld [vmem:[%s2292_s5 + $0x38] sm:$0xff] }
  0xcf   : > { %v415_v6 = vmul.f32 %v1956_v57, %v402_v3  ;;  %1097 = vmatprep.subr.bf16.mxu0 %v1607_v60  ;;  %v2074_v59 = vcombine.low %v635_v20, %v639_v56  ;;  %v2076_v60 = vcombine.high %v635_v20, %v639_v56  ;;  %v687_v20 = vld [vmem:[%s2292_s5 + $0x1b8] sm:$0xff] }
  0xd1   : > { %v423_v13 = vadd.f32 %v415_v6, %v371_v11 }
  0xd2   : > { %1098 = vmatpush1.bf16.msra.mxu0 %v1606_v4 }
  0xd3   : > { %v446_v16 = vpop.permute.xlu1 %445  ;;  %1099 = vmatprep.subr.bf16.mxu0 %v1615_v9  ;;  %v475_v25 = vadd.f32 %v467_v14, %v423_v13  ;;  %v646_v13 = vld [vmem:[%s2292_s5 + $0x70] sm:$0xff]  ;;  %v643_v14 = vld [vmem:[%s2292_s5 + $0x58] sm:$0xff] }
  0xd4   : > { %v465_v22 = vmul.f32 %v1958_v58, %v446_v16  ;;  %v1585_v19 = vcombine.high %v642_v10, %v646_v13 }
  0xd5   : > { %v490_v32 = vadd.f32 %v1970_v7, %v475_v25  ;;  %v651_v25 = vld [vmem:[%s2292_s5 + $0x98] sm:$0xff] }
  0xd6   : > { %v473_v26 = vadd.f32 %v465_v22, %v421_v17  ;;  %1100 = vmatpush1.bf16.msra.mxu0 %v1614_v15  ;;  %v647_v15 = vld [vmem:[%s2292_s5 + $0x78] sm:$0xff]  ;;  %v650_v22 = vld [vmem:[%s2292_s5 + $0x90] sm:$0xff] }
  0xd7   : > { %v450_v27 = vpop.permute.xlu1 %449  ;;  %v498_v35 = vmax.f32 %v490_v32, 0.0  ;;  %v2104_v21 = vcombine.high %v643_v14, %v647_v15  ;;  %v662_v32 = vld [vmem:[%s2292_s5 + $0xf0] sm:$0xff] }
  0xd8   : > { %v488_v29 = vadd.f32 %v1970_v7, %v473_v26  ;;  %v466_v30 = vmul.f32 %v1958_v58, %v450_v27  ;;  %v680_v58 = vld [vmem:[%s2292_s5 + $0x180] sm:$0xff]  ;;  %v655_v26 = vld [vmem:[%s2292_s5 + $0xb8] sm:$0xff]  ;;  %v1584_v27 = vcombine.low %v642_v10, %v646_v13 }
  0xd9   : > { %v1621_v39 = vcombine.high %v680_v58, %v684_v38  ;;  %v1620_v43 = vcombine.low %v680_v58, %v684_v38  ;;  %v670_v58 = vld [vmem:[%s2292_s5 + $0x130] sm:$0xff]  ;;  %v667_v38 = vld [vmem:[%s2292_s5 + $0x118] sm:$0xff] }
  0xda   : > { %v496_v33 = vmax.f32 %v488_v29, 0.0  ;;  %v474_v57 = vadd.f32 %v466_v30, %v422_v28  ;;  %v2123_v28 = vcombine.low %v643_v14, %v647_v15  ;;  %v1593_v29 = vcombine.high %v650_v22, %v654_v23 }
  0xdb   : > { %1028 = vmatprep.subr.bf16.mxu1 %v1621_v39  ;;  %v2126_v30 = vcombine.high %v651_v25, %v655_v26 }
  0xdc   : > { %v501_v34 = vpack.c.bf16 %v496_v33, %v495_v31  ;;  %v489_v54 = vadd.f32 %v1970_v7, %v474_v57  ;;  %v681_v7 = vld [vmem:[%s2292_s5 + $0x188] sm:$0xff]  ;;  %1029 = vmatpush1.bf16.msra.mxu1 %v1620_v43  ;;  %v658_v31 = vld [vmem:[%s2292_s5 + $0xd0] sm:$0xff]  ;;  %v659_v33 = vld [vmem:[%s2292_s5 + $0xd8] sm:$0xff] }
  0xdd   : > { %v1622_v41 = vcombine.low %v681_v7, %v685_v40  ;;  %v1623_v42 = vcombine.high %v681_v7, %v685_v40  ;;  %1030 = vmatprep.subr.bf16.mxu1 %v1629_v48  ;;  %v663_v57 = vld [vmem:[%s2292_s5 + $0xf8] sm:$0xff]  ;;  %v1600_v39 = vcombine.low %v658_v31, %v662_v32  ;;  %v674_v43 = vld [vmem:[%s2292_s5 + $0x150] sm:$0xff] }
  0xde   : > { %v497_v36 = vmax.f32 %v489_v54, 0.0  ;;  %1659 = vmatprep.mubr.msk.bf16.mxu0 %vm542_vm0, %v501_v34  ;;  %v1592_v34 = vcombine.low %v650_v22, %v654_v23  ;;  %v2141_v54 = vcombine.low %v651_v25, %v655_v26  ;;  %v671_v7 = vld [vmem:[%s2292_s5 + $0x138] sm:$0xff]  ;;  %v2163_v40 = vcombine.low %v659_v33, %v663_v57 }
  0xdf   : > { %1101 = vmatprep.subr.bf16.mxu0 %v1623_v42  ;;  %v2166_v42 = vcombine.high %v667_v38, %v671_v7  ;;  %v2181_v49 = vcombine.low %v667_v38, %v671_v7 }
  0xe0   : > { %v502_v37 = vpack.c.bf16 %v498_v35, %v497_v36  ;;  %1102 = vmatpush1.bf16.msra.mxu0 %v1622_v41  ;;  %1031 = vmatpush1.bf16.msra.mxu1 %v1628_v52  ;;  %v1601_v35 = vcombine.high %v658_v31, %v662_v32  ;;  %v2144_v36 = vcombine.high %v659_v33, %v663_v57  ;;  %v682_v52 = vld [vmem:[%s2292_s5 + $0x190] sm:$0xff] }
  0xe1   : > { %1103 = vmatprep.subr.bf16.mxu0 %v1631_v51  ;;  %1162 = vmatprep.subr.bf16.mxu1 %v1577_v55  ;;  %v2184_v51 = vcombine.high %v675_v45, %v679_v46  ;;  %v2199_v55 = vcombine.low %v675_v45, %v679_v46  ;;  %v1625_v56 = vcombine.high %v682_v52, %v686_v53 }
  0xe2   : > { %1660 = vmatmul.mubr.msk.bf16.gmra.mrb[4].mxu0 %vm542_vm0, %v502_v37  ;;  %v666_v37 = vld [vmem:[%s2292_s5 + $0x110] sm:$0xff] }
  0xe3   : > { %1121 = vmatprep.mubr.bf16.mxu0 %v1784_v5  ;;  %v1609_v41 = vcombine.high %v666_v37, %v670_v58  ;;  %v1608_v48 = vcombine.low %v666_v37, %v670_v58 }
  0xe4   : > { %1104 = vmatpush1.bf16.msra.mxu0 %v1630_v50  ;;  %v1617_v50 = vcombine.high %v674_v43, %v678_v44 }
  0xe5   : > { %1235 = vmatprep.subr.bf16.mxu0 %v2076_v60 }
 0x194   : > { %v1657_v62 = vpop.f32.mrb[0].mxu0 }
 0x195   : > { %v598_v63 = vadd.f32 %v1657_v62, %v2082_v61  ;;  %v589_v0 = vpop.f32.mrb[1].mxu0  ;;  %v2202_v62 = vcombine.high %v683_v18, %v687_v20 }
 0x196   : > { %v590_v1 = vadd.f32 %v2082_v61, %v589_v0  ;;  %v1658_v3 = vpop.f32.mrb[2].mxu0  ;;  %v694_v0 = vld [vmem:[%s2292_s5 + $0x1f0] sm:$0xff] }
 0x197   : > { %v601_v4 = vadd.f32 %v1658_v3, %v2082_v61  ;;  %v592_v6 = vpop.f32.mrb[3].mxu0  ;;  %v622_v9 = vmax.f32 %v598_v63, 0.0  ;;  %v690_v63 = vld [vmem:[%s2292_s5 + $0x1d0] sm:$0xff]  ;;  %v695_v3 = vld [vmem:[%s2292_s5 + $0x1f8] sm:$0xff] }
 0x198   : > { %v593_v8 = vadd.f32 %v2082_v61, %v592_v6  ;;  %v620_v11 = vmax.f32 %v590_v1, 0.0  ;;  %v691_v1 = vld [vmem:[%s2292_s5 + $0x1d8] sm:$0xff]  ;;  %v1626_v6 = vcombine.low %v683_v18, %v687_v20 }
 0x199   : > { %v623_v2 = vmax.f32 %v601_v4, 0.0  ;;  %v1624_v4 = vcombine.low %v682_v52, %v686_v53  ;;  %v1634_v22 = vcombine.low %v691_v1, %v695_v3 }
 0x19a   : > { %v621_v12 = vmax.f32 %v593_v8, 0.0 }
 0x19b   : > { %v2100_v16 = vpack.c.bf16 %v623_v2, %v622_v9  ;;  %v1633_v9 = vcombine.high %v690_v63, %v694_v0  ;;  %v1635_v2 = vcombine.high %v691_v1, %v695_v3 }
 0x19c   : > { %v2102_v17 = vpack.c.bf16 %v621_v12, %v620_v11 }
 0x19e   : > { %1049 = vmatmul.mubr.bf16.vlgmr.msra.gmra.mrb[0].mxu1 %v2102_v17  ;;  %1122 = vmatmul.mubr.bf16.vlgmr.msra.gmra.mrb[8].mxu0 %v2102_v17 }
 0x19f   : > { %1058 = vmatprep.mubr.bf16.mxu1 %v1784_v5  ;;  %1131 = vmatprep.mubr.bf16.mxu0 %v1784_v5 }
 0x1a0   : > { %1163 = vmatpush1.bf16.msra.mxu1 %v1576_v24  ;;  %1236 = vmatpush1.bf16.msra.mxu0 %v2074_v59  ;;  %v1616_v24 = vcombine.low %v674_v43, %v678_v44 }
 0x1a1   : > { %1164 = vmatprep.subr.bf16.mxu1 %v1585_v19  ;;  %1237 = vmatprep.subr.bf16.mxu0 %v2104_v21  ;;  %v1632_v19 = vcombine.low %v690_v63, %v694_v0 }
 0x1a4   : > { %1165 = vmatpush1.bf16.msra.mxu1 %v1584_v27  ;;  %1238 = vmatpush1.bf16.msra.mxu0 %v2123_v28 }
 0x1a5   : > { %1166 = vmatprep.subr.bf16.mxu1 %v1593_v29  ;;  %1239 = vmatprep.subr.bf16.mxu0 %v2126_v30 }
 0x1a6   : > { %1059 = vmatmul.mubr.bf16.gmra.mrb[4].mxu1 %v2100_v16  ;;  %1132 = vmatmul.mubr.bf16.gmra.mrb[12].mxu0 %v2100_v16 }
 0x1a7   : > { %1068 = vmatprep.mubr.bf16.mxu1 %v1784_v5  ;;  %1141 = vmatprep.mubr.bf16.mxu0 %v1784_v5 }
 0x1a8   : > { %1167 = vmatpush1.bf16.msra.mxu1 %v1592_v34  ;;  %1240 = vmatpush1.bf16.msra.mxu0 %v2141_v54 }
 0x1a9   : > { %1168 = vmatprep.subr.bf16.mxu1 %v1601_v35  ;;  %1241 = vmatprep.subr.bf16.mxu0 %v2144_v36 }
 0x1ac   : > { %1169 = vmatpush1.bf16.msra.mxu1 %v1600_v39  ;;  %1242 = vmatpush1.bf16.msra.mxu0 %v2163_v40 }
 0x1ad   : > { %1170 = vmatprep.subr.bf16.mxu1 %v1609_v41  ;;  %1243 = vmatprep.subr.bf16.mxu0 %v2166_v42 }
 0x1b0   : > { %1171 = vmatpush1.bf16.msra.mxu1 %v1608_v48  ;;  %1244 = vmatpush1.bf16.msra.mxu0 %v2181_v49 }
 0x1b1   : > { %1172 = vmatprep.subr.bf16.mxu1 %v1617_v50  ;;  %1245 = vmatprep.subr.bf16.mxu0 %v2184_v51 }
 0x1b4   : > { %1173 = vmatpush1.bf16.msra.mxu1 %v1616_v24  ;;  %1246 = vmatpush1.bf16.msra.mxu0 %v2199_v55 }
 0x1b5   : > { %v1661_v8 = vpop.f32.mrb[4].mxu0  ;;  %1174 = vmatprep.subr.bf16.mxu1 %v1625_v56  ;;  %1247 = vmatprep.subr.bf16.mxu0 %v2202_v62 }
 0x1b6   : > { %v614_v10 = vadd.f32 %v1661_v8, %v2082_v61  ;;  %v605_v11 = vpop.f32.mrb[5].mxu0 }
 0x1b7   : > { %v606_v12 = vadd.f32 %v2082_v61, %v605_v11  ;;  %v1662_v13 = vpop.f32.mrb[6].mxu0 }
 0x1b8   : > { %v617_v14 = vadd.f32 %v1662_v13, %v2082_v61  ;;  %v608_v15 = vpop.f32.mrb[7].mxu0  ;;  %1175 = vmatpush1.bf16.msra.mxu1 %v1624_v4  ;;  %1248 = vmatpush1.bf16.msra.mxu0 %v1626_v6  ;;  %v626_v25 = vmax.f32 %v614_v10, 0.0 }
 0x1b9   : > { %v609_v23 = vadd.f32 %v2082_v61, %v608_v15  ;;  %1176 = vmatprep.subr.bf16.mxu1 %v1633_v9  ;;  %1249 = vmatprep.subr.bf16.mxu0 %v1635_v2  ;;  %v624_v27 = vmax.f32 %v606_v12, 0.0 }
 0x1ba   : > { %v627_v26 = vmax.f32 %v617_v14, 0.0 }
 0x1bb   : > { %v625_v29 = vmax.f32 %v609_v23, 0.0 }
 0x1bc   : > { %v631_v31 = vpack.c.bf16 %v627_v26, %v626_v25  ;;  %1177 = vmatpush1.bf16.msra.mxu1 %v1632_v19  ;;  %1250 = vmatpush1.bf16.msra.mxu0 %v1634_v22 }
 0x1bd   : > { %v630_v32 = vpack.c.bf16 %v625_v29, %v624_v27  ;;  %1663 = vmatprep.subr.bf16.mxu1 %v2076_v60 }
 0x1bf   : > { %1069 = vmatmul.mubr.bf16.gmra.mrb[8].mxu1 %v630_v32  ;;  %1142 = vmatmul.mubr.bf16.gmra.mrb[16].mxu0 %v630_v32 }
 0x1c0   : > { %1078 = vmatprep.mubr.bf16.mxu1 %v1784_v5  ;;  %1151 = vmatprep.mubr.bf16.mxu0 %v1784_v5 }
 0x1c7   : > { %1079 = vmatmul.mubr.bf16.gmra.mrb[12].mxu1 %v631_v31  ;;  %1152 = vmatmul.mubr.bf16.gmra.mrb[20].mxu0 %v631_v31 }
 0x1c8   : > { %1194 = vmatprep.mubr.bf16.mxu1 %v1784_v5  ;;  %1267 = vmatprep.mubr.bf16.mxu0 %v1784_v5 }
 0x1cf   : > { %1195 = vmatmul.mubr.bf16.vlgmr.msra.gmra.mrb[16].mxu1 %v2102_v17  ;;  %1268 = vmatmul.mubr.bf16.vlgmr.msra.gmra.mrb[24].mxu0 %v2102_v17 }
 0x1d0   : > { %1671 = vmatpush1.bf16.msra.mxu1 %v2074_v59  ;;  %1204 = vmatprep.mubr.bf16.mxu1 %v1784_v5 }
 0x1d1   : > { %1664 = vmatprep.subr.bf16.mxu1 %v2104_v21  ;;  %1277 = vmatprep.mubr.bf16.mxu0 %v1784_v5 }
 0x1d4   : > { %1672 = vmatpush1.bf16.msra.mxu1 %v2123_v28 }
 0x1d5   : > { %1665 = vmatprep.subr.bf16.mxu1 %v2126_v30 }
 0x1d7   : > { %1205 = vmatmul.mubr.bf16.gmra.mrb[20].mxu1 %v2100_v16  ;;  %1278 = vmatmul.mubr.bf16.gmra.mrb[28].mxu0 %v2100_v16 }
 0x1d8   : > { %1673 = vmatpush1.bf16.msra.mxu1 %v2141_v54  ;;  %1214 = vmatprep.mubr.bf16.mxu1 %v1784_v5 }
 0x1d9   : > { %1666 = vmatprep.subr.bf16.mxu1 %v2144_v36  ;;  %1287 = vmatprep.mubr.bf16.mxu0 %v1784_v5 }
 0x1dc   : > { %1674 = vmatpush1.bf16.msra.mxu1 %v2163_v40 }
 0x1dd   : > { %1667 = vmatprep.subr.bf16.mxu1 %v2166_v42 }
 0x1df   : > { %1215 = vmatmul.mubr.bf16.gmra.mrb[24].mxu1 %v630_v32  ;;  %1288 = vmatmul.mubr.bf16.gmra.mrb[32].mxu0 %v630_v32 }
 0x1e0   : > { %1675 = vmatpush1.bf16.msra.mxu1 %v2181_v49  ;;  %1224 = vmatprep.mubr.bf16.mxu1 %v1784_v5 }
 0x1e1   : > { %1668 = vmatprep.subr.bf16.mxu1 %v2184_v51 }
 0x1e4   : > { %1676 = vmatpush1.bf16.msra.mxu1 %v2199_v55 }
 0x1e5   : > { %1669 = vmatprep.subr.bf16.mxu1 %v2202_v62 }
 0x1e7   : > { %1225 = vmatmul.mubr.bf16.gmra.mrb[28].mxu1 %v631_v31 }
 0x1e8   : > { %1677 = vmatpush1.bf16.msra.mxu1 %v1626_v6  ;;  %1297 = vmatprep.mubr.bf16.mxu1 %v1784_v5 }
 0x1e9   : > { %1670 = vmatprep.subr.bf16.mxu1 %v1635_v2 }
 0x1ec   : > { %1678 = vmatpush1.bf16.msra.mxu1 %v1634_v22 }
 0x1ef   : > { %1298 = vmatmul.mubr.bf16.vlgmr.msra.gmra.mrb[32].mxu1 %v631_v31 }
 0x271   : > { %v1050_v59 = vpop.f32.mrb[0].mxu1  ;;  %v1123_v60 = vpop.f32.mrb[8].mxu0 }
 0x272   : > { %v1052_v61 = vpop.f32.mrb[1].mxu1  ;;  %v1125_v16 = vpop.f32.mrb[9].mxu0 }
 0x273   : > { %v1054_v17 = vpop.f32.mrb[2].mxu1  ;;  %v1127_v21 = vpop.f32.mrb[10].mxu0 }
 0x274   : > { %v1308_v28 = vmax.f32 %v1050_v59, %v1054_v17  ;;  %v1334_v30 = vmax.f32 %v1123_v60, %v1127_v21  ;;  %v1056_v33 = vpop.f32.mrb[3].mxu1  ;;  %v1129_v57 = vpop.f32.mrb[11].mxu0  ;;  %v1785_v59 = vmov 1966171168  }
 0x275   : > { %v1321_v34 = vmax.f32 %v1052_v61, %v1056_v33  ;;  %v1347_v54 = vmax.f32 %v1125_v16, %v1129_v57  ;;  %v1426_v60 = vunpack.c.l.s4 %v1785_v59 }
 0x279   : > { %v1060_v35 = vpop.f32.mrb[4].mxu1  ;;  %v1133_v36 = vpop.f32.mrb[12].mxu0 }
 0x27a   : > { %v1309_v37 = vmax.f32 %v1308_v28, %v1060_v35  ;;  %v1335_v58 = vmax.f32 %v1334_v30, %v1133_v36  ;;  %v1062_v5 = vpop.f32.mrb[5].mxu1  ;;  %v1135_v38 = vpop.f32.mrb[13].mxu0 }
 0x27b   : > { %v1322_v7 = vmax.f32 %v1321_v34, %v1062_v5  ;;  %v1348_v39 = vmax.f32 %v1347_v54, %v1135_v38  ;;  %v1064_v40 = vpop.f32.mrb[6].mxu1  ;;  %v1137_v41 = vpop.f32.mrb[14].mxu0 }
 0x27c   : > { %v1310_v42 = vmax.f32 %v1309_v37, %v1064_v40  ;;  %v1336_v43 = vmax.f32 %v1335_v58, %v1137_v41  ;;  %v1066_v44 = vpop.f32.mrb[7].mxu1  ;;  %v1139_v45 = vpop.f32.mrb[15].mxu0  ;;  %v1427_v37 = vunpack.c.0.s8 %v1426_v60 }
 0x27d   : > { %v1323_v46 = vmax.f32 %v1322_v7, %v1066_v44  ;;  %v1349_v48 = vmax.f32 %v1348_v39, %v1139_v45 }
 0x292   : > { %v1070_v49 = vpop.f32.mrb[8].mxu1  ;;  %v1143_v50 = vpop.f32.mrb[16].mxu0 }
 0x293   : > { %v1311_v51 = vmax.f32 %v1310_v42, %v1070_v49  ;;  %v1337_v52 = vmax.f32 %v1336_v43, %v1143_v50  ;;  %v1072_v53 = vpop.f32.mrb[9].mxu1  ;;  %v1145_v18 = vpop.f32.mrb[17].mxu0 }
 0x294   : > { %v1324_v20 = vmax.f32 %v1323_v46, %v1072_v53  ;;  %v1350_v24 = vmax.f32 %v1349_v48, %v1145_v18  ;;  %v1074_v55 = vpop.f32.mrb[10].mxu1  ;;  %v1147_v56 = vpop.f32.mrb[18].mxu0 }
 0x295   : > { %v1312_v62 = vmax.f32 %v1311_v51, %v1074_v55  ;;  %v1338_v63 = vmax.f32 %v1337_v52, %v1147_v56  ;;  %v1076_v0 = vpop.f32.mrb[11].mxu1  ;;  %v1149_v1 = vpop.f32.mrb[19].mxu0 }
 0x296   : > { %v1325_v3 = vmax.f32 %v1324_v20, %v1076_v0  ;;  %v1351_v4 = vmax.f32 %v1350_v24, %v1149_v1  ;;  %v2250_v24 = vsub.s32 %v1427_v37, %v1946_v47 }
 0x29a   : > { %v1080_v6 = vpop.f32.mrb[12].mxu1  ;;  %v1153_v8 = vpop.f32.mrb[20].mxu0 }
 0x29b   : > { %v1313_v9 = vmax.f32 %v1312_v62, %v1080_v6  ;;  %v1339_v2 = vmax.f32 %v1338_v63, %v1153_v8  ;;  %v1082_v10 = vpop.f32.mrb[13].mxu1  ;;  %v1155_v11 = vpop.f32.mrb[21].mxu0 }
 0x29c   : > { %v1326_v12 = vmax.f32 %v1325_v3, %v1082_v10  ;;  %v1352_v13 = vmax.f32 %v1351_v4, %v1155_v11  ;;  %v1084_v14 = vpop.f32.mrb[14].mxu1  ;;  %v1157_v15 = vpop.f32.mrb[22].mxu0 }
 0x29d   : > { %v1314_v19 = vmax.f32 %v1313_v9, %v1084_v14  ;;  %v1340_v22 = vmax.f32 %v1339_v2, %v1157_v15  ;;  %v1086_v23 = vpop.f32.mrb[15].mxu1  ;;  %v1159_v25 = vpop.f32.mrb[23].mxu0 }
 0x29e   : > { %v1327_v26 = vmax.f32 %v1326_v12, %v1086_v23  ;;  %v1353_v27 = vmax.f32 %v1352_v13, %v1159_v25 }
 0x29f   : > { %v1315_v29 = vrot.slane %v1314_v19, 4  ;;  %v1341_v31 = vrot.slane %v1340_v22, 4 }
 0x2a0   : > { %v1328_v32 = vrot.slane %v1327_v26, 4  ;;  %v1354_v61 = vrot.slane %v1353_v27, 4 }
 0x2a1   : > { %v1316_v16 = vmax.f32 %v1314_v19, %v1315_v29  ;;  %v1342_v17 = vmax.f32 %v1340_v22, %v1341_v31 }
 0x2a2   : > { %v1329_v21 = vmax.f32 %v1327_v26, %v1328_v32  ;;  %v1355_v28 = vmax.f32 %v1353_v27, %v1354_v61  ;;  %v1196_v30 = vpop.f32.mrb[16].mxu1  ;;  %v1269_v33 = vpop.f32.mrb[24].mxu0 }
 0x2a3   : > { %v1317_v57 = vrot.slane %v1316_v16, 2  ;;  %v1343_v34 = vrot.slane %v1342_v17, 2  ;;  %v1198_v54 = vpop.f32.mrb[17].mxu1  ;;  %v1271_v35 = vpop.f32.mrb[25].mxu0 }
 0x2a4   : > { %v1330_v36 = vrot.slane %v1329_v21, 2  ;;  %v1356_v58 = vrot.slane %v1355_v28, 2  ;;  %v1200_v5 = vpop.f32.mrb[18].mxu1  ;;  %v1273_v38 = vpop.f32.mrb[26].mxu0 }
 0x2a5   : > { %v1318_v7 = vmax.f32 %v1316_v16, %v1317_v57  ;;  %v1344_v39 = vmax.f32 %v1342_v17, %v1343_v34  ;;  %v1360_v40 = vmax.f32 %v1196_v30, %v1200_v5  ;;  %v1386_v41 = vmax.f32 %v1269_v33, %v1273_v38  ;;  %v1202_v42 = vpop.f32.mrb[19].mxu1  ;;  %v1275_v43 = vpop.f32.mrb[27].mxu0 }
 0x2a6   : > { %v1331_v44 = vmax.f32 %v1329_v21, %v1330_v36  ;;  %v1357_v45 = vmax.f32 %v1355_v28, %v1356_v58  ;;  %v1373_v46 = vmax.f32 %v1198_v54, %v1202_v42  ;;  %v1399_v48 = vmax.f32 %v1271_v35, %v1275_v43 }
 0x2a7   : > { %v1319_v49 = vrot.slane %v1318_v7, 1  ;;  %v1345_v50 = vrot.slane %v1344_v39, 1 }
 0x2a8   : > { %v1332_v51 = vrot.slane %v1331_v44, 1  ;;  %v1358_v52 = vrot.slane %v1357_v45, 1 }
 0x2a9   : > { %v1320_v53 = vmax.f32 %v1318_v7, %v1319_v49  ;;  %v1346_v18 = vmax.f32 %v1344_v39, %v1345_v50 }
 0x2aa   : > { %v1333_v20 = vmax.f32 %v1331_v44, %v1332_v51  ;;  %v1359_v55 = vmax.f32 %v1357_v45, %v1358_v52  ;;  %v1206_v56 = vpop.f32.mrb[20].mxu1  ;;  %v1279_v62 = vpop.f32.mrb[28].mxu0 }
 0x2ab   : > { %v1361_v63 = vmax.f32 %v1360_v40, %v1206_v56  ;;  %v1387_v0 = vmax.f32 %v1386_v41, %v1279_v62  ;;  %v1208_v1 = vpop.f32.mrb[21].mxu1  ;;  %v1281_v3 = vpop.f32.mrb[29].mxu0 }
 0x2ac   : > { %v1421_v4 = vcombine.low %v1320_v53, %v1333_v20  ;;  %v1422_v6 = vcombine.low %v1346_v18, %v1359_v55  ;;  %v1374_v8 = vmax.f32 %v1373_v46, %v1208_v1  ;;  %v1400_v9 = vmax.f32 %v1399_v48, %v1281_v3  ;;  %v1210_v2 = vpop.f32.mrb[22].mxu1  ;;  %v1283_v10 = vpop.f32.mrb[30].mxu0 }
 0x2ad   : > { %v1362_v11 = vmax.f32 %v1361_v63, %v1210_v2  ;;  %v1388_v12 = vmax.f32 %v1387_v0, %v1283_v10  ;;  %v1212_v13 = vpop.f32.mrb[23].mxu1  ;;  %v1285_v14 = vpop.f32.mrb[31].mxu0 }
 0x2ae   : > { %v2253_v47 = vrot.slane %v1421_v4, %v2250_v24  ;;  %v2256_v15 = vrot.slane %v1422_v6, %v2250_v24  ;;  %v1375_v19 = vmax.f32 %v1374_v8, %v1212_v13  ;;  %v1401_v22 = vmax.f32 %v1400_v9, %v1285_v14 }
 0x2b0   : > { %v1453_v23 = vcombine.low %v2253_v47, %v2256_v15 }
 0x2b2   : > { %v1216_v25 = vpop.f32.mrb[24].mxu1  ;;  %v1289_v26 = vpop.f32.mrb[32].mxu0 }
 0x2b3   : > { %v1363_v27 = vmax.f32 %v1362_v11, %v1216_v25  ;;  %v1389_v29 = vmax.f32 %v1388_v12, %v1289_v26  ;;  %v1218_v31 = vpop.f32.mrb[25].mxu1  ;;  %v1291_v32 = vpop.f32.mrb[33].mxu0  ;;  %v1412_v26 = vld [vmem:[%s1862_s14] sm:$0xff] }
 0x2b4   : > { %v1376_v59 = vmax.f32 %v1375_v19, %v1218_v31  ;;  %v1402_v60 = vmax.f32 %v1401_v22, %v1291_v32  ;;  %v1220_v61 = vpop.f32.mrb[26].mxu1  ;;  %v1293_v16 = vpop.f32.mrb[34].mxu0  ;;  %v1461_v22 = vrot.slane %v1453_v23, %v2250_v24  ;;  %v1478_v32 = vld [vmem:[%s2293_s6] sm:$0xff] (!%p1636_p8) }
 0x2b5   : > { %v1364_v17 = vmax.f32 %v1363_v27, %v1220_v61  ;;  %v1390_v21 = vmax.f32 %v1389_v29, %v1293_v16  ;;  %v1222_v28 = vpop.f32.mrb[27].mxu1  ;;  %v1295_v30 = vpop.f32.mrb[35].mxu0 }
 0x2b6   : > { %v1377_v33 = vmax.f32 %v1376_v59, %v1222_v28  ;;  %v1403_v57 = vmax.f32 %v1402_v60, %v1295_v30 }
 0x2ba   : > { %v1226_v34 = vpop.f32.mrb[28].mxu1 }
 0x2bb   : > { %v1365_v54 = vmax.f32 %v1364_v17, %v1226_v34  ;;  %v1228_v35 = vpop.f32.mrb[29].mxu1 }
 0x2bc   : > { %v1378_v36 = vmax.f32 %v1377_v33, %v1228_v35  ;;  %v1230_v37 = vpop.f32.mrb[30].mxu1 }
 0x2bd   : > { %v1366_v58 = vmax.f32 %v1365_v54, %v1230_v37  ;;  %v1232_v5 = vpop.f32.mrb[31].mxu1 }
 0x2be   : > { %v1379_v38 = vmax.f32 %v1378_v36, %v1232_v5 }
 0x2bf   : > { %v1367_v7 = vrot.slane %v1366_v58, 4 }
 0x2c0   : > { %v1380_v39 = vrot.slane %v1379_v38, 4 }
 0x2c1   : > { %v1368_v40 = vmax.f32 %v1366_v58, %v1367_v7 }
 0x2c2   : > { %v1381_v41 = vmax.f32 %v1379_v38, %v1380_v39  ;;  %v1299_v42 = vpop.f32.mrb[32].mxu1 }
 0x2c3   : > { %v1369_v43 = vrot.slane %v1368_v40, 2  ;;  %v1391_v44 = vmax.f32 %v1390_v21, %v1299_v42  ;;  %v1301_v45 = vpop.f32.mrb[33].mxu1 }
 0x2c4   : > { %v1382_v46 = vrot.slane %v1381_v41, 2  ;;  %v1404_v48 = vmax.f32 %v1403_v57, %v1301_v45  ;;  %v1303_v49 = vpop.f32.mrb[34].mxu1 }
 0x2c5   : > { %v1370_v50 = vmax.f32 %v1368_v40, %v1369_v43  ;;  %v1392_v51 = vmax.f32 %v1391_v44, %v1303_v49  ;;  %v1305_v52 = vpop.f32.mrb[35].mxu1 }
 0x2c6   : > { %v1383_v53 = vmax.f32 %v1381_v41, %v1382_v46  ;;  %v1405_v18 = vmax.f32 %v1404_v48, %v1305_v52 }
 0x2c7   : > { %v1371_v20 = vrot.slane %v1370_v50, 1  ;;  %v1393_v55 = vrot.slane %v1392_v51, 4 }
 0x2c8   : > { %v1384_v56 = vrot.slane %v1383_v53, 1  ;;  %v1406_v62 = vrot.slane %v1405_v18, 4 }
 0x2c9   : > { %v1372_v63 = vmax.f32 %v1370_v50, %v1371_v20  ;;  %v1394_v0 = vmax.f32 %v1392_v51, %v1393_v55 }
 0x2ca   : > { %v1385_v1 = vmax.f32 %v1383_v53, %v1384_v56  ;;  %v1407_v3 = vmax.f32 %v1405_v18, %v1406_v62 }
 0x2cb   : > { %v1395_v4 = vrot.slane %v1394_v0, 2 }
 0x2cc   : > { %v1423_v6 = vcombine.low %v1372_v63, %v1385_v1  ;;  %v1408_v8 = vrot.slane %v1407_v3, 2 }
 0x2cd   : > { %v1396_v9 = vmax.f32 %v1394_v0, %v1395_v4 }
 0x2ce   : > { %v1409_v2 = vmax.f32 %v1407_v3, %v1408_v8  ;;  %v1445_v47 = vrot.slane %v1423_v6, %v2250_v24 }
 0x2cf   : > { %v1397_v10 = vrot.slane %v1396_v9, 1 }
 0x2d0   : > { %v1410_v11 = vrot.slane %v1409_v2, 1 }
 0x2d1   : > { %v1398_v12 = vmax.f32 %v1396_v9, %v1397_v10 }
 0x2d2   : > { %v1411_v13 = vmax.f32 %v1409_v2, %v1410_v11 }
 0x2d4   : > { %v1424_v14 = vcombine.low %v1398_v12, %v1411_v13 }
 0x2d6   : > { %v1452_v15 = vrot.slane %v1424_v14, %v2250_v24 }
 0x2d8   : > { %v1454_v19 = vcombine.low %v1445_v47, %v1452_v15 }
 0x2da   : > { %v1468_v25 = vrot.slane %v1454_v19, %v2250_v24  ;;  %1476 = sbr.rel (%p1636_p8) target bundleno = 749 (0x2ed), region = 56 }
 0x2dc   : > { %v1469_v27 = vcombine.low %v1461_v22, %v1468_v25 }
 0x2de   : > { %v1471_v29 = vmax.f32 %v1412_v26, %v1469_v27 }
 0x2e0   : > { %1472 = vst [vmem:[%s1862_s14] sm:$0xff] %v1471_v29 }
 0x2e7   : > { %v1477_v31 = vld [vmem:[%s1862_s14] sm:$0xff] }
 0x2e8   : > { %v1479_v59 = vadd.f32 %v1478_v32, %v1477_v31 }
 0x2ea   : > { %v1480_v60 = vmax.f32 %v1479_v59, 0.0 }
 0x2ec   : > { %1481 = vst [vmem:[%s1862_s14] sm:$0xff] %v1480_v60 }
 0x2ed PF: > { %s17_s28 = sadd.s32 1, %s1779_s28   ;;  %s2295_s24 = smov %s1771_s26 }
 0x2ee   : > { %p14_p9 = scmp.ge.s32.totalorder %s17_s28, 10   ;;  %s2296_s25 = smov %s1775_s27 }
 0x2ef   : > { %s2297_s26 = smov %s2300_s29  ;;  %s2298_s27 = smov %s2304_s30 }
 0x2f0   :  { %16 = sbr.rel (!%p14_p9) target bundleno = 3 (0x3), region = 86 }

// kernel: pointnet_cls_forward.6
= control target key start
LH: loop header
LB: loop body
LE: loop exit
PB: predicated region body
PF: predicated region fallthrough
CT: control target
= control target key end

     0   :  { %s1855_s24 = smov 0   ;;  %s1857_s25 = smov 0   ;;  %s2319_s0 = inlined_call_operand.vmem [shape: f32[2,256,3], index: 0, kind: input, shape index: {}]   ;;  %s2320_s1 = inlined_call_operand.vmem [shape: f32[2,3,64], index: 1, kind: input, shape index: {}]   ;;  %s2321_s2 = inlined_call_operand.vmem [shape: f32[1,64], index: 2, kind: input, shape index: {}]   ;;  %s2322_s3 = inlined_call_operand.vmem [shape: bf16[64,128], index: 3, kind: input, shape index: {}]   ;;  %s2323_s4 = inlined_call_operand.vmem [shape: f32[1,128], index: 4, kind: input, shape index: {}]   ;;  %s2324_s5 = inlined_call_operand.vmem [shape: bf16[128,1024], index: 5, kind: input, shape index: {}]   ;;  %s2325_s6 = inlined_call_operand.vmem [shape: f32[1,1024], index: 6, kind: input, shape index: {}]   ;;  %s2326_s7 = inlined_call_operand.vmem [shape: f32[2,1,1024], index: 7, kind: output, shape index: {}]  }
   0x1   :  { %s1859_s26 = smov 0   ;;  %s1861_s27 = smov 0  }
   0x2   :  { %s1863_s28 = smov 0  }
   0x3 LB: > { %s26_s29 = sadd.s32 1, %s1800_s26  ;;  %s29_s30 = sadd.s32 1, %s1804_s27  ;;  %s1808_s28 = sphi %s1863_s28, %s17_s28   ;;  %s1804_s27 = sphi %s1861_s27, %s2330_s27   ;;  %s1800_s26 = sphi %s1859_s26, %s2329_s26   ;;  %s1796_s25 = sphi %s1857_s25, %s2328_s25   ;;  %s1792_s24 = sphi %s1855_s24, %s2327_s24  }
   0x4   : > { %p27_p0 = scmp.ge.s32.totalorder %s26_s29, 4  ;;  %p1584_p1 = scmp.ge.s32.totalorder %s1808_s28, 1 }
   0x5   : > { %p265_p2 = scmp.lt.s32.totalorder %s1808_s28, 9 }
   0x6   : > { %s2332_s29 = smov (%p27_p0, %s26_s29), 0  ;;  %s2334_s30 = smov (!%p27_p0, %s29_s30), %s1804_s27 }
   0x7   : > { %p266_p3 = pnand %p1584_p1, %p265_p2  ;;  %p31_p4 = scmp.ge.s32.totalorder %s2334_s30, 2 }
   0x8   : > { %s1585_s8 = sshll.u32 (!%p266_p3), %s1792_s24, 3  ;;  %p305_p5 = scmp.lt.s32.totalorder (!%p266_p3), %s1796_s25, 1 }
   0x9   : > { %s2336_s30 = smov (%p31_p4, %s2334_s30), 0  ;;  %269 = sbr.rel (%p266_p3) target bundleno = 749 (0x2ed), region = 48 }
   0xa   : > { %p307_p6 = scmp.lt.s32.totalorder (!%p266_p3), %s1585_s8, 31  ;;  %p1590_p7 = scmp.ne.s32.totalorder (!%p266_p3), %s1792_s24, 0 }
  0x10   : > { %s2338_s25 = smov (!%p305_p5, %s1796_s25), 1  ;;  %s2340_s8 = smov (!%p307_p6, %s1585_s8), 31 }
  0x11   : > { %s1586_s9 = sshll.u32 %s2338_s25, 5  ;;  %s1588_s10 = sshll.u32 %s2338_s25, 2  ;;  %v1810_v0 = vmov (!%p1590_p7), -inf  }
  0x12   : > { %s310_s11 = sadd.s32 %s1586_s9, %s2340_s8  ;;  %s1891_s14 = scalar_lea.vmem %s2320_s1, %s1588_s10 }
  0x13   : > { %s1587_s15 = sshll.u32 %s310_s11, 3  ;;  %s1589_s16 = sshll.u32 %s2338_s25, 3 }
  0x14   : > { %s1896_s19 = scalar_lea.vmem %s2319_s0, %s1587_s15  ;;  %s1901_s22 = scalar_lea.vmem %s2326_s7, %s1589_s16 }
  0x15   : > { %326 = sbr.rel (%p1590_p7) target bundleno = 28 (0x1c), region = 52  ;;  %327 = vst [vmem:[%s1901_s22] sm:$0xff] (!%p1590_p7), %v1810_v0 }
  0x1c PF: > { %v329_v1 = vld [vmem:[%s1896_s19 + $0x8] sm:$0xff]  ;;  %v328_v2 = vld [vmem:[%s1896_s19] sm:$0xff]  ;;  %v1811_v3 = vmov 2   ;;  %v1812_v4 = vmov 1   ;;  %v1813_v5 = vmov 0   ;;  %v331_v6 = vld [vmem:[%s1896_s19 + $0x18] sm:$0xff]  ;;  %v377_v44 = vlaneseq }
  0x1d   : > { %1757 = vset.pattern.permute.xlu0 %v1811_v3  ;;  %1753 = vset.pattern.permute.xlu1 %v1812_v4  ;;  %v330_v7 = vld [vmem:[%s1896_s19 + $0x10] sm:$0xff]  ;;  %v332_v8 = vld [vmem:[%s1896_s19 + $0x20] sm:$0xff]  ;;  %v333_v10 = vld [vmem:[%s1896_s19 + $0x28] sm:$0xff]  ;;  %vm559_vm0 = vcmask 523264   ;;  %p1665_p8 = scmp.ne.s32.totalorder %s1792_s24, 3 }
  0x1e   : > { %446 = vperm.xlu0 %1757, %v329_v1   ;;  %390 = vperm.xlu1 %1753, %v328_v2   ;;  %v1766_v9 = vld [vmem:[%s2322_s3] sm:$0xff]   ;;  %v1767_v11 = vld [vmem:[%s2322_s3 + $0x8] sm:$0xff]   ;;  %v334_v12 = vld [vmem:[%s1896_s19 + $0x30] sm:$0xff]  ;;  %v1980_v47 = vshrl.u32 %v377_v44, 7 }
  0x1f   : > { %1065 = vmatprep.mubr.bf16.mxu1 %v1813_v5  ;;  %1676 = vmatprep.subr.bf16.mxu0 %v1766_v9  ;;  %v1768_v13 = vld [vmem:[%s2322_s3 + $0x10] sm:$0xff]   ;;  %v1769_v14 = vld [vmem:[%s2322_s3 + $0x18] sm:$0xff]   ;;  %v649_v16 = vld [vmem:[%s2324_s5] sm:$0xff] }
  0x20   : > { %1677 = vmatpush3.bf16.msra.mxu0 %v1766_v9  ;;  %v335_v15 = vld [vmem:[%s1896_s19 + $0x38] sm:$0xff]  ;;  %v653_v17 = vld [vmem:[%s2324_s5 + $0x20] sm:$0xff]  ;;  %v1939_v18 = vld [vmem:[%s2324_s5 + $0x8] sm:$0xff]  ;;  %v379_v49 = vsub.s32 0, %v1980_v47  ;;  %v423_v51 = vsub.s32 1, %v1980_v47  ;;  %v475_v52 = vsub.s32 2, %v1980_v47 }
  0x21   : > { %1678 = vmatprep.subr.bf16.mxu0 %v1767_v11  ;;  %v1602_v19 = vcombine.high %v649_v16, %v653_v17  ;;  %v1944_v20 = vld [vmem:[%s2324_s5 + $0x28] sm:$0xff]  ;;  %v1601_v21 = vcombine.low %v649_v16, %v653_v17  ;;  %v657_v22 = vld [vmem:[%s2324_s5 + $0x40] sm:$0xff] }
  0x22   : > { %1758 = vset.pattern.permute.xlu0 %v1813_v5  ;;  %394 = vperm.xlu1 %1753, %v329_v1   ;;  %v661_v23 = vld [vmem:[%s2324_s5 + $0x60] sm:$0xff]  ;;  %v1603_v24 = vcombine.low %v1939_v18, %v1944_v20  ;;  %v1604_v25 = vcombine.high %v1939_v18, %v1944_v20  ;;  %v670_v44 = vld [vmem:[%s2324_s5 + $0xa8] sm:$0xff] }
  0x23   : > { %339 = vperm.xlu0 %1758, %v328_v2   ;;  %v1610_v26 = vcombine.high %v657_v22, %v661_v23  ;;  %v665_v27 = vld [vmem:[%s2324_s5 + $0x80] sm:$0xff]  ;;  %1033 = vmatprep.subr.bf16.mxu1 %v1602_v19  ;;  %v1609_v29 = vcombine.low %v657_v22, %v661_v23  ;;  %v682_v18 = vld [vmem:[%s2324_s5 + $0x108] sm:$0xff] }
  0x24   : > { %1679 = vmatpush3.bf16.msra.mxu0 %v1767_v11  ;;  %v669_v28 = vld [vmem:[%s2324_s5 + $0xa0] sm:$0xff]  ;;  %1034 = vmatpush1.bf16.msra.mxu1 %v1601_v21  ;;  %v686_v20 = vld [vmem:[%s2324_s5 + $0x128] sm:$0xff] }
  0x25   : > { %1680 = vmatprep.subr.bf16.mxu0 %v1768_v13  ;;  %1035 = vmatprep.subr.bf16.mxu1 %v1610_v26  ;;  %v1618_v30 = vcombine.high %v665_v27, %v669_v28  ;;  %v673_v31 = vld [vmem:[%s2324_s5 + $0xc0] sm:$0xff]  ;;  %v1617_v33 = vcombine.low %v665_v27, %v669_v28 }
  0x26   : > { %1754 = vset.pattern.permute.xlu1 %v1813_v5  ;;  %v677_v32 = vld [vmem:[%s2324_s5 + $0xe0] sm:$0xff] }
  0x27   : > { %344 = vperm.xlu0 %1758, %v329_v1   ;;  %354 = vperm.xlu1 %1754, %v331_v6   ;;  %v1626_v34 = vcombine.high %v673_v31, %v677_v32  ;;  %v681_v35 = vld [vmem:[%s2324_s5 + $0x100] sm:$0xff]  ;;  %v1625_v37 = vcombine.low %v673_v31, %v677_v32 }
  0x28   : > { %1681 = vmatpush3.bf16.msra.mxu0 %v1768_v13  ;;  %1036 = vmatpush1.bf16.msra.mxu1 %v1609_v29  ;;  %v685_v36 = vld [vmem:[%s2324_s5 + $0x120] sm:$0xff] }
  0x29   : > { %1682 = vmatprep.subr.bf16.mxu0 %v1769_v14  ;;  %1037 = vmatprep.subr.bf16.mxu1 %v1618_v30  ;;  %v1634_v38 = vcombine.high %v681_v35, %v685_v36  ;;  %v689_v39 = vld [vmem:[%s2324_s5 + $0x140] sm:$0xff]  ;;  %v1633_v41 = vcombine.low %v681_v35, %v685_v36  ;;  %v658_v35 = vld [vmem:[%s2324_s5 + $0x48] sm:$0xff] }
  0x2a   : > { %v693_v40 = vld [vmem:[%s2324_s5 + $0x160] sm:$0xff]  ;;  %v662_v36 = vld [vmem:[%s2324_s5 + $0x68] sm:$0xff] }
  0x2b   : > { %349 = vperm.xlu0 %1758, %v330_v7   ;;  %1755 = vset.pattern.permute.xlu1 %v1812_v4  ;;  %v1642_v42 = vcombine.high %v689_v39, %v693_v40  ;;  %v1641_v43 = vcombine.low %v689_v39, %v693_v40  ;;  %v336_v53 = vld [vmem:[%s1891_s14] sm:$0x7] }
  0x2c   : > { %402 = vperm.xlu1 %1755, %v331_v6   ;;  %1683 = vmatpush3.bf16.msra.mxu0 %v1769_v14  ;;  %v1986_v54 = vrot.slane %v336_v53, %v379_v49  ;;  %v1988_v57 = vrot.slane %v336_v53, %v423_v51  ;;  %v1990_v58 = vrot.slane %v336_v53, %v475_v52  ;;  %v678_v49 = vld [vmem:[%s2324_s5 + $0xe8] sm:$0xff] }
  0x2d   : > { %1106 = vmatprep.subr.bf16.mxu0 %v1604_v25  ;;  %1038 = vmatpush1.bf16.msra.mxu1 %v1617_v33 }
  0x2e   : > { %1039 = vmatprep.subr.bf16.mxu1 %v1626_v34 }
  0x2f   : > { %359 = vperm.xlu0 %1758, %v332_v8  }
  0x30   : > { %1756 = vset.pattern.permute.xlu1 %v1811_v3 }
  0x31   : > { %442 = vperm.xlu1 %1756, %v328_v2   ;;  %1040 = vmatpush1.bf16.msra.mxu1 %v1625_v37 }
  0x32   : > { %1041 = vmatprep.subr.bf16.mxu1 %v1634_v38 }
  0x33   : > { %1759 = vset.pattern.permute.xlu0 %v1812_v4 }
  0x34   : > { %398 = vperm.xlu0 %1759, %v330_v7  }
  0x35   : > { %450 = vperm.xlu1 %1756, %v330_v7   ;;  %1042 = vmatpush1.bf16.msra.mxu1 %v1633_v41  ;;  %v2002_v7 = vld [vmem:[%s2321_s2] ss:$0 sm:$0xff]  ;;  %v1612_v41 = vcombine.high %v658_v35, %v662_v36 }
  0x36   : > { %1043 = vmatprep.subr.bf16.mxu1 %v1642_v42 }
  0x38   : > { %410 = vperm.xlu0 %1759, %v333_v10  }
  0x39   : > { %454 = vperm.xlu1 %1756, %v331_v6   ;;  %1044 = vmatpush1.bf16.msra.mxu1 %v1641_v43  ;;  %v666_v43 = vld [vmem:[%s2324_s5 + $0x88] sm:$0xff] }
  0x3a   : > { %v1619_v52 = vcombine.low %v666_v43, %v670_v44 }
  0x3c   : > { %414 = vperm.xlu0 %1759, %v334_v12  }
  0x3d   : > { %1760 = vset.pattern.permute.xlu1 %v1813_v5 }
  0x3e   : > { %364 = vperm.xlu1 %1760, %v333_v10  }
  0x40   : > { %1764 = vset.pattern.permute.xlu0 %v1811_v3 }
  0x41   : > { %458 = vperm.xlu0 %1764, %v332_v8  }
  0x42   : > { %1761 = vset.pattern.permute.xlu1 %v1812_v4 }
  0x43   : > { %406 = vperm.xlu1 %1761, %v332_v8  }
  0x45   : > { %470 = vperm.xlu0 %1764, %v335_v15  }
  0x47   : > { %1762 = vset.pattern.permute.xlu1 %v1813_v5 }
  0x48   : > { %369 = vperm.xlu1 %1762, %v334_v12  }
  0x4c   : > { %374 = vperm.xlu1 %1762, %v335_v15  }
  0x50   : > { %1763 = vset.pattern.permute.xlu1 %v1812_v4 }
  0x51   : > { %418 = vperm.xlu1 %1763, %v335_v15  }
  0x55   : > { %1765 = vset.pattern.permute.xlu1 %v1811_v3 }
  0x56   : > { %462 = vperm.xlu1 %1765, %v333_v10  }
  0x5a   : > { %466 = vperm.xlu1 %1765, %v334_v12  }
  0x9d   : > { %v391_v45 = vpop.permute.xlu1 %390  ;;  %v447_v46 = vpop.permute.xlu0 %446 }
  0x9e   : > { %v478_v62 = vmul.f32 %v1990_v58, %v447_v46  ;;  %v425_v3 = vmul.f32 %v1988_v57, %v391_v45  ;;  %v1611_v45 = vcombine.low %v658_v35, %v662_v36  ;;  %v1620_v46 = vcombine.high %v666_v43, %v670_v44  ;;  %v705_v44 = vld [vmem:[%s2324_s5 + $0x1c0] sm:$0xff] }
  0xa1   : > { %v395_v48 = vpop.permute.xlu1 %394 }
  0xa2   : > { %v340_v50 = vpop.permute.xlu0 %339  ;;  %v426_v60 = vmul.f32 %v1988_v57, %v395_v48  ;;  %v674_v48 = vld [vmem:[%s2324_s5 + $0xc8] sm:$0xff] }
  0xa3   : > { %v381_v1 = vmul.f32 %v1986_v54, %v340_v50  ;;  %v1628_v53 = vcombine.high %v674_v48, %v678_v49 }
  0xa5   : > { %v433_v8 = vadd.f32 %v425_v3, %v381_v1 }
  0xa6   : > { %v345_v55 = vpop.permute.xlu0 %344  ;;  %v355_v56 = vpop.permute.xlu1 %354 }
  0xa7   : > { %v382_v59 = vmul.f32 %v1986_v54, %v345_v55  ;;  %v384_v22 = vmul.f32 %v1986_v54, %v355_v56  ;;  %v1627_v56 = vcombine.low %v674_v48, %v678_v49  ;;  %v710_v49 = vld [vmem:[%s2324_s5 + $0x1e8] sm:$0xff] }
  0xa9   : > { %v434_v63 = vadd.f32 %v426_v60, %v382_v59  ;;  %v1636_v60 = vcombine.high %v682_v18, %v686_v20 }
  0xaa   : > { %v350_v61 = vpop.permute.xlu0 %349 }
  0xab   : > { %v403_v0 = vpop.permute.xlu1 %402  ;;  %v486_v4 = vadd.f32 %v478_v62, %v434_v63  ;;  %v383_v10 = vmul.f32 %v1986_v54, %v350_v61  ;;  %v690_v62 = vld [vmem:[%s2324_s5 + $0x148] sm:$0xff] }
  0xac   : > { %v428_v16 = vmul.f32 %v1988_v57, %v403_v0  ;;  %v694_v63 = vld [vmem:[%s2324_s5 + $0x168] sm:$0xff] }
  0xad   : > { %v501_v13 = vadd.f32 %v2002_v7, %v486_v4  ;;  %v1635_v4 = vcombine.low %v682_v18, %v686_v20  ;;  %v655_v18 = vld [vmem:[%s2324_s5 + $0x30] sm:$0xff]  ;;  %v652_v20 = vld [vmem:[%s2324_s5 + $0x18] sm:$0xff] }
  0xae   : > { %v1996_v2 = vpop.permute.xlu0 %359  ;;  %v436_v28 = vadd.f32 %v428_v16, %v384_v22 }
  0xaf   : > { %v509_v25 = vmax.f32 %v501_v13, 0.0  ;;  %v385_v61 = vmul.f32 %v1986_v54, %v1996_v2 }
  0xb0   : > { %v443_v6 = vpop.permute.xlu1 %442 }
  0xb1   : > { %v477_v9 = vmul.f32 %v1990_v58, %v443_v6 }
  0xb3   : > { %v485_v11 = vadd.f32 %v477_v9, %v433_v8  ;;  %v399_v12 = vpop.permute.xlu0 %398  ;;  %v1644_v9 = vcombine.high %v690_v62, %v694_v63 }
  0xb4   : > { %v427_v14 = vmul.f32 %v1988_v57, %v399_v12  ;;  %v451_v15 = vpop.permute.xlu1 %450 }
  0xb5   : > { %v479_v17 = vmul.f32 %v1990_v58, %v451_v15  ;;  %v500_v19 = vadd.f32 %v2002_v7, %v485_v11  ;;  %v1643_v15 = vcombine.low %v690_v62, %v694_v63 }
  0xb6   : > { %v435_v21 = vadd.f32 %v427_v14, %v383_v10 }
  0xb7   : > { %v508_v23 = vmax.f32 %v500_v19, 0.0  ;;  %v411_v40 = vpop.permute.xlu0 %410 }
  0xb8   : > { %v487_v26 = vadd.f32 %v479_v17, %v435_v21  ;;  %v455_v27 = vpop.permute.xlu1 %454  ;;  %v430_v2 = vmul.f32 %v1988_v57, %v411_v40  ;;  %v702_v40 = vld [vmem:[%s2324_s5 + $0x1a8] sm:$0xff] }
  0xb9   : > { %v480_v29 = vmul.f32 %v1990_v58, %v455_v27  ;;  %v516_v30 = vpack.c.bf16 %v509_v25, %v508_v23 }
  0xba   : > { %v502_v31 = vadd.f32 %v2002_v7, %v487_v26 }
  0xbb   : > { %v488_v32 = vadd.f32 %v480_v29, %v436_v28  ;;  %1684 = vmatprep.mubr.msk.bf16.mxu0 %vm559_vm0, %v516_v30  ;;  %v415_v50 = vpop.permute.xlu0 %414 }
  0xbc   : > { %v510_v37 = vmax.f32 %v502_v31, 0.0  ;;  %v431_v19 = vmul.f32 %v1988_v57, %v415_v50 }
  0xbd   : > { %v503_v33 = vadd.f32 %v2002_v7, %v488_v32  ;;  %v365_v34 = vpop.permute.xlu1 %364 }
  0xbe   : > { %v386_v10 = vmul.f32 %v1986_v54, %v365_v34 }
  0xbf   : > { %v511_v38 = vmax.f32 %v503_v33, 0.0 }
  0xc0   : > { %v459_v59 = vpop.permute.xlu0 %458  ;;  %v438_v17 = vadd.f32 %v430_v2, %v386_v10  ;;  %v659_v10 = vld [vmem:[%s2324_s5 + $0x50] sm:$0xff] }
  0xc1   : > { %v517_v39 = vpack.c.bf16 %v511_v38, %v510_v37  ;;  %v481_v1 = vmul.f32 %v1990_v58, %v459_v59  ;;  %v701_v38 = vld [vmem:[%s2324_s5 + $0x1a0] sm:$0xff] }
  0xc2   : > { %v407_v42 = vpop.permute.xlu1 %406 }
  0xc3   : > { %1685 = vmatmul.mubr.msk.bf16.vlgmr.msra.gmra.mrb[0].mxu0 %vm559_vm0, %v517_v39  ;;  %v429_v55 = vmul.f32 %v1988_v57, %v407_v42 }
  0xc4   : > { %1107 = vmatpush1.bf16.msra.mxu0 %v1603_v24  ;;  %v471_v8 = vpop.permute.xlu0 %470 }
  0xc5   : > { %1108 = vmatprep.subr.bf16.mxu0 %v1612_v41  ;;  %v437_v0 = vadd.f32 %v429_v55, %v385_v61  ;;  %v484_v14 = vmul.f32 %v1990_v58, %v471_v8  ;;  %v2114_v61 = vld [vmem:[%s2323_s4] ss:$0 sm:$0xff] }
  0xc7   : > { %v370_v51 = vpop.permute.xlu1 %369  ;;  %v489_v12 = vadd.f32 %v481_v1, %v437_v0 }
  0xc8   : > { %1109 = vmatpush1.bf16.msra.mxu0 %v1611_v45  ;;  %v387_v21 = vmul.f32 %v1986_v54, %v370_v51  ;;  %v709_v45 = vld [vmem:[%s2324_s5 + $0x1e0] sm:$0xff] }
  0xc9   : > { %1110 = vmatprep.subr.bf16.mxu0 %v1620_v46  ;;  %v504_v23 = vadd.f32 %v2002_v7, %v489_v12  ;;  %v706_v46 = vld [vmem:[%s2324_s5 + $0x1c8] sm:$0xff]  ;;  %v1658_v48 = vcombine.high %v705_v44, %v709_v45 }
  0xca   : > { %v439_v28 = vadd.f32 %v431_v19, %v387_v21  ;;  %v1659_v50 = vcombine.low %v706_v46, %v710_v49  ;;  %v1660_v51 = vcombine.high %v706_v46, %v710_v49  ;;  %v696_v46 = vld [vmem:[%s2324_s5 + $0x178] sm:$0xff] }
  0xcb   : > { %v375_v24 = vpop.permute.xlu1 %374  ;;  %v512_v31 = vmax.f32 %v504_v23, 0.0  ;;  %v671_v23 = vld [vmem:[%s2324_s5 + $0xb0] sm:$0xff] }
  0xcc   : > { %1111 = vmatpush1.bf16.msra.mxu0 %v1619_v52  ;;  %v388_v11 = vmul.f32 %v1986_v54, %v375_v24  ;;  %v1657_v52 = vcombine.low %v705_v44, %v709_v45  ;;  %v695_v44 = vld [vmem:[%s2324_s5 + $0x170] sm:$0xff]  ;;  %v692_v45 = vld [vmem:[%s2324_s5 + $0x158] sm:$0xff] }
  0xcd   : > { %1112 = vmatprep.subr.bf16.mxu0 %v1628_v53  ;;  %v651_v53 = vld [vmem:[%s2324_s5 + $0x10] sm:$0xff] }
  0xce   : > { %v1605_v24 = vcombine.low %v651_v53, %v655_v18  ;;  %v1606_v55 = vcombine.high %v651_v53, %v655_v18  ;;  %v703_v53 = vld [vmem:[%s2324_s5 + $0x1b0] sm:$0xff]  ;;  %v700_v18 = vld [vmem:[%s2324_s5 + $0x198] sm:$0xff] }
  0xd0   : > { %v419_v3 = vpop.permute.xlu1 %418  ;;  %1113 = vmatpush1.bf16.msra.mxu0 %v1627_v56  ;;  %v656_v56 = vld [vmem:[%s2324_s5 + $0x38] sm:$0xff] }
  0xd1   : > { %v432_v6 = vmul.f32 %v1988_v57, %v419_v3  ;;  %1114 = vmatprep.subr.bf16.mxu0 %v1636_v60  ;;  %v2106_v59 = vcombine.low %v652_v20, %v656_v56  ;;  %v2108_v60 = vcombine.high %v652_v20, %v656_v56  ;;  %v704_v20 = vld [vmem:[%s2324_s5 + $0x1b8] sm:$0xff] }
  0xd3   : > { %v440_v13 = vadd.f32 %v432_v6, %v388_v11 }
  0xd4   : > { %1115 = vmatpush1.bf16.msra.mxu0 %v1635_v4 }
  0xd5   : > { %v463_v16 = vpop.permute.xlu1 %462  ;;  %1116 = vmatprep.subr.bf16.mxu0 %v1644_v9  ;;  %v492_v25 = vadd.f32 %v484_v14, %v440_v13  ;;  %v663_v13 = vld [vmem:[%s2324_s5 + $0x70] sm:$0xff]  ;;  %v660_v14 = vld [vmem:[%s2324_s5 + $0x58] sm:$0xff] }
  0xd6   : > { %v482_v22 = vmul.f32 %v1990_v58, %v463_v16  ;;  %v1614_v19 = vcombine.high %v659_v10, %v663_v13 }
  0xd7   : > { %v507_v32 = vadd.f32 %v2002_v7, %v492_v25  ;;  %v668_v25 = vld [vmem:[%s2324_s5 + $0x98] sm:$0xff] }
  0xd8   : > { %v490_v26 = vadd.f32 %v482_v22, %v438_v17  ;;  %1117 = vmatpush1.bf16.msra.mxu0 %v1643_v15  ;;  %v664_v15 = vld [vmem:[%s2324_s5 + $0x78] sm:$0xff]  ;;  %v667_v22 = vld [vmem:[%s2324_s5 + $0x90] sm:$0xff] }
  0xd9   : > { %v467_v27 = vpop.permute.xlu1 %466  ;;  %v515_v35 = vmax.f32 %v507_v32, 0.0  ;;  %v2136_v21 = vcombine.high %v660_v14, %v664_v15  ;;  %v679_v32 = vld [vmem:[%s2324_s5 + $0xf0] sm:$0xff] }
  0xda   : > { %v505_v29 = vadd.f32 %v2002_v7, %v490_v26  ;;  %v483_v30 = vmul.f32 %v1990_v58, %v467_v27  ;;  %v697_v58 = vld [vmem:[%s2324_s5 + $0x180] sm:$0xff]  ;;  %v672_v26 = vld [vmem:[%s2324_s5 + $0xb8] sm:$0xff]  ;;  %v1613_v27 = vcombine.low %v659_v10, %v663_v13 }
  0xdb   : > { %v1650_v39 = vcombine.high %v697_v58, %v701_v38  ;;  %v1649_v43 = vcombine.low %v697_v58, %v701_v38  ;;  %v687_v58 = vld [vmem:[%s2324_s5 + $0x130] sm:$0xff]  ;;  %v684_v38 = vld [vmem:[%s2324_s5 + $0x118] sm:$0xff] }
  0xdc   : > { %v513_v33 = vmax.f32 %v505_v29, 0.0  ;;  %v491_v57 = vadd.f32 %v483_v30, %v439_v28  ;;  %v2155_v28 = vcombine.low %v660_v14, %v664_v15  ;;  %v1622_v29 = vcombine.high %v667_v22, %v671_v23 }
  0xdd   : > { %1045 = vmatprep.subr.bf16.mxu1 %v1650_v39  ;;  %v2158_v30 = vcombine.high %v668_v25, %v672_v26 }
  0xde   : > { %v518_v34 = vpack.c.bf16 %v513_v33, %v512_v31  ;;  %v506_v54 = vadd.f32 %v2002_v7, %v491_v57  ;;  %v698_v7 = vld [vmem:[%s2324_s5 + $0x188] sm:$0xff]  ;;  %1046 = vmatpush1.bf16.msra.mxu1 %v1649_v43  ;;  %v675_v31 = vld [vmem:[%s2324_s5 + $0xd0] sm:$0xff]  ;;  %v676_v33 = vld [vmem:[%s2324_s5 + $0xd8] sm:$0xff] }
  0xdf   : > { %v1651_v41 = vcombine.low %v698_v7, %v702_v40  ;;  %v1652_v42 = vcombine.high %v698_v7, %v702_v40  ;;  %1047 = vmatprep.subr.bf16.mxu1 %v1658_v48  ;;  %v680_v57 = vld [vmem:[%s2324_s5 + $0xf8] sm:$0xff]  ;;  %v1629_v39 = vcombine.low %v675_v31, %v679_v32  ;;  %v691_v43 = vld [vmem:[%s2324_s5 + $0x150] sm:$0xff] }
  0xe0   : > { %v514_v36 = vmax.f32 %v506_v54, 0.0  ;;  %1688 = vmatprep.mubr.msk.bf16.mxu0 %vm559_vm0, %v518_v34  ;;  %v1621_v34 = vcombine.low %v667_v22, %v671_v23  ;;  %v2173_v54 = vcombine.low %v668_v25, %v672_v26  ;;  %v688_v7 = vld [vmem:[%s2324_s5 + $0x138] sm:$0xff]  ;;  %v2195_v40 = vcombine.low %v676_v33, %v680_v57 }
  0xe1   : > { %1118 = vmatprep.subr.bf16.mxu0 %v1652_v42  ;;  %v2198_v42 = vcombine.high %v684_v38, %v688_v7  ;;  %v2213_v49 = vcombine.low %v684_v38, %v688_v7 }
  0xe2   : > { %v519_v37 = vpack.c.bf16 %v515_v35, %v514_v36  ;;  %1119 = vmatpush1.bf16.msra.mxu0 %v1651_v41  ;;  %1048 = vmatpush1.bf16.msra.mxu1 %v1657_v52  ;;  %v1630_v35 = vcombine.high %v675_v31, %v679_v32  ;;  %v2176_v36 = vcombine.high %v676_v33, %v680_v57  ;;  %v699_v52 = vld [vmem:[%s2324_s5 + $0x190] sm:$0xff] }
  0xe3   : > { %1120 = vmatprep.subr.bf16.mxu0 %v1660_v51  ;;  %1179 = vmatprep.subr.bf16.mxu1 %v1606_v55  ;;  %v2216_v51 = vcombine.high %v692_v45, %v696_v46  ;;  %v2231_v55 = vcombine.low %v692_v45, %v696_v46  ;;  %v1654_v56 = vcombine.high %v699_v52, %v703_v53 }
  0xe4   : > { %1689 = vmatmul.mubr.msk.bf16.gmra.mrb[4].mxu0 %vm559_vm0, %v519_v37  ;;  %v683_v37 = vld [vmem:[%s2324_s5 + $0x110] sm:$0xff] }
  0xe5   : > { %1138 = vmatprep.mubr.bf16.mxu0 %v1813_v5  ;;  %v1638_v41 = vcombine.high %v683_v37, %v687_v58  ;;  %v1637_v48 = vcombine.low %v683_v37, %v687_v58 }
  0xe6   : > { %1121 = vmatpush1.bf16.msra.mxu0 %v1659_v50  ;;  %v1646_v50 = vcombine.high %v691_v43, %v695_v44 }
  0xe7   : > { %1252 = vmatprep.subr.bf16.mxu0 %v2108_v60 }
 0x196   : > { %v1686_v62 = vpop.f32.mrb[0].mxu0 }
 0x197   : > { %v615_v63 = vadd.f32 %v1686_v62, %v2114_v61  ;;  %v606_v0 = vpop.f32.mrb[1].mxu0  ;;  %v2234_v62 = vcombine.high %v700_v18, %v704_v20 }
 0x198   : > { %v607_v1 = vadd.f32 %v2114_v61, %v606_v0  ;;  %v1687_v3 = vpop.f32.mrb[2].mxu0  ;;  %v711_v0 = vld [vmem:[%s2324_s5 + $0x1f0] sm:$0xff] }
 0x199   : > { %v618_v4 = vadd.f32 %v1687_v3, %v2114_v61  ;;  %v609_v6 = vpop.f32.mrb[3].mxu0  ;;  %v639_v9 = vmax.f32 %v615_v63, 0.0  ;;  %v707_v63 = vld [vmem:[%s2324_s5 + $0x1d0] sm:$0xff]  ;;  %v712_v3 = vld [vmem:[%s2324_s5 + $0x1f8] sm:$0xff] }
 0x19a   : > { %v610_v8 = vadd.f32 %v2114_v61, %v609_v6  ;;  %v637_v11 = vmax.f32 %v607_v1, 0.0  ;;  %v708_v1 = vld [vmem:[%s2324_s5 + $0x1d8] sm:$0xff]  ;;  %v1655_v6 = vcombine.low %v700_v18, %v704_v20 }
 0x19b   : > { %v640_v2 = vmax.f32 %v618_v4, 0.0  ;;  %v1653_v4 = vcombine.low %v699_v52, %v703_v53  ;;  %v1663_v22 = vcombine.low %v708_v1, %v712_v3 }
 0x19c   : > { %v638_v12 = vmax.f32 %v610_v8, 0.0 }
 0x19d   : > { %v2132_v16 = vpack.c.bf16 %v640_v2, %v639_v9  ;;  %v1662_v9 = vcombine.high %v707_v63, %v711_v0  ;;  %v1664_v2 = vcombine.high %v708_v1, %v712_v3 }
 0x19e   : > { %v2134_v17 = vpack.c.bf16 %v638_v12, %v637_v11 }
 0x1a0   : > { %1066 = vmatmul.mubr.bf16.vlgmr.msra.gmra.mrb[0].mxu1 %v2134_v17  ;;  %1139 = vmatmul.mubr.bf16.vlgmr.msra.gmra.mrb[8].mxu0 %v2134_v17 }
 0x1a1   : > { %1075 = vmatprep.mubr.bf16.mxu1 %v1813_v5  ;;  %1148 = vmatprep.mubr.bf16.mxu0 %v1813_v5 }
 0x1a2   : > { %1180 = vmatpush1.bf16.msra.mxu1 %v1605_v24  ;;  %1253 = vmatpush1.bf16.msra.mxu0 %v2106_v59  ;;  %v1645_v24 = vcombine.low %v691_v43, %v695_v44 }
 0x1a3   : > { %1181 = vmatprep.subr.bf16.mxu1 %v1614_v19  ;;  %1254 = vmatprep.subr.bf16.mxu0 %v2136_v21  ;;  %v1661_v19 = vcombine.low %v707_v63, %v711_v0 }
 0x1a6   : > { %1182 = vmatpush1.bf16.msra.mxu1 %v1613_v27  ;;  %1255 = vmatpush1.bf16.msra.mxu0 %v2155_v28 }
 0x1a7   : > { %1183 = vmatprep.subr.bf16.mxu1 %v1622_v29  ;;  %1256 = vmatprep.subr.bf16.mxu0 %v2158_v30 }
 0x1a8   : > { %1076 = vmatmul.mubr.bf16.gmra.mrb[4].mxu1 %v2132_v16  ;;  %1149 = vmatmul.mubr.bf16.gmra.mrb[12].mxu0 %v2132_v16 }
 0x1a9   : > { %1085 = vmatprep.mubr.bf16.mxu1 %v1813_v5  ;;  %1158 = vmatprep.mubr.bf16.mxu0 %v1813_v5 }
 0x1aa   : > { %1184 = vmatpush1.bf16.msra.mxu1 %v1621_v34  ;;  %1257 = vmatpush1.bf16.msra.mxu0 %v2173_v54 }
 0x1ab   : > { %1185 = vmatprep.subr.bf16.mxu1 %v1630_v35  ;;  %1258 = vmatprep.subr.bf16.mxu0 %v2176_v36 }
 0x1ae   : > { %1186 = vmatpush1.bf16.msra.mxu1 %v1629_v39  ;;  %1259 = vmatpush1.bf16.msra.mxu0 %v2195_v40 }
 0x1af   : > { %1187 = vmatprep.subr.bf16.mxu1 %v1638_v41  ;;  %1260 = vmatprep.subr.bf16.mxu0 %v2198_v42 }
 0x1b2   : > { %1188 = vmatpush1.bf16.msra.mxu1 %v1637_v48  ;;  %1261 = vmatpush1.bf16.msra.mxu0 %v2213_v49 }
 0x1b3   : > { %1189 = vmatprep.subr.bf16.mxu1 %v1646_v50  ;;  %1262 = vmatprep.subr.bf16.mxu0 %v2216_v51 }
 0x1b6   : > { %1190 = vmatpush1.bf16.msra.mxu1 %v1645_v24  ;;  %1263 = vmatpush1.bf16.msra.mxu0 %v2231_v55 }
 0x1b7   : > { %v1690_v8 = vpop.f32.mrb[4].mxu0  ;;  %1191 = vmatprep.subr.bf16.mxu1 %v1654_v56  ;;  %1264 = vmatprep.subr.bf16.mxu0 %v2234_v62 }
 0x1b8   : > { %v631_v10 = vadd.f32 %v1690_v8, %v2114_v61  ;;  %v622_v11 = vpop.f32.mrb[5].mxu0 }
 0x1b9   : > { %v623_v12 = vadd.f32 %v2114_v61, %v622_v11  ;;  %v1691_v13 = vpop.f32.mrb[6].mxu0 }
 0x1ba   : > { %v634_v14 = vadd.f32 %v1691_v13, %v2114_v61  ;;  %v625_v15 = vpop.f32.mrb[7].mxu0  ;;  %1192 = vmatpush1.bf16.msra.mxu1 %v1653_v4  ;;  %1265 = vmatpush1.bf16.msra.mxu0 %v1655_v6  ;;  %v643_v25 = vmax.f32 %v631_v10, 0.0 }
 0x1bb   : > { %v626_v23 = vadd.f32 %v2114_v61, %v625_v15  ;;  %1193 = vmatprep.subr.bf16.mxu1 %v1662_v9  ;;  %1266 = vmatprep.subr.bf16.mxu0 %v1664_v2  ;;  %v641_v27 = vmax.f32 %v623_v12, 0.0 }
 0x1bc   : > { %v644_v26 = vmax.f32 %v634_v14, 0.0 }
 0x1bd   : > { %v642_v29 = vmax.f32 %v626_v23, 0.0 }
 0x1be   : > { %v648_v31 = vpack.c.bf16 %v644_v26, %v643_v25  ;;  %1194 = vmatpush1.bf16.msra.mxu1 %v1661_v19  ;;  %1267 = vmatpush1.bf16.msra.mxu0 %v1663_v22 }
 0x1bf   : > { %v647_v32 = vpack.c.bf16 %v642_v29, %v641_v27  ;;  %1692 = vmatprep.subr.bf16.mxu1 %v2108_v60 }
 0x1c1   : > { %1086 = vmatmul.mubr.bf16.gmra.mrb[8].mxu1 %v647_v32  ;;  %1159 = vmatmul.mubr.bf16.gmra.mrb[16].mxu0 %v647_v32 }
 0x1c2   : > { %1095 = vmatprep.mubr.bf16.mxu1 %v1813_v5  ;;  %1168 = vmatprep.mubr.bf16.mxu0 %v1813_v5 }
 0x1c9   : > { %1096 = vmatmul.mubr.bf16.gmra.mrb[12].mxu1 %v648_v31  ;;  %1169 = vmatmul.mubr.bf16.gmra.mrb[20].mxu0 %v648_v31 }
 0x1ca   : > { %1211 = vmatprep.mubr.bf16.mxu1 %v1813_v5  ;;  %1284 = vmatprep.mubr.bf16.mxu0 %v1813_v5 }
 0x1d1   : > { %1212 = vmatmul.mubr.bf16.vlgmr.msra.gmra.mrb[16].mxu1 %v2134_v17  ;;  %1285 = vmatmul.mubr.bf16.vlgmr.msra.gmra.mrb[24].mxu0 %v2134_v17 }
 0x1d2   : > { %1700 = vmatpush1.bf16.msra.mxu1 %v2106_v59  ;;  %1221 = vmatprep.mubr.bf16.mxu1 %v1813_v5 }
 0x1d3   : > { %1693 = vmatprep.subr.bf16.mxu1 %v2136_v21  ;;  %1294 = vmatprep.mubr.bf16.mxu0 %v1813_v5 }
 0x1d6   : > { %1701 = vmatpush1.bf16.msra.mxu1 %v2155_v28 }
 0x1d7   : > { %1694 = vmatprep.subr.bf16.mxu1 %v2158_v30 }
 0x1d9   : > { %1222 = vmatmul.mubr.bf16.gmra.mrb[20].mxu1 %v2132_v16  ;;  %1295 = vmatmul.mubr.bf16.gmra.mrb[28].mxu0 %v2132_v16 }
 0x1da   : > { %1702 = vmatpush1.bf16.msra.mxu1 %v2173_v54  ;;  %1231 = vmatprep.mubr.bf16.mxu1 %v1813_v5 }
 0x1db   : > { %1695 = vmatprep.subr.bf16.mxu1 %v2176_v36  ;;  %1304 = vmatprep.mubr.bf16.mxu0 %v1813_v5 }
 0x1de   : > { %1703 = vmatpush1.bf16.msra.mxu1 %v2195_v40 }
 0x1df   : > { %1696 = vmatprep.subr.bf16.mxu1 %v2198_v42 }
 0x1e1   : > { %1232 = vmatmul.mubr.bf16.gmra.mrb[24].mxu1 %v647_v32  ;;  %1305 = vmatmul.mubr.bf16.gmra.mrb[32].mxu0 %v647_v32 }
 0x1e2   : > { %1704 = vmatpush1.bf16.msra.mxu1 %v2213_v49  ;;  %1241 = vmatprep.mubr.bf16.mxu1 %v1813_v5 }
 0x1e3   : > { %1697 = vmatprep.subr.bf16.mxu1 %v2216_v51 }
 0x1e6   : > { %1705 = vmatpush1.bf16.msra.mxu1 %v2231_v55 }
 0x1e7   : > { %1698 = vmatprep.subr.bf16.mxu1 %v2234_v62 }
 0x1e9   : > { %1242 = vmatmul.mubr.bf16.gmra.mrb[28].mxu1 %v648_v31 }
 0x1ea   : > { %1706 = vmatpush1.bf16.msra.mxu1 %v1655_v6  ;;  %1314 = vmatprep.mubr.bf16.mxu1 %v1813_v5 }
 0x1eb   : > { %1699 = vmatprep.subr.bf16.mxu1 %v1664_v2 }
 0x1ee   : > { %1707 = vmatpush1.bf16.msra.mxu1 %v1663_v22 }
 0x1f1   : > { %1315 = vmatmul.mubr.bf16.vlgmr.msra.gmra.mrb[32].mxu1 %v648_v31 }
 0x273   : > { %v1067_v59 = vpop.f32.mrb[0].mxu1  ;;  %v1140_v60 = vpop.f32.mrb[8].mxu0 }
 0x274   : > { %v1069_v61 = vpop.f32.mrb[1].mxu1  ;;  %v1142_v16 = vpop.f32.mrb[9].mxu0 }
 0x275   : > { %v1071_v17 = vpop.f32.mrb[2].mxu1  ;;  %v1144_v21 = vpop.f32.mrb[10].mxu0 }
 0x276   : > { %v1325_v28 = vmax.f32 %v1067_v59, %v1071_v17  ;;  %v1351_v30 = vmax.f32 %v1140_v60, %v1144_v21  ;;  %v1073_v33 = vpop.f32.mrb[3].mxu1  ;;  %v1146_v57 = vpop.f32.mrb[11].mxu0  ;;  %v1814_v59 = vmov 1966171168  }
 0x277   : > { %v1338_v34 = vmax.f32 %v1069_v61, %v1073_v33  ;;  %v1364_v54 = vmax.f32 %v1142_v16, %v1146_v57  ;;  %v1443_v60 = vunpack.c.l.s4 %v1814_v59 }
 0x27b   : > { %v1077_v35 = vpop.f32.mrb[4].mxu1  ;;  %v1150_v36 = vpop.f32.mrb[12].mxu0 }
 0x27c   : > { %v1326_v37 = vmax.f32 %v1325_v28, %v1077_v35  ;;  %v1352_v58 = vmax.f32 %v1351_v30, %v1150_v36  ;;  %v1079_v5 = vpop.f32.mrb[5].mxu1  ;;  %v1152_v38 = vpop.f32.mrb[13].mxu0 }
 0x27d   : > { %v1339_v7 = vmax.f32 %v1338_v34, %v1079_v5  ;;  %v1365_v39 = vmax.f32 %v1364_v54, %v1152_v38  ;;  %v1081_v40 = vpop.f32.mrb[6].mxu1  ;;  %v1154_v41 = vpop.f32.mrb[14].mxu0 }
 0x27e   : > { %v1327_v42 = vmax.f32 %v1326_v37, %v1081_v40  ;;  %v1353_v43 = vmax.f32 %v1352_v58, %v1154_v41  ;;  %v1083_v44 = vpop.f32.mrb[7].mxu1  ;;  %v1156_v45 = vpop.f32.mrb[15].mxu0  ;;  %v1444_v37 = vunpack.c.0.s8 %v1443_v60 }
 0x27f   : > { %v1340_v46 = vmax.f32 %v1339_v7, %v1083_v44  ;;  %v1366_v48 = vmax.f32 %v1365_v39, %v1156_v45 }
 0x294   : > { %v1087_v49 = vpop.f32.mrb[8].mxu1  ;;  %v1160_v50 = vpop.f32.mrb[16].mxu0 }
 0x295   : > { %v1328_v51 = vmax.f32 %v1327_v42, %v1087_v49  ;;  %v1354_v52 = vmax.f32 %v1353_v43, %v1160_v50  ;;  %v1089_v53 = vpop.f32.mrb[9].mxu1  ;;  %v1162_v18 = vpop.f32.mrb[17].mxu0 }
 0x296   : > { %v1341_v20 = vmax.f32 %v1340_v46, %v1089_v53  ;;  %v1367_v24 = vmax.f32 %v1366_v48, %v1162_v18  ;;  %v1091_v55 = vpop.f32.mrb[10].mxu1  ;;  %v1164_v56 = vpop.f32.mrb[18].mxu0 }
 0x297   : > { %v1329_v62 = vmax.f32 %v1328_v51, %v1091_v55  ;;  %v1355_v63 = vmax.f32 %v1354_v52, %v1164_v56  ;;  %v1093_v0 = vpop.f32.mrb[11].mxu1  ;;  %v1166_v1 = vpop.f32.mrb[19].mxu0 }
 0x298   : > { %v1342_v3 = vmax.f32 %v1341_v20, %v1093_v0  ;;  %v1368_v4 = vmax.f32 %v1367_v24, %v1166_v1  ;;  %v2282_v24 = vsub.s32 %v1444_v37, %v1980_v47 }
 0x29c   : > { %v1097_v6 = vpop.f32.mrb[12].mxu1  ;;  %v1170_v8 = vpop.f32.mrb[20].mxu0 }
 0x29d   : > { %v1330_v9 = vmax.f32 %v1329_v62, %v1097_v6  ;;  %v1356_v2 = vmax.f32 %v1355_v63, %v1170_v8  ;;  %v1099_v10 = vpop.f32.mrb[13].mxu1  ;;  %v1172_v11 = vpop.f32.mrb[21].mxu0 }
 0x29e   : > { %v1343_v12 = vmax.f32 %v1342_v3, %v1099_v10  ;;  %v1369_v13 = vmax.f32 %v1368_v4, %v1172_v11  ;;  %v1101_v14 = vpop.f32.mrb[14].mxu1  ;;  %v1174_v15 = vpop.f32.mrb[22].mxu0 }
 0x29f   : > { %v1331_v19 = vmax.f32 %v1330_v9, %v1101_v14  ;;  %v1357_v22 = vmax.f32 %v1356_v2, %v1174_v15  ;;  %v1103_v23 = vpop.f32.mrb[15].mxu1  ;;  %v1176_v25 = vpop.f32.mrb[23].mxu0 }
 0x2a0   : > { %v1344_v26 = vmax.f32 %v1343_v12, %v1103_v23  ;;  %v1370_v27 = vmax.f32 %v1369_v13, %v1176_v25 }
 0x2a1   : > { %v1332_v29 = vrot.slane %v1331_v19, 4  ;;  %v1358_v31 = vrot.slane %v1357_v22, 4 }
 0x2a2   : > { %v1345_v32 = vrot.slane %v1344_v26, 4  ;;  %v1371_v61 = vrot.slane %v1370_v27, 4 }
 0x2a3   : > { %v1333_v16 = vmax.f32 %v1331_v19, %v1332_v29  ;;  %v1359_v17 = vmax.f32 %v1357_v22, %v1358_v31 }
 0x2a4   : > { %v1346_v21 = vmax.f32 %v1344_v26, %v1345_v32  ;;  %v1372_v28 = vmax.f32 %v1370_v27, %v1371_v61  ;;  %v1213_v30 = vpop.f32.mrb[16].mxu1  ;;  %v1286_v33 = vpop.f32.mrb[24].mxu0 }
 0x2a5   : > { %v1334_v57 = vrot.slane %v1333_v16, 2  ;;  %v1360_v34 = vrot.slane %v1359_v17, 2  ;;  %v1215_v54 = vpop.f32.mrb[17].mxu1  ;;  %v1288_v35 = vpop.f32.mrb[25].mxu0 }
 0x2a6   : > { %v1347_v36 = vrot.slane %v1346_v21, 2  ;;  %v1373_v58 = vrot.slane %v1372_v28, 2  ;;  %v1217_v5 = vpop.f32.mrb[18].mxu1  ;;  %v1290_v38 = vpop.f32.mrb[26].mxu0 }
 0x2a7   : > { %v1335_v7 = vmax.f32 %v1333_v16, %v1334_v57  ;;  %v1361_v39 = vmax.f32 %v1359_v17, %v1360_v34  ;;  %v1377_v40 = vmax.f32 %v1213_v30, %v1217_v5  ;;  %v1403_v41 = vmax.f32 %v1286_v33, %v1290_v38  ;;  %v1219_v42 = vpop.f32.mrb[19].mxu1  ;;  %v1292_v43 = vpop.f32.mrb[27].mxu0 }
 0x2a8   : > { %v1348_v44 = vmax.f32 %v1346_v21, %v1347_v36  ;;  %v1374_v45 = vmax.f32 %v1372_v28, %v1373_v58  ;;  %v1390_v46 = vmax.f32 %v1215_v54, %v1219_v42  ;;  %v1416_v48 = vmax.f32 %v1288_v35, %v1292_v43 }
 0x2a9   : > { %v1336_v49 = vrot.slane %v1335_v7, 1  ;;  %v1362_v50 = vrot.slane %v1361_v39, 1 }
 0x2aa   : > { %v1349_v51 = vrot.slane %v1348_v44, 1  ;;  %v1375_v52 = vrot.slane %v1374_v45, 1 }
 0x2ab   : > { %v1337_v53 = vmax.f32 %v1335_v7, %v1336_v49  ;;  %v1363_v18 = vmax.f32 %v1361_v39, %v1362_v50 }
 0x2ac   : > { %v1350_v20 = vmax.f32 %v1348_v44, %v1349_v51  ;;  %v1376_v55 = vmax.f32 %v1374_v45, %v1375_v52  ;;  %v1223_v56 = vpop.f32.mrb[20].mxu1  ;;  %v1296_v62 = vpop.f32.mrb[28].mxu0 }
 0x2ad   : > { %v1378_v63 = vmax.f32 %v1377_v40, %v1223_v56  ;;  %v1404_v0 = vmax.f32 %v1403_v41, %v1296_v62  ;;  %v1225_v1 = vpop.f32.mrb[21].mxu1  ;;  %v1298_v3 = vpop.f32.mrb[29].mxu0 }
 0x2ae   : > { %v1438_v4 = vcombine.low %v1337_v53, %v1350_v20  ;;  %v1439_v6 = vcombine.low %v1363_v18, %v1376_v55  ;;  %v1391_v8 = vmax.f32 %v1390_v46, %v1225_v1  ;;  %v1417_v9 = vmax.f32 %v1416_v48, %v1298_v3  ;;  %v1227_v2 = vpop.f32.mrb[22].mxu1  ;;  %v1300_v10 = vpop.f32.mrb[30].mxu0 }
 0x2af   : > { %v1379_v11 = vmax.f32 %v1378_v63, %v1227_v2  ;;  %v1405_v12 = vmax.f32 %v1404_v0, %v1300_v10  ;;  %v1229_v13 = vpop.f32.mrb[23].mxu1  ;;  %v1302_v14 = vpop.f32.mrb[31].mxu0 }
 0x2b0   : > { %v2285_v47 = vrot.slane %v1438_v4, %v2282_v24  ;;  %v2288_v15 = vrot.slane %v1439_v6, %v2282_v24  ;;  %v1392_v19 = vmax.f32 %v1391_v8, %v1229_v13  ;;  %v1418_v22 = vmax.f32 %v1417_v9, %v1302_v14 }
 0x2b2   : > { %v1470_v23 = vcombine.low %v2285_v47, %v2288_v15 }
 0x2b4   : > { %v1233_v25 = vpop.f32.mrb[24].mxu1  ;;  %v1306_v26 = vpop.f32.mrb[32].mxu0 }
 0x2b5   : > { %v1380_v27 = vmax.f32 %v1379_v11, %v1233_v25  ;;  %v1406_v29 = vmax.f32 %v1405_v12, %v1306_v26  ;;  %v1235_v31 = vpop.f32.mrb[25].mxu1  ;;  %v1308_v32 = vpop.f32.mrb[33].mxu0  ;;  %v1429_v26 = vld [vmem:[%s1901_s22] sm:$0xff] }
 0x2b6   : > { %v1393_v59 = vmax.f32 %v1392_v19, %v1235_v31  ;;  %v1419_v60 = vmax.f32 %v1418_v22, %v1308_v32  ;;  %v1237_v61 = vpop.f32.mrb[26].mxu1  ;;  %v1310_v16 = vpop.f32.mrb[34].mxu0  ;;  %v1478_v22 = vrot.slane %v1470_v23, %v2282_v24  ;;  %v1495_v32 = vld [vmem:[%s2325_s6] sm:$0xff] (!%p1665_p8) }
 0x2b7   : > { %v1381_v17 = vmax.f32 %v1380_v27, %v1237_v61  ;;  %v1407_v21 = vmax.f32 %v1406_v29, %v1310_v16  ;;  %v1239_v28 = vpop.f32.mrb[27].mxu1  ;;  %v1312_v30 = vpop.f32.mrb[35].mxu0 }
 0x2b8   : > { %v1394_v33 = vmax.f32 %v1393_v59, %v1239_v28  ;;  %v1420_v57 = vmax.f32 %v1419_v60, %v1312_v30 }
 0x2bc   : > { %v1243_v34 = vpop.f32.mrb[28].mxu1 }
 0x2bd   : > { %v1382_v54 = vmax.f32 %v1381_v17, %v1243_v34  ;;  %v1245_v35 = vpop.f32.mrb[29].mxu1 }
 0x2be   : > { %v1395_v36 = vmax.f32 %v1394_v33, %v1245_v35  ;;  %v1247_v37 = vpop.f32.mrb[30].mxu1 }
 0x2bf   : > { %v1383_v58 = vmax.f32 %v1382_v54, %v1247_v37  ;;  %v1249_v5 = vpop.f32.mrb[31].mxu1 }
 0x2c0   : > { %v1396_v38 = vmax.f32 %v1395_v36, %v1249_v5 }
 0x2c1   : > { %v1384_v7 = vrot.slane %v1383_v58, 4 }
 0x2c2   : > { %v1397_v39 = vrot.slane %v1396_v38, 4 }
 0x2c3   : > { %v1385_v40 = vmax.f32 %v1383_v58, %v1384_v7 }
 0x2c4   : > { %v1398_v41 = vmax.f32 %v1396_v38, %v1397_v39  ;;  %v1316_v42 = vpop.f32.mrb[32].mxu1 }
 0x2c5   : > { %v1386_v43 = vrot.slane %v1385_v40, 2  ;;  %v1408_v44 = vmax.f32 %v1407_v21, %v1316_v42  ;;  %v1318_v45 = vpop.f32.mrb[33].mxu1 }
 0x2c6   : > { %v1399_v46 = vrot.slane %v1398_v41, 2  ;;  %v1421_v48 = vmax.f32 %v1420_v57, %v1318_v45  ;;  %v1320_v49 = vpop.f32.mrb[34].mxu1 }
 0x2c7   : > { %v1387_v50 = vmax.f32 %v1385_v40, %v1386_v43  ;;  %v1409_v51 = vmax.f32 %v1408_v44, %v1320_v49  ;;  %v1322_v52 = vpop.f32.mrb[35].mxu1 }
 0x2c8   : > { %v1400_v53 = vmax.f32 %v1398_v41, %v1399_v46  ;;  %v1422_v18 = vmax.f32 %v1421_v48, %v1322_v52 }
 0x2c9   : > { %v1388_v20 = vrot.slane %v1387_v50, 1  ;;  %v1410_v55 = vrot.slane %v1409_v51, 4 }
 0x2ca   : > { %v1401_v56 = vrot.slane %v1400_v53, 1  ;;  %v1423_v62 = vrot.slane %v1422_v18, 4 }
 0x2cb   : > { %v1389_v63 = vmax.f32 %v1387_v50, %v1388_v20  ;;  %v1411_v0 = vmax.f32 %v1409_v51, %v1410_v55 }
 0x2cc   : > { %v1402_v1 = vmax.f32 %v1400_v53, %v1401_v56  ;;  %v1424_v3 = vmax.f32 %v1422_v18, %v1423_v62 }
 0x2cd   : > { %v1412_v4 = vrot.slane %v1411_v0, 2 }
 0x2ce   : > { %v1440_v6 = vcombine.low %v1389_v63, %v1402_v1  ;;  %v1425_v8 = vrot.slane %v1424_v3, 2 }
 0x2cf   : > { %v1413_v9 = vmax.f32 %v1411_v0, %v1412_v4 }
 0x2d0   : > { %v1426_v2 = vmax.f32 %v1424_v3, %v1425_v8  ;;  %v1462_v47 = vrot.slane %v1440_v6, %v2282_v24 }
 0x2d1   : > { %v1414_v10 = vrot.slane %v1413_v9, 1 }
 0x2d2   : > { %v1427_v11 = vrot.slane %v1426_v2, 1 }
 0x2d3   : > { %v1415_v12 = vmax.f32 %v1413_v9, %v1414_v10 }
 0x2d4   : > { %v1428_v13 = vmax.f32 %v1426_v2, %v1427_v11 }
 0x2d6   : > { %v1441_v14 = vcombine.low %v1415_v12, %v1428_v13 }
 0x2d8   : > { %v1469_v15 = vrot.slane %v1441_v14, %v2282_v24 }
 0x2da   : > { %v1471_v19 = vcombine.low %v1462_v47, %v1469_v15 }
 0x2dc   : > { %v1485_v25 = vrot.slane %v1471_v19, %v2282_v24  ;;  %1493 = sbr.rel (%p1665_p8) target bundleno = 749 (0x2ed), region = 56 }
 0x2de   : > { %v1486_v27 = vcombine.low %v1478_v22, %v1485_v25 }
 0x2e0   : > { %v1488_v29 = vmax.f32 %v1429_v26, %v1486_v27 }
 0x2e2   : > { %1489 = vst [vmem:[%s1901_s22] sm:$0xff] %v1488_v29 }
 0x2e9   : > { %v1494_v31 = vld [vmem:[%s1901_s22] sm:$0xff] }
 0x2ea   : > { %v1496_v59 = vadd.f32 %v1495_v32, %v1494_v31 }
 0x2ec   : > { %1497 = vst [vmem:[%s1901_s22] sm:$0xff] %v1496_v59 }
 0x2ed PF: > { %s17_s28 = sadd.s32 1, %s1808_s28   ;;  %s2327_s24 = smov %s1800_s26 }
 0x2ee   : > { %p14_p9 = scmp.ge.s32.totalorder %s17_s28, 10   ;;  %s2328_s25 = smov %s1804_s27 }
 0x2ef   : > { %s2329_s26 = smov %s2332_s29  ;;  %s2330_s27 = smov %s2336_s30 }
 0x2f0   :  { %16 = sbr.rel (!%p14_p9) target bundleno = 3 (0x3), region = 89 }

// kernel: pointnet_cls_forward.7
= control target key start
LH: loop header
LB: loop body
LE: loop exit
PB: predicated region body
PF: predicated region fallthrough
CT: control target
= control target key end

     0   :  { %12 = vsyncpa [#allocation4], 0  ;;  %s2104_s24 = smov 0   ;;  %s2493_s0 = inlined_call_operand.vmem [shape: f32[2,1024], index: 0, kind: input, shape index: {}]   ;;  %s2494_s1 = inlined_call_operand.vmem [shape: bf16[1024,512], index: 1, kind: input, shape index: {}]   ;;  %s2495_s2 = inlined_call_operand.vmem [shape: f32[1,512], index: 2, kind: input, shape index: {}]   ;;  %s2496_s3 = inlined_call_operand.vmem [shape: bf16[512,256], index: 3, kind: input, shape index: {}]   ;;  %s2497_s4 = inlined_call_operand.vmem [shape: f32[1,256], index: 4, kind: input, shape index: {}]   ;;  %s2498_s5 = inlined_call_operand.vmem [shape: bf16[256,128], index: 5, kind: input, shape index: {}]   ;;  %s2499_s6 = inlined_call_operand.vmem [shape: f32[1,128], index: 6, kind: input, shape index: {}]   ;;  %s2500_s7 = inlined_call_operand.hbm [shape: f32[2,128], index: 7, kind: output, shape index: {}]  }
   0x1 LB: > { %s2110_s25 = sadd.s32 4294967295, %s2059_s24   ;;  %p1609_p0 = scmp.ge.s32.totalorder %s2059_s24, 1  ;;  %s2059_s24 = sphi %s2104_s24, %s18_s24  }
   0x2   : > { %p246_p1 = scmp.lt.s32.totalorder %s2059_s24, 5 }
   0x4   : > { %p247_p2 = pnand %p1609_p0, %p246_p1 }
   0x5   : > { %s1610_s26 = sshll.u32 (!%p247_p2), %s2110_s25, 1  ;;  %s1612_s27 = sshll.u32 (!%p247_p2), %s2110_s25, 5 }
   0x6   : > { %250 = sbr.rel (%p247_p2) target bundleno = 1111 (0x457), region = 48  ;;  %p280_p3 = scmp.lt.s32.totalorder (!%p247_p2), %s1610_s26, 7 }
   0x7   : > { %p286_p4 = scmp.lt.s32.totalorder (!%p247_p2), %s1612_s27, 127  ;;  %p1615_p5 = scmp.ne.s32.totalorder (!%p247_p2), %s2110_s25, 0 }
   0xd   : > { %s2502_s26 = smov (!%p280_p3, %s1610_s26), 7  ;;  %s2504_s27 = smov (!%p286_p4, %s1612_s27), 127 }
   0xe   : > { %s1611_s28 = sshll.u32 %s2502_s26, 1  ;;  %s1767_s9 = sshll.u32 %s2504_s27, 4  ;;  %v2061_v0 = vmov (!%p1615_p5), 0.0  }
   0xf   : > { %s2119_s8 = scalar_lea.vmem %s2493_s0, %s1611_s28  ;;  %s2124_s12 = scalar_lea.vmem %s2494_s1, %s1767_s9  ;;  %297 = vst [vmem:[#allocation2] sm:$0xff] (!%p1615_p5), %v2061_v0 }
  0x10   : > { %296 = sbr.rel (%p1615_p5) target bundleno = 23 (0x17), region = 52 }
  0x17 PF: > { %v1811_v1 = vld [vmem:[%s2124_s12 + $0x4] ss:$16 sps:$4 sm:$0xff]   ;;  %v1813_v2 = vld [vmem:[%s2124_s12 + $0xc] ss:$16 sps:$4 sm:$0xff]   ;;  %v1815_v3 = vld [vmem:[%s2124_s12] ss:$16 sps:$4 sm:$0xff]  }
  0x18   : > { %697 = vmatprep.subr.bf16.mxu0 %v1811_v1  ;;  %v1816_v4 = vld [vmem:[%s2124_s12 + $0x8] ss:$16 sps:$4 sm:$0xff]   ;;  %738 = vmatprep.subr.bf16.mxu1 %v1813_v2  ;;  %v1817_v5 = vld [vmem:[%s2124_s12 + $0x24] ss:$16 sps:$4 sm:$0xff]   ;;  %v1819_v6 = vld [vmem:[%s2124_s12 + $0x2c] ss:$16 sps:$4 sm:$0xff]  }
  0x19   : > { %698 = vmatpush1.bf16.msra.mxu0 %v1815_v3  ;;  %739 = vmatpush1.bf16.msra.mxu1 %v1816_v4  ;;  %v1821_v7 = vld [vmem:[%s2124_s12 + $0x20] ss:$16 sps:$4 sm:$0xff]   ;;  %v1822_v8 = vld [vmem:[%s2124_s12 + $0x28] ss:$16 sps:$4 sm:$0xff]   ;;  %v1823_v9 = vld [vmem:[%s2124_s12 + $0x44] ss:$16 sps:$4 sm:$0xff]  }
  0x1a   : > { %699 = vmatprep.subr.bf16.mxu0 %v1817_v5  ;;  %740 = vmatprep.subr.bf16.mxu1 %v1819_v6  ;;  %v1825_v10 = vld [vmem:[%s2124_s12 + $0x4c] ss:$16 sps:$4 sm:$0xff]   ;;  %v1827_v11 = vld [vmem:[%s2124_s12 + $0x40] ss:$16 sps:$4 sm:$0xff]   ;;  %v1828_v12 = vld [vmem:[%s2124_s12 + $0x48] ss:$16 sps:$4 sm:$0xff]  }
  0x1b   : > { %v1829_v13 = vld [vmem:[%s2124_s12 + $0x64] ss:$16 sps:$4 sm:$0xff]   ;;  %v1831_v14 = vld [vmem:[%s2124_s12 + $0x6c] ss:$16 sps:$4 sm:$0xff]   ;;  %v1833_v15 = vld [vmem:[%s2124_s12 + $0x60] ss:$16 sps:$4 sm:$0xff]  }
  0x1c   : > { %v1834_v16 = vld [vmem:[%s2124_s12 + $0x68] ss:$16 sps:$4 sm:$0xff]   ;;  %v1835_v17 = vld [vmem:[%s2124_s12 + $0x84] ss:$16 sps:$4 sm:$0xff]   ;;  %v1837_v18 = vld [vmem:[%s2124_s12 + $0x8c] ss:$16 sps:$4 sm:$0xff]  }
  0x1d   : > { %700 = vmatpush1.bf16.msra.mxu0 %v1821_v7  ;;  %741 = vmatpush1.bf16.msra.mxu1 %v1822_v8  ;;  %v1839_v19 = vld [vmem:[%s2124_s12 + $0x80] ss:$16 sps:$4 sm:$0xff]   ;;  %v1840_v20 = vld [vmem:[%s2124_s12 + $0x88] ss:$16 sps:$4 sm:$0xff]   ;;  %v1841_v21 = vld [vmem:[%s2124_s12 + $0xa4] ss:$16 sps:$4 sm:$0xff]   ;;  %v788_v7 = vlaneseq }
  0x1e   : > { %701 = vmatprep.subr.bf16.mxu0 %v1823_v9  ;;  %742 = vmatprep.subr.bf16.mxu1 %v1825_v10  ;;  %v1843_v22 = vld [vmem:[%s2124_s12 + $0xac] ss:$16 sps:$4 sm:$0xff]   ;;  %v1845_v23 = vld [vmem:[%s2124_s12 + $0xa0] ss:$16 sps:$4 sm:$0xff]   ;;  %v1846_v24 = vld [vmem:[%s2124_s12 + $0xa8] ss:$16 sps:$4 sm:$0xff]  }
  0x1f   : > { %v1847_v25 = vld [vmem:[%s2124_s12 + $0xc4] ss:$16 sps:$4 sm:$0xff]   ;;  %v1849_v26 = vld [vmem:[%s2124_s12 + $0xcc] ss:$16 sps:$4 sm:$0xff]   ;;  %v1851_v27 = vld [vmem:[%s2124_s12 + $0xc0] ss:$16 sps:$4 sm:$0xff]  }
  0x20   : > { %v1852_v28 = vld [vmem:[%s2124_s12 + $0xc8] ss:$16 sps:$4 sm:$0xff]   ;;  %v1853_v29 = vld [vmem:[%s2124_s12 + $0xe4] ss:$16 sps:$4 sm:$0xff]   ;;  %v1855_v30 = vld [vmem:[%s2124_s12 + $0xec] ss:$16 sps:$4 sm:$0xff]  }
  0x21   : > { %702 = vmatpush1.bf16.msra.mxu0 %v1827_v11  ;;  %743 = vmatpush1.bf16.msra.mxu1 %v1828_v12  ;;  %v1857_v31 = vld [vmem:[%s2124_s12 + $0xe0] ss:$16 sps:$4 sm:$0xff]   ;;  %v1858_v32 = vld [vmem:[%s2124_s12 + $0xe8] ss:$16 sps:$4 sm:$0xff]   ;;  %v1859_v33 = vld [vmem:[%s2124_s12 + $0x104] ss:$16 sps:$4 sm:$0xff]  }
  0x22   : > { %703 = vmatprep.subr.bf16.mxu0 %v1829_v13  ;;  %744 = vmatprep.subr.bf16.mxu1 %v1831_v14  ;;  %v1861_v34 = vld [vmem:[%s2124_s12 + $0x10c] ss:$16 sps:$4 sm:$0xff]   ;;  %v1863_v35 = vld [vmem:[%s2124_s12 + $0x100] ss:$16 sps:$4 sm:$0xff]   ;;  %v1864_v36 = vld [vmem:[%s2124_s12 + $0x108] ss:$16 sps:$4 sm:$0xff]  }
  0x23   : > { %v1865_v37 = vld [vmem:[%s2124_s12 + $0x124] ss:$16 sps:$4 sm:$0xff]   ;;  %v1867_v38 = vld [vmem:[%s2124_s12 + $0x12c] ss:$16 sps:$4 sm:$0xff]   ;;  %v1869_v39 = vld [vmem:[%s2124_s12 + $0x120] ss:$16 sps:$4 sm:$0xff]  }
  0x24   : > { %v1870_v40 = vld [vmem:[%s2124_s12 + $0x128] ss:$16 sps:$4 sm:$0xff]   ;;  %v1871_v41 = vld [vmem:[%s2124_s12 + $0x144] ss:$16 sps:$4 sm:$0xff]   ;;  %v1873_v42 = vld [vmem:[%s2124_s12 + $0x14c] ss:$16 sps:$4 sm:$0xff]  }
  0x25   : > { %704 = vmatpush1.bf16.msra.mxu0 %v1833_v15  ;;  %745 = vmatpush1.bf16.msra.mxu1 %v1834_v16  ;;  %v1875_v43 = vld [vmem:[%s2124_s12 + $0x140] ss:$16 sps:$4 sm:$0xff]   ;;  %v1876_v44 = vld [vmem:[%s2124_s12 + $0x148] ss:$16 sps:$4 sm:$0xff]   ;;  %v1877_v45 = vld [vmem:[%s2124_s12 + $0x164] ss:$16 sps:$4 sm:$0xff]  }
  0x26   : > { %705 = vmatprep.subr.bf16.mxu0 %v1835_v17  ;;  %746 = vmatprep.subr.bf16.mxu1 %v1837_v18  ;;  %v1879_v46 = vld [vmem:[%s2124_s12 + $0x16c] ss:$16 sps:$4 sm:$0xff]   ;;  %v1616_v47 = vld.sshfl [vmem:[%s2119_s8] sm:$0x33 pattern:$0x76325410] }
  0x27   : > { %v1881_v48 = vld [vmem:[%s2124_s12 + $0x160] ss:$16 sps:$4 sm:$0xff]   ;;  %v1882_v49 = vld [vmem:[%s2124_s12 + $0x168] ss:$16 sps:$4 sm:$0xff]   ;;  %v308_v50 = vcombine.high %v1616_v47, %v1616_v47  ;;  %v1883_v51 = vld [vmem:[%s2124_s12 + $0x184] ss:$16 sps:$4 sm:$0xff]   ;;  %v311_v4 = vpack.c.bf16 %v1616_v47, %v1616_v47 }
  0x28   : > { %v1885_v52 = vld [vmem:[%s2124_s12 + $0x18c] ss:$16 sps:$4 sm:$0xff]   ;;  %v1887_v54 = vld [vmem:[%s2124_s12 + $0x180] ss:$16 sps:$4 sm:$0xff]   ;;  %v1888_v55 = vld [vmem:[%s2124_s12 + $0x188] ss:$16 sps:$4 sm:$0xff]  }
  0x29   : > { %706 = vmatpush1.bf16.msra.mxu0 %v1839_v19  ;;  %747 = vmatpush1.bf16.msra.mxu1 %v1840_v20  ;;  %v312_v53 = vpack.c.bf16 %v308_v50, %v308_v50  ;;  %v1889_v56 = vld [vmem:[%s2124_s12 + $0x1a4] ss:$16 sps:$4 sm:$0xff]   ;;  %v1891_v57 = vld [vmem:[%s2124_s12 + $0x1ac] ss:$16 sps:$4 sm:$0xff]   ;;  %v1893_v58 = vld [vmem:[%s2124_s12 + $0x1a0] ss:$16 sps:$4 sm:$0xff]  }
  0x2a   : > { %707 = vmatprep.subr.bf16.mxu0 %v1841_v21  ;;  %748 = vmatprep.subr.bf16.mxu1 %v1843_v22  ;;  %v1894_v59 = vld [vmem:[%s2124_s12 + $0x1a8] ss:$16 sps:$4 sm:$0xff]   ;;  %v1895_v60 = vld [vmem:[%s2124_s12 + $0x1c4] ss:$16 sps:$4 sm:$0xff]   ;;  %v1897_v61 = vld [vmem:[%s2124_s12 + $0x1cc] ss:$16 sps:$4 sm:$0xff]  }
  0x2b   : > { %729 = vmatprep.mubr.bf16.mxu0 %v312_v53  ;;  %770 = vmatprep.mubr.bf16.mxu1 %v312_v53  ;;  %v1899_v62 = vld [vmem:[%s2124_s12 + $0x1c0] ss:$16 sps:$4 sm:$0xff]   ;;  %v1900_v63 = vld [vmem:[%s2124_s12 + $0x1c8] ss:$16 sps:$4 sm:$0xff]   ;;  %v1901_v0 = vld [vmem:[%s2124_s12 + $0x1e4] ss:$16 sps:$4 sm:$0xff]  }
  0x2c   : > { %v1903_v1 = vld [vmem:[%s2124_s12 + $0x1ec] ss:$16 sps:$4 sm:$0xff]   ;;  %v1905_v2 = vld [vmem:[%s2124_s12 + $0x1e0] ss:$16 sps:$4 sm:$0xff]   ;;  %v1906_v3 = vld [vmem:[%s2124_s12 + $0x1e8] ss:$16 sps:$4 sm:$0xff]  }
  0x2d   : > { %708 = vmatpush1.bf16.msra.mxu0 %v1845_v23  ;;  %749 = vmatpush1.bf16.msra.mxu1 %v1846_v24  ;;  %v2062_v5 = vmov 1983009808   ;;  %v2193_v9 = vshrl.u32 %v788_v7, 7  ;;  %v298_v23 = vld [vmem:[#allocation2] sm:$0xff]  ;;  %p1681_p6 = scmp.ne.s32.totalorder %s2110_s25, 3 }
  0x2e   : > { %709 = vmatprep.subr.bf16.mxu0 %v1847_v25  ;;  %750 = vmatprep.subr.bf16.mxu1 %v1849_v26  ;;  %v786_v6 = vunpack.c.l.s4 %v2062_v5  ;;  %v1907_v26 = vld [vmem:[%s2496_s3 + $0x4] ss:$8 sps:$4 sm:$0xff] (!%p1681_p6)   ;;  %v1939_v47 = vld [vmem:[%s2496_s3 + $0x154] ss:$8 sps:$4 sm:$0xff] (!%p1681_p6)   ;;  %v1948_v53 = vld [vmem:[%s2496_s3 + $0x160] ss:$8 sps:$4 sm:$0xff] (!%p1681_p6)  }
  0x2f   : > { %v1943_v50 = vld [vmem:[%s2496_s3 + $0x64] ss:$8 sps:$4 sm:$0xff] (!%p1681_p6)   ;;  %v1972_v5 = vld [vmem:[%s2496_s3 + $0x1a0] ss:$8 sps:$4 sm:$0xff] (!%p1681_p6)   ;;  %vm1533_vm1 = vcmask (!%p1681_p6), 1041408  }
  0x30   : > { %v787_v8 = vunpack.c.0.s8 %v786_v6  ;;  %v812_v6 = vsub.s32 (!%p1681_p6), 0, %v2193_v9 }
  0x31   : > { %710 = vmatpush1.bf16.msra.mxu0 %v1851_v27  ;;  %751 = vmatpush1.bf16.msra.mxu1 %v1852_v28  ;;  %v1909_v27 = vld [vmem:[%s2496_s3 + $0x104] ss:$8 sps:$4 sm:$0xff] (!%p1681_p6)   ;;  %v1911_v28 = vld [vmem:[%s2496_s3] ss:$8 sps:$4 sm:$0xff] (!%p1681_p6)  }
  0x32   : > { %711 = vmatprep.subr.bf16.mxu0 %v1853_v29  ;;  %752 = vmatprep.subr.bf16.mxu1 %v1855_v30  ;;  %v2196_v12 = vsub.s32 %v787_v8, %v2193_v9  ;;  %v1912_v29 = vld [vmem:[%s2496_s3 + $0x100] ss:$8 sps:$4 sm:$0xff] (!%p1681_p6)   ;;  %v1913_v30 = vld [vmem:[%s2496_s3 + $0x14] ss:$8 sps:$4 sm:$0xff] (!%p1681_p6)  }
  0x33   : > { %v1973_v8 = vld [vmem:[%s2496_s3 + $0xb4] ss:$8 sps:$4 sm:$0xff] (!%p1681_p6)  }
  0x35   : > { %712 = vmatpush1.bf16.msra.mxu0 %v1857_v31  ;;  %753 = vmatpush1.bf16.msra.mxu1 %v1858_v32  ;;  %v1915_v31 = vld [vmem:[%s2496_s3 + $0x114] ss:$8 sps:$4 sm:$0xff] (!%p1681_p6)   ;;  %v1917_v32 = vld [vmem:[%s2496_s3 + $0x10] ss:$8 sps:$4 sm:$0xff] (!%p1681_p6)  }
  0x36   : > { %713 = vmatprep.subr.bf16.mxu0 %v1859_v33  ;;  %754 = vmatprep.subr.bf16.mxu1 %v1861_v34  ;;  %v1918_v33 = vld [vmem:[%s2496_s3 + $0x110] ss:$8 sps:$4 sm:$0xff] (!%p1681_p6)   ;;  %v1919_v34 = vld [vmem:[%s2496_s3 + $0x24] ss:$8 sps:$4 sm:$0xff] (!%p1681_p6)  }
  0x39   : > { %714 = vmatpush1.bf16.msra.mxu0 %v1863_v35  ;;  %755 = vmatpush1.bf16.msra.mxu1 %v1864_v36  ;;  %v1921_v35 = vld [vmem:[%s2496_s3 + $0x124] ss:$8 sps:$4 sm:$0xff] (!%p1681_p6)   ;;  %v1923_v36 = vld [vmem:[%s2496_s3 + $0x20] ss:$8 sps:$4 sm:$0xff] (!%p1681_p6)  }
  0x3a   : > { %715 = vmatprep.subr.bf16.mxu0 %v1865_v37  ;;  %756 = vmatprep.subr.bf16.mxu1 %v1867_v38  ;;  %v1924_v37 = vld [vmem:[%s2496_s3 + $0x120] ss:$8 sps:$4 sm:$0xff] (!%p1681_p6)   ;;  %v1925_v38 = vld [vmem:[%s2496_s3 + $0x34] ss:$8 sps:$4 sm:$0xff] (!%p1681_p6)  }
  0x3d   : > { %716 = vmatpush1.bf16.msra.mxu0 %v1869_v39  ;;  %757 = vmatpush1.bf16.msra.mxu1 %v1870_v40  ;;  %v1927_v39 = vld [vmem:[%s2496_s3 + $0x134] ss:$8 sps:$4 sm:$0xff] (!%p1681_p6)   ;;  %v1929_v40 = vld [vmem:[%s2496_s3 + $0x30] ss:$8 sps:$4 sm:$0xff] (!%p1681_p6)  }
  0x3e   : > { %717 = vmatprep.subr.bf16.mxu0 %v1871_v41  ;;  %758 = vmatprep.subr.bf16.mxu1 %v1873_v42  ;;  %v1930_v41 = vld [vmem:[%s2496_s3 + $0x130] ss:$8 sps:$4 sm:$0xff] (!%p1681_p6)   ;;  %v1931_v42 = vld [vmem:[%s2496_s3 + $0x44] ss:$8 sps:$4 sm:$0xff] (!%p1681_p6)  }
  0x41   : > { %718 = vmatpush1.bf16.msra.mxu0 %v1875_v43  ;;  %759 = vmatpush1.bf16.msra.mxu1 %v1876_v44  ;;  %v1933_v43 = vld [vmem:[%s2496_s3 + $0x144] ss:$8 sps:$4 sm:$0xff] (!%p1681_p6)   ;;  %v1935_v44 = vld [vmem:[%s2496_s3 + $0x40] ss:$8 sps:$4 sm:$0xff] (!%p1681_p6)  }
  0x42   : > { %719 = vmatprep.subr.bf16.mxu0 %v1877_v45  ;;  %760 = vmatprep.subr.bf16.mxu1 %v1879_v46  ;;  %v1936_v45 = vld [vmem:[%s2496_s3 + $0x140] ss:$8 sps:$4 sm:$0xff] (!%p1681_p6)   ;;  %v1937_v46 = vld [vmem:[%s2496_s3 + $0x54] ss:$8 sps:$4 sm:$0xff] (!%p1681_p6)  }
  0x45   : > { %720 = vmatpush1.bf16.msra.mxu0 %v1881_v48  ;;  %761 = vmatpush1.bf16.msra.mxu1 %v1882_v49  ;;  %v1941_v48 = vld [vmem:[%s2496_s3 + $0x50] ss:$8 sps:$4 sm:$0xff] (!%p1681_p6)  }
  0x46   : > { %721 = vmatprep.subr.bf16.mxu0 %v1883_v51  ;;  %762 = vmatprep.subr.bf16.mxu1 %v1885_v52  ;;  %v1942_v49 = vld [vmem:[%s2496_s3 + $0x150] ss:$8 sps:$4 sm:$0xff] (!%p1681_p6)   ;;  %v1945_v51 = vld [vmem:[%s2496_s3 + $0x164] ss:$8 sps:$4 sm:$0xff] (!%p1681_p6)   ;;  %v1947_v52 = vld [vmem:[%s2496_s3 + $0x60] ss:$8 sps:$4 sm:$0xff] (!%p1681_p6)  }
  0x49   : > { %722 = vmatpush1.bf16.msra.mxu0 %v1887_v54  ;;  %763 = vmatpush1.bf16.msra.mxu1 %v1888_v55  ;;  %v1949_v54 = vld [vmem:[%s2496_s3 + $0x74] ss:$8 sps:$4 sm:$0xff] (!%p1681_p6)  }
  0x4a   : > { %723 = vmatprep.subr.bf16.mxu0 %v1889_v56  ;;  %764 = vmatprep.subr.bf16.mxu1 %v1891_v57  ;;  %v1951_v55 = vld [vmem:[%s2496_s3 + $0x174] ss:$8 sps:$4 sm:$0xff] (!%p1681_p6)   ;;  %v1953_v56 = vld [vmem:[%s2496_s3 + $0x70] ss:$8 sps:$4 sm:$0xff] (!%p1681_p6)  }
  0x4b   : > { %v1954_v57 = vld [vmem:[%s2496_s3 + $0x170] ss:$8 sps:$4 sm:$0xff] (!%p1681_p6)  }
  0x4d   : > { %724 = vmatpush1.bf16.msra.mxu0 %v1893_v58  ;;  %765 = vmatpush1.bf16.msra.mxu1 %v1894_v59  ;;  %v1955_v58 = vld [vmem:[%s2496_s3 + $0x84] ss:$8 sps:$4 sm:$0xff] (!%p1681_p6)  }
  0x4e   : > { %725 = vmatprep.subr.bf16.mxu0 %v1895_v60  ;;  %766 = vmatprep.subr.bf16.mxu1 %v1897_v61  ;;  %v1957_v59 = vld [vmem:[%s2496_s3 + $0x184] ss:$8 sps:$4 sm:$0xff] (!%p1681_p6)   ;;  %v1959_v60 = vld [vmem:[%s2496_s3 + $0x80] ss:$8 sps:$4 sm:$0xff] (!%p1681_p6)  }
  0x4f   : > { %v1960_v61 = vld [vmem:[%s2496_s3 + $0x180] ss:$8 sps:$4 sm:$0xff] (!%p1681_p6)  }
  0x51   : > { %726 = vmatpush1.bf16.msra.mxu0 %v1899_v62  ;;  %767 = vmatpush1.bf16.msra.mxu1 %v1900_v63  ;;  %v1961_v62 = vld [vmem:[%s2496_s3 + $0x94] ss:$8 sps:$4 sm:$0xff] (!%p1681_p6)  }
  0x52   : > { %727 = vmatprep.subr.bf16.mxu0 %v1901_v0  ;;  %768 = vmatprep.subr.bf16.mxu1 %v1903_v1  ;;  %v1963_v63 = vld [vmem:[%s2496_s3 + $0x194] ss:$8 sps:$4 sm:$0xff] (!%p1681_p6)   ;;  %v1965_v0 = vld [vmem:[%s2496_s3 + $0x90] ss:$8 sps:$4 sm:$0xff] (!%p1681_p6)  }
  0x53   : > { %v1966_v1 = vld [vmem:[%s2496_s3 + $0x190] ss:$8 sps:$4 sm:$0xff] (!%p1681_p6)  }
  0x55   : > { %728 = vmatpush1.bf16.msra.mxu0 %v1905_v2  ;;  %769 = vmatpush1.bf16.msra.mxu1 %v1906_v3  ;;  %v1967_v2 = vld [vmem:[%s2496_s3 + $0xa4] ss:$8 sps:$4 sm:$0xff] (!%p1681_p6)  }
  0x56   : > { %1268 = vmatprep.subr.bf16.mxu1 (!%p1681_p6), %v1907_v26  ;;  %1309 = vmatprep.subr.bf16.mxu0 (!%p1681_p6), %v1909_v27  ;;  %v1969_v3 = vld [vmem:[%s2496_s3 + $0x1a4] ss:$8 sps:$4 sm:$0xff] (!%p1681_p6)   ;;  %v1984_v26 = vld [vmem:[%s2496_s3 + $0x1c0] ss:$8 sps:$4 sm:$0xff] (!%p1681_p6)  }
  0x58   : > { %730 = vmatmul.mubr.bf16.vlgmr.msra.gmra.mrb[0].mxu0 %v311_v4  ;;  %771 = vmatmul.mubr.bf16.vlgmr.msra.gmra.mrb[0].mxu1 %v311_v4  ;;  %v1971_v4 = vld [vmem:[%s2496_s3 + $0xa0] ss:$8 sps:$4 sm:$0xff] (!%p1681_p6)  }
  0x59   : > { %1269 = vmatpush1.bf16.msra.mxu1 (!%p1681_p6), %v1911_v28  ;;  %1310 = vmatpush1.bf16.msra.mxu0 (!%p1681_p6), %v1912_v29  ;;  %v1985_v28 = vld [vmem:[%s2496_s3 + $0xd4] ss:$8 sps:$4 sm:$0xff] (!%p1681_p6)  }
  0x5a   : > { %1270 = vmatprep.subr.bf16.mxu1 (!%p1681_p6), %v1913_v30  ;;  %1311 = vmatprep.subr.bf16.mxu0 (!%p1681_p6), %v1915_v31  ;;  %v1987_v30 = vld [vmem:[%s2496_s3 + $0x1d4] ss:$8 sps:$4 sm:$0xff] (!%p1681_p6)  }
  0x5d   : > { %1271 = vmatpush1.bf16.msra.mxu1 (!%p1681_p6), %v1917_v32  ;;  %1312 = vmatpush1.bf16.msra.mxu0 (!%p1681_p6), %v1918_v33  ;;  %v1989_v32 = vld [vmem:[%s2496_s3 + $0xd0] ss:$8 sps:$4 sm:$0xff] (!%p1681_p6)  }
  0x5e   : > { %1272 = vmatprep.subr.bf16.mxu1 (!%p1681_p6), %v1919_v34  ;;  %1313 = vmatprep.subr.bf16.mxu0 (!%p1681_p6), %v1921_v35  ;;  %v1990_v34 = vld [vmem:[%s2496_s3 + $0x1d0] ss:$8 sps:$4 sm:$0xff] (!%p1681_p6)  }
  0x61   : > { %1273 = vmatpush1.bf16.msra.mxu1 (!%p1681_p6), %v1923_v36  ;;  %1314 = vmatpush1.bf16.msra.mxu0 (!%p1681_p6), %v1924_v37  ;;  %v1991_v36 = vld [vmem:[%s2496_s3 + $0xe4] ss:$8 sps:$4 sm:$0xff] (!%p1681_p6)  }
  0x62   : > { %1274 = vmatprep.subr.bf16.mxu1 (!%p1681_p6), %v1925_v38  ;;  %1315 = vmatprep.subr.bf16.mxu0 (!%p1681_p6), %v1927_v39  ;;  %v1993_v37 = vld [vmem:[%s2496_s3 + $0x1e4] ss:$8 sps:$4 sm:$0xff] (!%p1681_p6)   ;;  %v1995_v39 = vld [vmem:[%s2496_s3 + $0xe0] ss:$8 sps:$4 sm:$0xff] (!%p1681_p6)  }
  0x65   : > { %1275 = vmatpush1.bf16.msra.mxu1 (!%p1681_p6), %v1929_v40  ;;  %1316 = vmatpush1.bf16.msra.mxu0 (!%p1681_p6), %v1930_v41  ;;  %v1996_v40 = vld [vmem:[%s2496_s3 + $0x1e0] ss:$8 sps:$4 sm:$0xff] (!%p1681_p6)   ;;  %v1997_v41 = vld [vmem:[%s2496_s3 + $0xf4] ss:$8 sps:$4 sm:$0xff] (!%p1681_p6)  }
  0x66   : > { %1276 = vmatprep.subr.bf16.mxu1 (!%p1681_p6), %v1931_v42  ;;  %1317 = vmatprep.subr.bf16.mxu0 (!%p1681_p6), %v1933_v43  ;;  %v1999_v42 = vld [vmem:[%s2496_s3 + $0x1f4] ss:$8 sps:$4 sm:$0xff] (!%p1681_p6)  }
  0x69   : > { %1277 = vmatpush1.bf16.msra.mxu1 (!%p1681_p6), %v1935_v44  ;;  %1318 = vmatpush1.bf16.msra.mxu0 (!%p1681_p6), %v1936_v45 }
  0x6a   : > { %1278 = vmatprep.subr.bf16.mxu1 (!%p1681_p6), %v1937_v46  ;;  %1319 = vmatprep.subr.bf16.mxu0 (!%p1681_p6), %v1939_v47 }
  0x6d   : > { %1279 = vmatpush1.bf16.msra.mxu1 (!%p1681_p6), %v1941_v48  ;;  %1320 = vmatpush1.bf16.msra.mxu0 (!%p1681_p6), %v1942_v49  ;;  %v2001_v48 = vld [vmem:[%s2496_s3 + $0xf0] ss:$8 sps:$4 sm:$0xff] (!%p1681_p6)  }
  0x6e   : > { %1280 = vmatprep.subr.bf16.mxu1 (!%p1681_p6), %v1943_v50  ;;  %1321 = vmatprep.subr.bf16.mxu0 (!%p1681_p6), %v1945_v51  ;;  %v2002_v49 = vld [vmem:[%s2496_s3 + $0x1f0] ss:$8 sps:$4 sm:$0xff] (!%p1681_p6)  }
  0x71   : > { %1281 = vmatpush1.bf16.msra.mxu1 (!%p1681_p6), %v1947_v52  ;;  %1322 = vmatpush1.bf16.msra.mxu0 (!%p1681_p6), %v1948_v53  ;;  %v2003_v52 = vld [vmem:[%s2498_s5 + $0x40] sm:$0xff] (!%p1681_p6)  }
  0x72   : > { %1282 = vmatprep.subr.bf16.mxu1 (!%p1681_p6), %v1949_v54  ;;  %1323 = vmatprep.subr.bf16.mxu0 (!%p1681_p6), %v1951_v55  ;;  %v2004_v55 = vld [vmem:[%s2498_s5] sm:$0xff] (!%p1681_p6)  }
  0x75   : > { %1283 = vmatpush1.bf16.msra.mxu1 (!%p1681_p6), %v1953_v56  ;;  %1324 = vmatpush1.bf16.msra.mxu0 (!%p1681_p6), %v1954_v57  ;;  %v2005_v56 = vld [vmem:[%s2498_s5 + $0x48] sm:$0xff] (!%p1681_p6)  }
  0x76   : > { %1284 = vmatprep.subr.bf16.mxu1 (!%p1681_p6), %v1955_v58  ;;  %1325 = vmatprep.subr.bf16.mxu0 (!%p1681_p6), %v1957_v59  ;;  %v2006_v57 = vld [vmem:[%s2498_s5 + $0x8] sm:$0xff] (!%p1681_p6)   ;;  %v2007_v58 = vld [vmem:[%s2498_s5 + $0x50] sm:$0xff] (!%p1681_p6)  }
  0x77   : > { %v2008_v59 = vld [vmem:[%s2498_s5 + $0x10] sm:$0xff] (!%p1681_p6)  }
  0x79   : > { %1285 = vmatpush1.bf16.msra.mxu1 (!%p1681_p6), %v1959_v60  ;;  %1326 = vmatpush1.bf16.msra.mxu0 (!%p1681_p6), %v1960_v61  ;;  %v2009_v60 = vld [vmem:[%s2498_s5 + $0x58] sm:$0xff] (!%p1681_p6)  }
  0x7a   : > { %1286 = vmatprep.subr.bf16.mxu1 (!%p1681_p6), %v1961_v62  ;;  %1327 = vmatprep.subr.bf16.mxu0 (!%p1681_p6), %v1963_v63  ;;  %v2010_v61 = vld [vmem:[%s2498_s5 + $0x18] sm:$0xff] (!%p1681_p6)   ;;  %v2011_v62 = vld [vmem:[%s2498_s5 + $0x60] sm:$0xff] (!%p1681_p6)  }
  0x7b   : > { %v2012_v63 = vld [vmem:[%s2498_s5 + $0x20] sm:$0xff] (!%p1681_p6)  }
  0x7d   : > { %1287 = vmatpush1.bf16.msra.mxu1 (!%p1681_p6), %v1965_v0  ;;  %1328 = vmatpush1.bf16.msra.mxu0 (!%p1681_p6), %v1966_v1  ;;  %v2013_v0 = vld [vmem:[%s2498_s5 + $0x68] sm:$0xff] (!%p1681_p6)  }
  0x7e   : > { %1288 = vmatprep.subr.bf16.mxu1 (!%p1681_p6), %v1967_v2  ;;  %1329 = vmatprep.subr.bf16.mxu0 (!%p1681_p6), %v1969_v3  ;;  %v2014_v1 = vld [vmem:[%s2498_s5 + $0x28] sm:$0xff] (!%p1681_p6)   ;;  %v2015_v2 = vld [vmem:[%s2498_s5 + $0x70] sm:$0xff] (!%p1681_p6)  }
  0x7f   : > { %v2016_v3 = vld [vmem:[%s2498_s5 + $0x30] sm:$0xff] (!%p1681_p6)  }
  0x81   : > { %1289 = vmatpush1.bf16.msra.mxu1 (!%p1681_p6), %v1971_v4  ;;  %1330 = vmatpush1.bf16.msra.mxu0 (!%p1681_p6), %v1972_v5  ;;  %v2017_v4 = vld [vmem:[%s2498_s5 + $0x78] sm:$0xff] (!%p1681_p6)  }
  0x82   : > { %1290 = vmatprep.subr.bf16.mxu1 (!%p1681_p6), %v1973_v8  ;;  %v2018_v5 = vld [vmem:[%s2498_s5 + $0x38] sm:$0xff] (!%p1681_p6)   ;;  %v936_v8 = vld [vmem:[%s2497_s4] sm:$0x3] (!%p1681_p6) }
 0x12b   : > { %v731_v10 = vpop.f32.mrb[0].mxu0  ;;  %v772_v11 = vpop.f32.mrb[0].mxu1 }
 0x12c   : > { %v733_v13 = vpop.f32.mrb[1].mxu0  ;;  %v774_v14 = vpop.f32.mrb[1].mxu1 }
 0x12d   : > { %v783_v15 = vcombine.low %v731_v10, %v733_v13  ;;  %v784_v16 = vcombine.low %v772_v11, %v774_v14  ;;  %v735_v17 = vpop.f32.mrb[2].mxu0  ;;  %v776_v18 = vpop.f32.mrb[2].mxu1  ;;  %v816_v10 = vsub.s32 (!%p1681_p6), 1, %v2193_v9  ;;  %v820_v11 = vsub.s32 (!%p1681_p6), 2, %v2193_v9  ;;  %v1975_v13 = vld [vmem:[%s2496_s3 + $0x1b4] ss:$8 sps:$4 sm:$0xff] (!%p1681_p6)  }
 0x12e   : > { %v736_v19 = vpop.f32.mrb[3].mxu0  ;;  %v777_v20 = vpop.f32.mrb[3].mxu1  ;;  %v824_v14 = vsub.s32 (!%p1681_p6), 3, %v2193_v9  ;;  %v808_v17 = vld [vmem:[%s2495_s2] sm:$0xf] (!%p1681_p6)  ;;  %1331 = vmatprep.subr.bf16.mxu0 (!%p1681_p6), %v1975_v13  ;;  %v1530_v9 = vand.u32 (!%p1681_p6), 127, %v788_v7 }
 0x12f   : > { %v791_v21 = vrot.slane %v783_v15, %v2196_v12  ;;  %v798_v22 = vrot.slane %v784_v16, %v2196_v12  ;;  %806 = sbr.rel (%p1681_p6) target bundleno = 1086 (0x43e), region = 56  ;;  %v1977_v15 = vld [vmem:[%s2496_s3 + $0xb0] ss:$8 sps:$4 sm:$0xff] (!%p1681_p6)   ;;  %v1979_v18 = vld [vmem:[%s2496_s3 + $0xc4] ss:$8 sps:$4 sm:$0xff] (!%p1681_p6)   ;;  %v813_v19 = vrot.slane (!%p1681_p6), %v808_v17, %v812_v6  ;;  %v817_v20 = vrot.slane (!%p1681_p6), %v808_v17, %v816_v10 }
 0x130   : > { %v1978_v16 = vld [vmem:[%s2496_s3 + $0x1b0] ss:$8 sps:$4 sm:$0xff] (!%p1681_p6)   ;;  %1291 = vmatpush1.bf16.msra.mxu1 (!%p1681_p6), %v1977_v15  ;;  %v945_v13 = vrot.slane (!%p1681_p6), %v936_v8, %v816_v10  ;;  %v1746_v10 = vld [vmem:[%s2499_s6] ss:$0 sm:$0xff] (!%p1681_p6)  ;;  %vm1531_vm0 = vcmp.lt.s32.totalorder (!%p1681_p6), %v1530_v9, 2 }
 0x131   : > { %v799_v24 = vcombine.low %v791_v21, %v798_v22  ;;  %v821_v21 = vrot.slane (!%p1681_p6), %v808_v17, %v820_v11  ;;  %v1981_v22 = vld [vmem:[%s2496_s3 + $0x1c4] ss:$8 sps:$4 sm:$0xff] (!%p1681_p6)   ;;  %1332 = vmatpush1.bf16.msra.mxu0 (!%p1681_p6), %v1978_v16  ;;  %1292 = vmatprep.subr.bf16.mxu1 (!%p1681_p6), %v1979_v18  ;;  %v941_v11 = vrot.slane (!%p1681_p6), %v936_v8, %v812_v6 }
 0x132   : > { %1333 = vmatprep.subr.bf16.mxu0 (!%p1681_p6), %v1981_v22 }
 0x133   : > { %v801_v25 = vadd.f32 %v799_v24, %v298_v23  ;;  %v825_v23 = vrot.slane (!%p1681_p6), %v808_v17, %v824_v14  ;;  %v1983_v24 = vld [vmem:[%s2496_s3 + $0xc0] ss:$8 sps:$4 sm:$0xff] (!%p1681_p6)  }
 0x134   : > { %1293 = vmatpush1.bf16.msra.mxu1 (!%p1681_p6), %v1983_v24 }
 0x135   : > { %802 = vst [vmem:[#allocation2] sm:$0xff] %v801_v25  ;;  %v826_v25 = vcombine.low (!%p1681_p6), %v813_v19, %v817_v20  ;;  %v827_v27 = vcombine.low (!%p1681_p6), %v821_v21, %v825_v23  ;;  %1334 = vmatpush1.bf16.msra.mxu0 (!%p1681_p6), %v1984_v26  ;;  %1294 = vmatprep.subr.bf16.mxu1 (!%p1681_p6), %v1985_v28 }
 0x136   : > { %1335 = vmatprep.subr.bf16.mxu0 %v1987_v30 }
 0x137   : > { %v834_v29 = vrot.slane %v826_v25, %v2196_v12  ;;  %v841_v31 = vrot.slane %v827_v27, %v2196_v12 }
 0x138   : > { %1295 = vmatpush1.bf16.msra.mxu1 %v1989_v32 }
 0x139   : > { %v842_v35 = vcombine.low %v834_v29, %v841_v31  ;;  %1336 = vmatpush1.bf16.msra.mxu0 %v1990_v34  ;;  %1296 = vmatprep.subr.bf16.mxu1 %v1991_v36 }
 0x13a   : > { %1337 = vmatprep.subr.bf16.mxu0 %v1993_v37 }
 0x13c   : > { %v807_v33 = vld [vmem:[#allocation2] sm:$0xff]  ;;  %1297 = vmatpush1.bf16.msra.mxu1 %v1995_v39 }
 0x13d   : > { %v844_v38 = vadd.f32 %v842_v35, %v807_v33  ;;  %1338 = vmatpush1.bf16.msra.mxu0 %v1996_v40  ;;  %1298 = vmatprep.subr.bf16.mxu1 %v1997_v41 }
 0x13e   : > { %1339 = vmatprep.subr.bf16.mxu0 %v1999_v42 }
 0x13f   : > { %v845_v43 = vmax.f32 %v844_v38, 0.0 }
 0x140   : > { %1299 = vmatpush1.bf16.msra.mxu1 %v2001_v48 }
 0x141   : > { %v854_v44 = vrot.slane %v845_v43, %v2196_v12  ;;  %v847_v45 = vcombine.high %v845_v43, %v845_v43  ;;  %1340 = vmatpush1.bf16.msra.mxu0 %v2002_v49  ;;  %1768 = vmatprep.subr.bf16.mxu1 %v2003_v52 }
 0x143   : > { %v862_v46 = vcombine.high %v854_v44, %v854_v44  ;;  %v861_v47 = vrot.slane %v847_v45, %v2196_v12  ;;  %v868_v53 = vpack.c.bf16 %v854_v44, %v854_v44 }
 0x145   : > { %v869_v50 = vpack.c.bf16 %v862_v46, %v862_v46  ;;  %v863_v51 = vcombine.high %v861_v47, %v861_v47  ;;  %v870_v54 = vpack.c.bf16 %v861_v47, %v861_v47 }
 0x147   : > { %1300 = vmatprep.mubr.bf16.mxu1 %v869_v50  ;;  %v871_v12 = vpack.c.bf16 %v863_v51, %v863_v51 }
 0x148   : > { %1301 = vmatmul.mubr.bf16.vlgmr.msra.gmra.mrb[0].mxu1 %v868_v53 }
 0x149   : > { %1341 = vmatprep.mubr.bf16.mxu0 %v871_v12  ;;  %1769 = vmatpush3.bf16.msra.mxu1 %v2004_v55 }
 0x14a   : > { %1342 = vmatmul.mubr.bf16.vlgmr.msra.gmra.mrb[0].mxu0 %v870_v54  ;;  %1770 = vmatprep.subr.bf16.mxu1 %v2005_v56 }
 0x14d   : > { %1771 = vmatpush3.bf16.msra.mxu1 %v2006_v57 }
 0x14e   : > { %1772 = vmatprep.subr.bf16.mxu1 %v2007_v58 }
 0x151   : > { %1773 = vmatpush3.bf16.msra.mxu1 %v2008_v59 }
 0x152   : > { %1774 = vmatprep.subr.bf16.mxu1 %v2009_v60 }
 0x155   : > { %1775 = vmatpush3.bf16.msra.mxu1 %v2010_v61 }
 0x156   : > { %1776 = vmatprep.subr.bf16.mxu1 %v2011_v62 }
 0x159   : > { %1777 = vmatpush3.bf16.msra.mxu1 %v2012_v63 }
 0x15a   : > { %1778 = vmatprep.subr.bf16.mxu1 %v2013_v0 }
 0x15d   : > { %1779 = vmatpush3.bf16.msra.mxu1 %v2014_v1 }
 0x15e   : > { %1780 = vmatprep.subr.bf16.mxu1 %v2015_v2 }
 0x161   : > { %1781 = vmatpush3.bf16.msra.mxu1 %v2016_v3 }
 0x162   : > { %1782 = vmatprep.subr.bf16.mxu1 %v2017_v4 }
 0x165   : > { %1783 = vmatpush3.bf16.msra.mxu1 %v2018_v5 }
 0x21b   : > { %v1302_v14 = vpop.f32.mrb[0].mxu1 }
 0x21c   : > { %v1303_v16 = vadd.f32 %v1302_v14, %v941_v11  ;;  %v1304_v17 = vpop.f32.mrb[1].mxu1 }
 0x21d   : > { %v1343_v15 = vpop.f32.mrb[0].mxu0  ;;  %v1305_v19 = vadd.f32 %v1304_v17, %v945_v13  ;;  %v1306_v20 = vpop.f32.mrb[2].mxu1 }
 0x21e   : > { %v1345_v18 = vpop.f32.mrb[1].mxu0  ;;  %v1344_v22 = vadd.f32 %v1343_v15, %v1303_v16  ;;  %v1307_v23 = vpop.f32.mrb[3].mxu1 }
 0x21f   : > { %v1347_v21 = vpop.f32.mrb[2].mxu0  ;;  %v1346_v25 = vadd.f32 %v1345_v18, %v1305_v19 }
 0x220   : > { %v1348_v24 = vpop.f32.mrb[3].mxu0  ;;  %v1350_v26 = vmax.f32 %v1344_v22, 0.0 }
 0x221   : > { %v1351_v27 = vmax.f32 %v1346_v25, 0.0 }
 0x222   : > { %v1352_v29 = vpack.c.bf16 %v1350_v26, %v1350_v26 }
 0x223   : > { %v1353_v28 = vpack.c.bf16 %v1351_v27, %v1351_v27 }
 0x225   : > { %1521 = vmatprep.mubr.bf16.mxu1 %v1353_v28 }
 0x226   : > { %1522 = vmatmul.mubr.bf16.vlgmr.msra.gmra.mrb[4].mxu1 %v1352_v29 }
 0x2f9   : > { %v1784_v6 = vpop.f32.mrb[4].mxu1 }
 0x2fa   : > { %v1785_v30 = vpop.f32.mrb[5].mxu1 }
 0x2fb   : > { %v1786_v31 = vadd.f32 %v1785_v30, %v1784_v6  ;;  %v1787_v32 = vpop.f32.mrb[6].mxu1 }
 0x2fc   : > { %v1788_v33 = vpop.f32.mrb[7].mxu1 }
 0x2fd   : > { %v1524_v34 = vadd.f32 %v1786_v31, %v1746_v10 }
 0x2ff   : > { %v1532_v35 = vsel %vm1531_vm0, %v1524_v34, -inf }
 0x300   : > { %v1534_v36 = vsel %vm1533_vm1, %v1532_v35, -inf }
 0x301   : > { %1535 = vmax.xlane.f32.xlu0 %v1534_v36 }
 0x38e   : > { %v1536_v37 = vpop.xlane.xlu0 %1535 }
 0x38f   : > { %v1537_v38 = vsub.f32 %v1532_v35, %v1536_v37 }
 0x391   : > { %v1538_v39 = vmul.f32 1.442695, %v1537_v38 }
 0x393   : > { %2019 = vpow2.f32 %v1538_v39 }
 0x39d   : > { %v2020_v7 = vpop.eup %2019 }
 0x39e   : > { %v1540_v40 = vsel %vm1531_vm0, %v2020_v7, 0.0 }
 0x39f   : > { %v1541_v41 = vsel %vm1533_vm1, %v1540_v40, 0.0 }
 0x3a0   : > { %1542 = vadd.xlane.f32.xlu0 %v1541_v41 }
 0x42d   : > { %v1543_v42 = vpop.xlane.xlu0 %1542 }
 0x42e   : > { %2021 = vlog2.f32 %v1543_v42 }
 0x438   : > { %v2022_v43 = vpop.eup %2021 }
 0x439   : > { %v1545_v44 = vmul.f32 0.6931472, %v2022_v43 }
 0x43b   : > { %v1546_v45 = vsub.f32 %v1537_v38, %v1545_v44 }
 0x43d   : > { %1547 = vst [vmem:[#allocation3] sm:$0x3] %v1546_v45 }
 0x43e PF: > { %p1798_p7 = scmp.eq.s32.totalorder %s2110_s25, 3  ;;  %s2063_s11 = smov [#allocation3]  }
 0x43f   : > { %s1555_s12 = sshll.u32 %s2063_s11, 4  ;;  %s1556_s12 = int_to_ptr.vmem [resolvable:$true] %s1555_s12 }
 0x440   : > { %s2023_s13 = scalar_lea.vmem %s1556_s12, 32  ;;  %p2030_p11 = scmp.lt.s32.totalorder %s1556_s12, %s1556_s12 }
 0x441   : > { %p2024_p8 = scmp.ne.s32.totalorder %s1556_s12, %s2023_s13  ;;  %p2031_p12 = scmp.lt.s32.totalorder %s2023_s13, %s2023_s13 }
 0x443   : > { %p2025_p9 = pnand %p2024_p8, %p1798_p7  ;;  %p2032_p13 = por %p2031_p12, %p2030_p11 }
 0x445   : > { %p2026_p10 = pneg %p2025_p9 }
 0x447   : > { %p2033_p0 = pnand %p2032_p13, %p2026_p10 }
 0x449   : > { %2036 = shalt.err (!%p2033_p0)
}
 0x44a   : > { %s2037_s16 = scalar_lea.hbm %s2500_s7, 32 }
 0x44b   : > { %p2038_p1 = scmp.ne.s32.totalorder %s2500_s7, %s2037_s16  ;;  %p2043_p4 = scmp.lt.u32.totalorder %s2037_s16, %s2500_s7 }
 0x44d   : > { %p2039_p2 = pnand %p2038_p1, %p1798_p7 }
 0x44f   : > { %p2040_p3 = pneg %p2039_p2 }
 0x451   : > { %p2045_p5 = pnand %p2043_p4, %p2040_p3 }
 0x453   : > { %2048 = shalt.err (!%p2045_p5)
}
 0x454   : > { %1795 = dma.vmem_to_hbm [thread:$0]  (%p1798_p7), %s1556_s12, 32, %s2500_s7, [#allocation4]  }
 0x455   : > { %2054 = dma.done.wait (%p1798_p7), [#allocation4], 32  }
 0x456   : > { %2056 = vsyncadd (%p1798_p7), [#allocation4], 4294967264 }
 0x457 PF: > { %s18_s24 = sadd.s32 1, %s2059_s24  }
 0x458   : > { %p15_p6 = scmp.ge.s32.totalorder %s18_s24, 6  }
 0x45a   :  { %17 = sbr.rel (!%p15_p6) target bundleno = 1 (0x1), region = 86 }
 0x461   :  { %1568 = vsyncpa [#allocation4], 1 }
 0x462   :  { %1570 = vsyncpa [#allocation4 + $0x1], 1 }

</bundles_post_ra>
